<compile_context>
chip_gen: v7x
topology: tpu7x:2x2x1
jax: 0.10.0
libtpu: 0.0.40
codegen_flags: <defaults>
</compile_context>

<pallas_src>
import functools
import math

import jax
import jax.numpy as jnp
from jax.experimental import pallas as pl
from jax.experimental.pallas import tpu as pltpu


# ----------------------------------------------------------------------------- helpers

def positional_encoding(length: int, d_model: int) -> jax.Array:
    position = jnp.arange(length, dtype=jnp.float32)[:, None]
    div_term = jnp.exp(
        jnp.arange(0, d_model, 2, dtype=jnp.float32) * (-math.log(10000.0) / d_model)
    )
    pe = jnp.zeros((length, d_model), jnp.float32)
    pe = pe.at[:, 0::2].set(jnp.sin(position * div_term))
    pe = pe.at[:, 1::2].set(jnp.cos(position * div_term))
    return pe


def _ln(x, g, b, eps):
    mu = jnp.mean(x, axis=-1, keepdims=True)
    xc = x - mu
    var = jnp.mean(xc * xc, axis=-1, keepdims=True)
    return xc * jax.lax.rsqrt(var + eps) * g + b


_PARALLEL = pltpu.CompilerParams(dimension_semantics=("parallel",))


def _row_spec(rows, cols):
    # one (rows, cols) block per batch element of the (B*rows, cols) slab
    return pl.BlockSpec((rows, cols), lambda b: (b, 0))


def _const_spec(shape):
    # full array, same block for every grid step (weights / biases / PE stay VMEM-resident)
    return pl.BlockSpec(shape, lambda b: (0, 0))


# ----------------------------------------------------------------------------- kernels

def _inproj_kernel(x_ref, w_ref, b_ref, g_ref, beta_ref, pe_ref, o_ref, *, eps):
    # x_ref: (L, F); w_ref: (F, D); b/g/beta: (1, D); pe_ref: (L, D); o_ref: (L, D)
    h = jnp.dot(x_ref[...], w_ref[...], preferred_element_type=jnp.float32) + b_ref[...]
    y = _ln(h, g_ref[...], beta_ref[...], eps) + pe_ref[...]
    o_ref[...] = y.astype(o_ref.dtype)


def _attn_block_kernel(h_ref, wqkv_ref, bqkv_ref, wo_ref, bo_ref, g_ref, beta_ref,
                       o_ref, *, nhead, eps):
    # Fused: QKV projection -> per-head softmax attention -> output projection
    #        -> residual add -> LayerNorm1.  One batch element per program.
    h = h_ref[...].astype(jnp.float32)                      # (L, D)
    D = h.shape[-1]
    dh = D // nhead
    scale = 1.0 / math.sqrt(dh)

    qkv = jnp.dot(h, wqkv_ref[...], preferred_element_type=jnp.float32) + bqkv_ref[...]  # (L, 3D)

    heads = []
    for hd in range(nhead):                                  # unrolled: nhead is tiny & static
        q = qkv[:, hd * dh:(hd + 1) * dh]                    # (L, dh)
        k = qkv[:, D + hd * dh:D + (hd + 1) * dh]
        v = qkv[:, 2 * D + hd * dh:2 * D + (hd + 1) * dh]
        s = jax.lax.dot_general(
            q, k, (((1,), (1,)), ((), ())), preferred_element_type=jnp.float32
        ) * scale                                            # (L, L)
        m = jnp.max(s, axis=-1, keepdims=True)
        p = jnp.exp(s - m)
        l = jnp.sum(p, axis=-1, keepdims=True)
        heads.append(jnp.dot(p, v, preferred_element_type=jnp.float32) / l)

    a = jnp.concatenate(heads, axis=-1)                      # (L, D): lane-dense, no transpose
    a = jnp.dot(a, wo_ref[...], preferred_element_type=jnp.float32) + bo_ref[...]
    o_ref[...] = _ln(h + a, g_ref[...], beta_ref[...], eps).astype(o_ref.dtype)


def _ffn_block_kernel(h_ref, w1_ref, b1_ref, w2_ref, b2_ref, g_ref, beta_ref, o_ref, *, eps):
    # Fused: FF1 + ReLU + FF2 + residual add + LayerNorm2.  One batch element per program.
    h = h_ref[...].astype(jnp.float32)                       # (L, D)
    f = jnp.maximum(
        jnp.dot(h, w1_ref[...], preferred_element_type=jnp.float32) + b1_ref[...], 0.0)
    f = jnp.dot(f, w2_ref[...], preferred_element_type=jnp.float32) + b2_ref[...]
    o_ref[...] = _ln(h + f, g_ref[...], beta_ref[...], eps).astype(o_ref.dtype)


# ----------------------------------------------------------------------------- pallas wrappers

def input_projection(x2d, w, b, g, beta, pe, *, B, L, eps=1e-5):
    F = x2d.shape[1]
    D = w.shape[1]
    return pl.pallas_call(
        functools.partial(_inproj_kernel, eps=eps),
        out_shape=jax.ShapeDtypeStruct((B * L, D), x2d.dtype),
        grid=(B,),
        in_specs=[
            _row_spec(L, F),
            _const_spec((F, D)),
            _const_spec((1, D)),
            _const_spec((1, D)),
            _const_spec((1, D)),
            _const_spec((L, D)),
        ],
        out_specs=_row_spec(L, D),
        compiler_params=_PARALLEL,
    )(x2d, w, b, g, beta, pe)


def attention_block(h, lyr, *, B, L, nhead, eps=1e-5):
    D = h.shape[1]
    return pl.pallas_call(
        functools.partial(_attn_block_kernel, nhead=nhead, eps=eps),
        out_shape=jax.ShapeDtypeStruct((B * L, D), h.dtype),
        grid=(B,),
        in_specs=[
            _row_spec(L, D),
            _const_spec((D, 3 * D)),
            _const_spec((1, 3 * D)),
            _const_spec((D, D)),
            _const_spec((1, D)),
            _const_spec((1, D)),
            _const_spec((1, D)),
        ],
        out_specs=_row_spec(L, D),
        compiler_params=_PARALLEL,
    )(h, lyr["w_qkv"], lyr["b_qkv"], lyr["w_o"], lyr["b_o"], lyr["ln1_g"], lyr["ln1_b"])


def ffn_block(h, lyr, *, B, L, eps=1e-5):
    D = h.shape[1]
    Fd = lyr["w_ff1"].shape[1]
    return pl.pallas_call(
        functools.partial(_ffn_block_kernel, eps=eps),
        out_shape=jax.ShapeDtypeStruct((B * L, D), h.dtype),
        grid=(B,),
        in_specs=[
            _row_spec(L, D),
            _const_spec((D, Fd)),
            _const_spec((1, Fd)),
            _const_spec((Fd, D)),
            _const_spec((1, D)),
            _const_spec((1, D)),
            _const_spec((1, D)),
        ],
        out_specs=_row_spec(L, D),
        compiler_params=_PARALLEL,
    )(h, lyr["w_ff1"], lyr["b_ff1"], lyr["w_ff2"], lyr["b_ff2"], lyr["ln2_g"], lyr["ln2_b"])


# ----------------------------------------------------------------------------- model forward

def transformer_forward(x, params, pe, *, nhead):
    """Pallas implementation of TransformerModel.forward (eval mode: dropout = identity)."""
    B, L, F = x.shape
    D = params["w_in"].shape[1]

    x2d = x.reshape(B * L, F)
    h = input_projection(
        x2d, params["w_in"], params["b_in"], params["ln_in_g"], params["ln_in_b"], pe,
        B=B, L=L)

    for lyr in params["layers"]:
        h = attention_block(h, lyr, B=B, L=L, nhead=nhead)
        h = ffn_block(h, lyr, B=B, L=L)

    # Final projection on the last timestep in plain XLA: at (B, D) x (D, pred_len) the
    # pallas_call launch overhead exceeds the compute (perf-review recommendation).
    last = h.reshape(B, L, D)[:, -1, :]
    return last @ params["w_out"] + params["b_out"]


# ----------------------------------------------------------------------------- params & reference

def init_params(key, feature_dim, d_model, nhead, num_layers, dim_feed, pred_len):
    keys = iter(jax.random.split(key, 64))

    def dense(shape, fan_in):
        return jax.random.normal(next(keys), shape, jnp.float32) / math.sqrt(fan_in)

    def bias(n):
        return 0.02 * jax.random.normal(next(keys), (1, n), jnp.float32)

    params = {
        "w_in": dense((feature_dim, d_model), feature_dim),
        "b_in": bias(d_model),
        "ln_in_g": jnp.ones((1, d_model), jnp.float32),
        "ln_in_b": jnp.zeros((1, d_model), jnp.float32),
        "w_out": dense((d_model, pred_len), d_model),
        "b_out": bias(pred_len),
        "layers": [],
    }
    for _ in range(num_layers):
        params["layers"].append({
            "w_qkv": dense((d_model, 3 * d_model), d_model),
            "b_qkv": bias(3 * d_model),
            "w_o": dense((d_model, d_model), d_model),
            "b_o": bias(d_model),
            "ln1_g": jnp.ones((1, d_model), jnp.float32),
            "ln1_b": jnp.zeros((1, d_model), jnp.float32),
            "w_ff1": dense((d_model, dim_feed), d_model),
            "b_ff1": bias(dim_feed),
            "w_ff2": dense((dim_feed, d_model), dim_feed),
            "b_ff2": bias(d_model),
            "ln2_g": jnp.ones((1, d_model), jnp.float32),
            "ln2_b": jnp.zeros((1, d_model), jnp.float32),
        })
    return params


def _reference_forward(x, params, pe, *, nhead):
    """Pure-JAX reference mirroring the PyTorch module (eval mode)."""
    B, L, F = x.shape
    D = params["w_in"].shape[1]
    dh = D // nhead

    def ln(z, g, b, eps=1e-5):
        mu = jnp.mean(z, axis=-1, keepdims=True)
        var = jnp.mean((z - mu) ** 2, axis=-1, keepdims=True)
        return (z - mu) / jnp.sqrt(var + eps) * g.reshape(1, 1, -1) + b.reshape(1, 1, -1)

    h = x @ params["w_in"] + params["b_in"].reshape(1, 1, -1)
    h = ln(h, params["ln_in_g"], params["ln_in_b"])
    h = h + pe[None]
    for lyr in params["layers"]:
        qkv = h @ lyr["w_qkv"] + lyr["b_qkv"].reshape(1, 1, -1)
        qkv = qkv.reshape(B, L, 3, nhead, dh)
        q = qkv[:, :, 0].transpose(0, 2, 1, 3)
        k = qkv[:, :, 1].transpose(0, 2, 1, 3)
        v = qkv[:, :, 2].transpose(0, 2, 1, 3)
        s = jnp.einsum("bhqd,bhkd->bhqk", q, k) / math.sqrt(dh)
        p = jax.nn.softmax(s, axis=-1)
        a = jnp.einsum("bhqk,bhkd->bhqd", p, v)
        a = a.transpose(0, 2, 1, 3).reshape(B, L, D)
        a = a @ lyr["w_o"] + lyr["b_o"].reshape(1, 1, -1)
        h = ln(h + a, lyr["ln1_g"], lyr["ln1_b"])
        f = jnp.maximum(h @ lyr["w_ff1"] + lyr["b_ff1"].reshape(1, 1, -1), 0.0)
        f = f @ lyr["w_ff2"] + lyr["b_ff2"].reshape(1, 1, -1)
        h = ln(h + f, lyr["ln2_g"], lyr["ln2_b"])
    last = h[:, -1, :]
    return last @ params["w_out"] + params["b_out"].reshape(1, -1)


# ----------------------------------------------------------------------------- main

if __name__ == "__main__":
    B, L = 2, 16
    FEATURE_DIM = 23   # len(feature_cols) in the original script
    D_MODEL, NHEAD, NUM_LAYERS, DIM_FEED, PRED_LEN = 256, 4, 2, 256, 96

    root = jax.random.PRNGKey(0)
    kx, kp = jax.random.split(root)
    x = jax.random.normal(kx, (B, L, FEATURE_DIM), dtype=jnp.float32)
    params = init_params(kp, FEATURE_DIM, D_MODEL, NHEAD, NUM_LAYERS, DIM_FEED, PRED_LEN)
    pe = positional_encoding(L, D_MODEL)   # computed once, passed in (no per-trace tile/rebuild)

    fwd = jax.jit(functools.partial(transformer_forward, nhead=NHEAD))
    out = jax.block_until_ready(fwd(x, params, pe))
    assert out.shape == (B, PRED_LEN), out.shape
    assert bool(jnp.all(jnp.isfinite(out))), "non-finite output"

    with jax.default_matmul_precision("highest"):
        ref = _reference_forward(x, params, pe, nhead=NHEAD)
    rel_err = float(jnp.max(jnp.abs(out - ref)) / (jnp.max(jnp.abs(ref)) + 1e-6))
    assert rel_err < 2e-3, f"mismatch vs reference: rel_err={rel_err}"

    print("KERNEL_OK")
</pallas_src>

<mosaic_0001>
module attributes {stable_mosaic.version = 11 : i64} {
  func.func @_ffn_block_kernel(%arg0: i32, %arg1: memref<16x256xf32, #tpu.memory_space<vmem>>, %arg2: memref<256x256xf32, #tpu.memory_space<vmem>>, %arg3: memref<1x256xf32, #tpu.memory_space<vmem>>, %arg4: memref<256x256xf32, #tpu.memory_space<vmem>>, %arg5: memref<1x256xf32, #tpu.memory_space<vmem>>, %arg6: memref<1x256xf32, #tpu.memory_space<vmem>>, %arg7: memref<1x256xf32, #tpu.memory_space<vmem>>, %arg8: memref<16x256xf32, #tpu.memory_space<vmem>>) attributes {dimension_semantics = [#tpu.dimension_semantics<parallel>], iteration_bounds = array<i64: 2>, scalar_prefetch = 0 : i64, scratch_operands = 0 : i64, tpu.core_type = #tpu.core_type<tc>, window_params = [{transform_indices = @transform_0, window_bounds = array<i64: 16, 256>}, {pipeline_mode = #tpu.pipeline_mode<synchronous>, transform_indices = @transform_1, window_bounds = array<i64: 256, 256>}, {pipeline_mode = #tpu.pipeline_mode<synchronous>, transform_indices = @transform_2, window_bounds = array<i64: 1, 256>}, {pipeline_mode = #tpu.pipeline_mode<synchronous>, transform_indices = @transform_3, window_bounds = array<i64: 256, 256>}, {pipeline_mode = #tpu.pipeline_mode<synchronous>, transform_indices = @transform_4, window_bounds = array<i64: 1, 256>}, {pipeline_mode = #tpu.pipeline_mode<synchronous>, transform_indices = @transform_5, window_bounds = array<i64: 1, 256>}, {pipeline_mode = #tpu.pipeline_mode<synchronous>, transform_indices = @transform_6, window_bounds = array<i64: 1, 256>}, {transform_indices = @transform_7, window_bounds = array<i64: 16, 256>}]} {
    %c0 = arith.constant 0 : index
    %c0_0 = arith.constant 0 : index
    %0 = vector.load %arg1[%c0, %c0_0] : memref<16x256xf32, #tpu.memory_space<vmem>>, vector<16x256xf32>
    %c0_1 = arith.constant 0 : index
    %c0_2 = arith.constant 0 : index
    %1 = vector.load %arg2[%c0_1, %c0_2] : memref<256x256xf32, #tpu.memory_space<vmem>>, vector<256x256xf32>
    %cst = arith.constant dense<0.000000e+00> : vector<16x256xf32>
    %2 = tpu.matmul %0, %1, %cst {dimension_numbers = #tpu.dot_dimension_numbers<[1], [0], [0], [1], [0, 0, 1, 1], [], []>} : vector<16x256xf32>, vector<256x256xf32>, vector<16x256xf32> -> vector<16x256xf32>
    %c0_3 = arith.constant 0 : index
    %c0_4 = arith.constant 0 : index
    %3 = vector.load %arg3[%c0_3, %c0_4] : memref<1x256xf32, #tpu.memory_space<vmem>>, vector<1x256xf32>
    %4 = vector.broadcast %3 : vector<1x256xf32> to vector<16x256xf32>
    %5 = arith.addf %2, %4 : vector<16x256xf32>
    %cst_5 = arith.constant 0.000000e+00 : f32
    %6 = vector.broadcast %cst_5 : f32 to vector<16x256xf32>
    %7 = arith.maximumf %5, %6 : vector<16x256xf32>
    %c0_6 = arith.constant 0 : index
    %c0_7 = arith.constant 0 : index
    %8 = vector.load %arg4[%c0_6, %c0_7] : memref<256x256xf32, #tpu.memory_space<vmem>>, vector<256x256xf32>
    %cst_8 = arith.constant dense<0.000000e+00> : vector<16x256xf32>
    %9 = tpu.matmul %7, %8, %cst_8 {dimension_numbers = #tpu.dot_dimension_numbers<[1], [0], [0], [1], [0, 0, 1, 1], [], []>} : vector<16x256xf32>, vector<256x256xf32>, vector<16x256xf32> -> vector<16x256xf32>
    %c0_9 = arith.constant 0 : index
    %c0_10 = arith.constant 0 : index
    %10 = vector.load %arg5[%c0_9, %c0_10] : memref<1x256xf32, #tpu.memory_space<vmem>>, vector<1x256xf32>
    %11 = vector.broadcast %10 : vector<1x256xf32> to vector<16x256xf32>
    %12 = arith.addf %9, %11 : vector<16x256xf32>
    %13 = arith.addf %0, %12 : vector<16x256xf32>
    %c0_11 = arith.constant 0 : index
    %c0_12 = arith.constant 0 : index
    %14 = vector.load %arg6[%c0_11, %c0_12] : memref<1x256xf32, #tpu.memory_space<vmem>>, vector<1x256xf32>
    %c0_13 = arith.constant 0 : index
    %c0_14 = arith.constant 0 : index
    %15 = vector.load %arg7[%c0_13, %c0_14] : memref<1x256xf32, #tpu.memory_space<vmem>>, vector<1x256xf32>
    %cst_15 = arith.constant dense<0.000000e+00> : vector<16xf32>
    %16 = vector.multi_reduction <add>, %13, %cst_15 [1] : vector<16x256xf32> to vector<16xf32>
    %17 = vector.shape_cast %16 : vector<16xf32> to vector<16x1xf32>
    %cst_16 = arith.constant 2.560000e+02 : f32
    %18 = vector.broadcast %cst_16 : f32 to vector<16x1xf32>
    %19 = arith.divf %17, %18 : vector<16x1xf32>
    %20 = vector.broadcast %19 : vector<16x1xf32> to vector<16x256xf32>
    %21 = arith.subf %13, %20 : vector<16x256xf32>
    %22 = arith.mulf %21, %21 : vector<16x256xf32>
    %cst_17 = arith.constant dense<0.000000e+00> : vector<16xf32>
    %23 = vector.multi_reduction <add>, %22, %cst_17 [1] : vector<16x256xf32> to vector<16xf32>
    %24 = vector.shape_cast %23 : vector<16xf32> to vector<16x1xf32>
    %cst_18 = arith.constant 2.560000e+02 : f32
    %25 = vector.broadcast %cst_18 : f32 to vector<16x1xf32>
    %26 = arith.divf %24, %25 : vector<16x1xf32>
    %cst_19 = arith.constant 9.99999974E-6 : f32
    %27 = vector.broadcast %cst_19 : f32 to vector<16x1xf32>
    %28 = arith.addf %26, %27 : vector<16x1xf32>
    %29 = math.rsqrt %28 : vector<16x1xf32>
    %30 = vector.broadcast %29 : vector<16x1xf32> to vector<16x256xf32>
    %31 = arith.mulf %21, %30 : vector<16x256xf32>
    %32 = vector.broadcast %14 : vector<1x256xf32> to vector<16x256xf32>
    %33 = arith.mulf %31, %32 : vector<16x256xf32>
    %34 = vector.broadcast %15 : vector<1x256xf32> to vector<16x256xf32>
    %35 = arith.addf %33, %34 : vector<16x256xf32>
    %c0_20 = arith.constant 0 : index
    %c0_21 = arith.constant 0 : index
    %36 = vector.load %arg8[%c0_20, %c0_21] : memref<16x256xf32, #tpu.memory_space<vmem>>, vector<16x256xf32>
    tpu.vector_store %arg8[%c0_20, %c0_21], %35 {strides = array<i32>} : memref<16x256xf32, #tpu.memory_space<vmem>>, vector<16x256xf32>,
    return
  }
  func.func @transform_0(%arg0: i32) -> (i32, i32) {
    %c0_i32 = arith.constant 0 : i32
    %c0_i32_0 = arith.constant 0 : i32
    return %arg0, %c0_i32 : i32, i32
  }
  func.func @transform_1(%arg0: i32) -> (i32, i32) {
    %c0_i32 = arith.constant 0 : i32
    %c0_i32_0 = arith.constant 0 : i32
    %c0_i32_1 = arith.constant 0 : i32
    return %c0_i32, %c0_i32_0 : i32, i32
  }
  func.func @transform_2(%arg0: i32) -> (i32, i32) {
    %c0_i32 = arith.constant 0 : i32
    %c0_i32_0 = arith.constant 0 : i32
    %c0_i32_1 = arith.constant 0 : i32
    return %c0_i32, %c0_i32_0 : i32, i32
  }
  func.func @transform_3(%arg0: i32) -> (i32, i32) {
    %c0_i32 = arith.constant 0 : i32
    %c0_i32_0 = arith.constant 0 : i32
    %c0_i32_1 = arith.constant 0 : i32
    return %c0_i32, %c0_i32_0 : i32, i32
  }
  func.func @transform_4(%arg0: i32) -> (i32, i32) {
    %c0_i32 = arith.constant 0 : i32
    %c0_i32_0 = arith.constant 0 : i32
    %c0_i32_1 = arith.constant 0 : i32
    return %c0_i32, %c0_i32_0 : i32, i32
  }
  func.func @transform_5(%arg0: i32) -> (i32, i32) {
    %c0_i32 = arith.constant 0 : i32
    %c0_i32_0 = arith.constant 0 : i32
    %c0_i32_1 = arith.constant 0 : i32
    return %c0_i32, %c0_i32_0 : i32, i32
  }
  func.func @transform_6(%arg0: i32) -> (i32, i32) {
    %c0_i32 = arith.constant 0 : i32
    %c0_i32_0 = arith.constant 0 : i32
    %c0_i32_1 = arith.constant 0 : i32
    return %c0_i32, %c0_i32_0 : i32, i32
  }
  func.func @transform_7(%arg0: i32) -> (i32, i32) {
    %c0_i32 = arith.constant 0 : i32
    %c0_i32_0 = arith.constant 0 : i32
    return %arg0, %c0_i32 : i32, i32
  }
}

module attributes {stable_mosaic.version = 11 : i64} {
  func.func @_attn_block_kernel(%arg0: i32, %arg1: memref<16x256xf32, #tpu.memory_space<vmem>>, %arg2: memref<256x768xf32, #tpu.memory_space<vmem>>, %arg3: memref<1x768xf32, #tpu.memory_space<vmem>>, %arg4: memref<256x256xf32, #tpu.memory_space<vmem>>, %arg5: memref<1x256xf32, #tpu.memory_space<vmem>>, %arg6: memref<1x256xf32, #tpu.memory_space<vmem>>, %arg7: memref<1x256xf32, #tpu.memory_space<vmem>>, %arg8: memref<16x256xf32, #tpu.memory_space<vmem>>) attributes {dimension_semantics = [#tpu.dimension_semantics<parallel>], iteration_bounds = array<i64: 2>, scalar_prefetch = 0 : i64, scratch_operands = 0 : i64, tpu.core_type = #tpu.core_type<tc>, window_params = [{transform_indices = @transform_0, window_bounds = array<i64: 16, 256>}, {pipeline_mode = #tpu.pipeline_mode<synchronous>, transform_indices = @transform_1, window_bounds = array<i64: 256, 768>}, {pipeline_mode = #tpu.pipeline_mode<synchronous>, transform_indices = @transform_2, window_bounds = array<i64: 1, 768>}, {pipeline_mode = #tpu.pipeline_mode<synchronous>, transform_indices = @transform_3, window_bounds = array<i64: 256, 256>}, {pipeline_mode = #tpu.pipeline_mode<synchronous>, transform_indices = @transform_4, window_bounds = array<i64: 1, 256>}, {pipeline_mode = #tpu.pipeline_mode<synchronous>, transform_indices = @transform_5, window_bounds = array<i64: 1, 256>}, {pipeline_mode = #tpu.pipeline_mode<synchronous>, transform_indices = @transform_6, window_bounds = array<i64: 1, 256>}, {transform_indices = @transform_7, window_bounds = array<i64: 16, 256>}]} {
    %c0 = arith.constant 0 : index
    %c0_0 = arith.constant 0 : index
    %0 = vector.load %arg1[%c0, %c0_0] : memref<16x256xf32, #tpu.memory_space<vmem>>, vector<16x256xf32>
    %c0_1 = arith.constant 0 : index
    %c0_2 = arith.constant 0 : index
    %1 = vector.load %arg2[%c0_1, %c0_2] : memref<256x768xf32, #tpu.memory_space<vmem>>, vector<256x768xf32>
    %cst = arith.constant dense<0.000000e+00> : vector<16x768xf32>
    %2 = tpu.matmul %0, %1, %cst {dimension_numbers = #tpu.dot_dimension_numbers<[1], [0], [0], [1], [0, 0, 1, 1], [], []>} : vector<16x256xf32>, vector<256x768xf32>, vector<16x768xf32> -> vector<16x768xf32>
    %c0_3 = arith.constant 0 : index
    %c0_4 = arith.constant 0 : index
    %3 = vector.load %arg3[%c0_3, %c0_4] : memref<1x768xf32, #tpu.memory_space<vmem>>, vector<1x768xf32>
    %4 = vector.broadcast %3 : vector<1x768xf32> to vector<16x768xf32>
    %5 = arith.addf %2, %4 : vector<16x768xf32>
    %6 = vector.extract_strided_slice %5 {offsets = [0, 0], sizes = [16, 64], strides = [1, 1]} : vector<16x768xf32> to vector<16x64xf32>
    %7 = vector.extract_strided_slice %5 {offsets = [0, 256], sizes = [16, 64], strides = [1, 1]} : vector<16x768xf32> to vector<16x64xf32>
    %8 = vector.extract_strided_slice %5 {offsets = [0, 512], sizes = [16, 64], strides = [1, 1]} : vector<16x768xf32> to vector<16x64xf32>
    %cst_5 = arith.constant dense<0.000000e+00> : vector<16x16xf32>
    %9 = tpu.matmul %6, %7, %cst_5 {dimension_numbers = #tpu.dot_dimension_numbers<[1], [1], [0], [0], [0, 0, 1, 0], [], []>} : vector<16x64xf32>, vector<16x64xf32>, vector<16x16xf32> -> vector<16x16xf32>
    %cst_6 = arith.constant 1.250000e-01 : f32
    %10 = vector.broadcast %cst_6 : f32 to vector<16x16xf32>
    %11 = arith.mulf %9, %10 : vector<16x16xf32>
    %cst_7 = arith.constant dense<0xFF800000> : vector<16xf32>
    %12 = vector.multi_reduction <maximumf>, %11, %cst_7 [1] : vector<16x16xf32> to vector<16xf32>
    %13 = vector.shape_cast %12 : vector<16xf32> to vector<16x1xf32>
    %14 = vector.broadcast %13 : vector<16x1xf32> to vector<16x16xf32>
    %15 = arith.subf %11, %14 : vector<16x16xf32>
    %16 = math.exp %15 : vector<16x16xf32>
    %cst_8 = arith.constant dense<0.000000e+00> : vector<16xf32>
    %17 = vector.multi_reduction <add>, %16, %cst_8 [1] : vector<16x16xf32> to vector<16xf32>
    %18 = vector.shape_cast %17 : vector<16xf32> to vector<16x1xf32>
    %cst_9 = arith.constant dense<0.000000e+00> : vector<16x64xf32>
    %19 = tpu.matmul %16, %8, %cst_9 {dimension_numbers = #tpu.dot_dimension_numbers<[1], [0], [0], [1], [0, 0, 1, 1], [], []>} : vector<16x16xf32>, vector<16x64xf32>, vector<16x64xf32> -> vector<16x64xf32>
    %20 = vector.broadcast %18 : vector<16x1xf32> to vector<16x64xf32>
    %21 = arith.divf %19, %20 : vector<16x64xf32>
    %22 = vector.extract_strided_slice %5 {offsets = [0, 64], sizes = [16, 64], strides = [1, 1]} : vector<16x768xf32> to vector<16x64xf32>
    %23 = vector.extract_strided_slice %5 {offsets = [0, 320], sizes = [16, 64], strides = [1, 1]} : vector<16x768xf32> to vector<16x64xf32>
    %24 = vector.extract_strided_slice %5 {offsets = [0, 576], sizes = [16, 64], strides = [1, 1]} : vector<16x768xf32> to vector<16x64xf32>
    %cst_10 = arith.constant dense<0.000000e+00> : vector<16x16xf32>
    %25 = tpu.matmul %22, %23, %cst_10 {dimension_numbers = #tpu.dot_dimension_numbers<[1], [1], [0], [0], [0, 0, 1, 0], [], []>} : vector<16x64xf32>, vector<16x64xf32>, vector<16x16xf32> -> vector<16x16xf32>
    %cst_11 = arith.constant 1.250000e-01 : f32
    %26 = vector.broadcast %cst_11 : f32 to vector<16x16xf32>
    %27 = arith.mulf %25, %26 : vector<16x16xf32>
    %cst_12 = arith.constant dense<0xFF800000> : vector<16xf32>
    %28 = vector.multi_reduction <maximumf>, %27, %cst_12 [1] : vector<16x16xf32> to vector<16xf32>
    %29 = vector.shape_cast %28 : vector<16xf32> to vector<16x1xf32>
    %30 = vector.broadcast %29 : vector<16x1xf32> to vector<16x16xf32>
    %31 = arith.subf %27, %30 : vector<16x16xf32>
    %32 = math.exp %31 : vector<16x16xf32>
    %cst_13 = arith.constant dense<0.000000e+00> : vector<16xf32>
    %33 = vector.multi_reduction <add>, %32, %cst_13 [1] : vector<16x16xf32> to vector<16xf32>
    %34 = vector.shape_cast %33 : vector<16xf32> to vector<16x1xf32>
    %cst_14 = arith.constant dense<0.000000e+00> : vector<16x64xf32>
    %35 = tpu.matmul %32, %24, %cst_14 {dimension_numbers = #tpu.dot_dimension_numbers<[1], [0], [0], [1], [0, 0, 1, 1], [], []>} : vector<16x16xf32>, vector<16x64xf32>, vector<16x64xf32> -> vector<16x64xf32>
    %36 = vector.broadcast %34 : vector<16x1xf32> to vector<16x64xf32>
    %37 = arith.divf %35, %36 : vector<16x64xf32>
    %38 = vector.extract_strided_slice %5 {offsets = [0, 128], sizes = [16, 64], strides = [1, 1]} : vector<16x768xf32> to vector<16x64xf32>
    %39 = vector.extract_strided_slice %5 {offsets = [0, 384], sizes = [16, 64], strides = [1, 1]} : vector<16x768xf32> to vector<16x64xf32>
    %40 = vector.extract_strided_slice %5 {offsets = [0, 640], sizes = [16, 64], strides = [1, 1]} : vector<16x768xf32> to vector<16x64xf32>
    %cst_15 = arith.constant dense<0.000000e+00> : vector<16x16xf32>
    %41 = tpu.matmul %38, %39, %cst_15 {dimension_numbers = #tpu.dot_dimension_numbers<[1], [1], [0], [0], [0, 0, 1, 0], [], []>} : vector<16x64xf32>, vector<16x64xf32>, vector<16x16xf32> -> vector<16x16xf32>
    %cst_16 = arith.constant 1.250000e-01 : f32
    %42 = vector.broadcast %cst_16 : f32 to vector<16x16xf32>
    %43 = arith.mulf %41, %42 : vector<16x16xf32>
    %cst_17 = arith.constant dense<0xFF800000> : vector<16xf32>
    %44 = vector.multi_reduction <maximumf>, %43, %cst_17 [1] : vector<16x16xf32> to vector<16xf32>
    %45 = vector.shape_cast %44 : vector<16xf32> to vector<16x1xf32>
    %46 = vector.broadcast %45 : vector<16x1xf32> to vector<16x16xf32>
    %47 = arith.subf %43, %46 : vector<16x16xf32>
    %48 = math.exp %47 : vector<16x16xf32>
    %cst_18 = arith.constant dense<0.000000e+00> : vector<16xf32>
    %49 = vector.multi_reduction <add>, %48, %cst_18 [1] : vector<16x16xf32> to vector<16xf32>
    %50 = vector.shape_cast %49 : vector<16xf32> to vector<16x1xf32>
    %cst_19 = arith.constant dense<0.000000e+00> : vector<16x64xf32>
    %51 = tpu.matmul %48, %40, %cst_19 {dimension_numbers = #tpu.dot_dimension_numbers<[1], [0], [0], [1], [0, 0, 1, 1], [], []>} : vector<16x16xf32>, vector<16x64xf32>, vector<16x64xf32> -> vector<16x64xf32>
    %52 = vector.broadcast %50 : vector<16x1xf32> to vector<16x64xf32>
    %53 = arith.divf %51, %52 : vector<16x64xf32>
    %54 = vector.extract_strided_slice %5 {offsets = [0, 192], sizes = [16, 64], strides = [1, 1]} : vector<16x768xf32> to vector<16x64xf32>
    %55 = vector.extract_strided_slice %5 {offsets = [0, 448], sizes = [16, 64], strides = [1, 1]} : vector<16x768xf32> to vector<16x64xf32>
    %56 = vector.extract_strided_slice %5 {offsets = [0, 704], sizes = [16, 64], strides = [1, 1]} : vector<16x768xf32> to vector<16x64xf32>
    %cst_20 = arith.constant dense<0.000000e+00> : vector<16x16xf32>
    %57 = tpu.matmul %54, %55, %cst_20 {dimension_numbers = #tpu.dot_dimension_numbers<[1], [1], [0], [0], [0, 0, 1, 0], [], []>} : vector<16x64xf32>, vector<16x64xf32>, vector<16x16xf32> -> vector<16x16xf32>
    %cst_21 = arith.constant 1.250000e-01 : f32
    %58 = vector.broadcast %cst_21 : f32 to vector<16x16xf32>
    %59 = arith.mulf %57, %58 : vector<16x16xf32>
    %cst_22 = arith.constant dense<0xFF800000> : vector<16xf32>
    %60 = vector.multi_reduction <maximumf>, %59, %cst_22 [1] : vector<16x16xf32> to vector<16xf32>
    %61 = vector.shape_cast %60 : vector<16xf32> to vector<16x1xf32>
    %62 = vector.broadcast %61 : vector<16x1xf32> to vector<16x16xf32>
    %63 = arith.subf %59, %62 : vector<16x16xf32>
    %64 = math.exp %63 : vector<16x16xf32>
    %cst_23 = arith.constant dense<0.000000e+00> : vector<16xf32>
    %65 = vector.multi_reduction <add>, %64, %cst_23 [1] : vector<16x16xf32> to vector<16xf32>
    %66 = vector.shape_cast %65 : vector<16xf32> to vector<16x1xf32>
    %cst_24 = arith.constant dense<0.000000e+00> : vector<16x64xf32>
    %67 = tpu.matmul %64, %56, %cst_24 {dimension_numbers = #tpu.dot_dimension_numbers<[1], [0], [0], [1], [0, 0, 1, 1], [], []>} : vector<16x16xf32>, vector<16x64xf32>, vector<16x64xf32> -> vector<16x64xf32>
    %68 = vector.broadcast %66 : vector<16x1xf32> to vector<16x64xf32>
    %69 = arith.divf %67, %68 : vector<16x64xf32>
    %70 = tpu.concatenate %21, %37, %53, %69 in 1 : vector<16x64xf32>, vector<16x64xf32>, vector<16x64xf32>, vector<16x64xf32> -> vector<16x256xf32>
    %c0_25 = arith.constant 0 : index
    %c0_26 = arith.constant 0 : index
    %71 = vector.load %arg4[%c0_25, %c0_26] : memref<256x256xf32, #tpu.memory_space<vmem>>, vector<256x256xf32>
    %cst_27 = arith.constant dense<0.000000e+00> : vector<16x256xf32>
    %72 = tpu.matmul %70, %71, %cst_27 {dimension_numbers = #tpu.dot_dimension_numbers<[1], [0], [0], [1], [0, 0, 1, 1], [], []>} : vector<16x256xf32>, vector<256x256xf32>, vector<16x256xf32> -> vector<16x256xf32>
    %c0_28 = arith.constant 0 : index
    %c0_29 = arith.constant 0 : index
    %73 = vector.load %arg5[%c0_28, %c0_29] : memref<1x256xf32, #tpu.memory_space<vmem>>, vector<1x256xf32>
    %74 = vector.broadcast %73 : vector<1x256xf32> to vector<16x256xf32>
    %75 = arith.addf %72, %74 : vector<16x256xf32>
    %76 = arith.addf %0, %75 : vector<16x256xf32>
    %c0_30 = arith.constant 0 : index
    %c0_31 = arith.constant 0 : index
    %77 = vector.load %arg6[%c0_30, %c0_31] : memref<1x256xf32, #tpu.memory_space<vmem>>, vector<1x256xf32>
    %c0_32 = arith.constant 0 : index
    %c0_33 = arith.constant 0 : index
    %78 = vector.load %arg7[%c0_32, %c0_33] : memref<1x256xf32, #tpu.memory_space<vmem>>, vector<1x256xf32>
    %cst_34 = arith.constant dense<0.000000e+00> : vector<16xf32>
    %79 = vector.multi_reduction <add>, %76, %cst_34 [1] : vector<16x256xf32> to vector<16xf32>
    %80 = vector.shape_cast %79 : vector<16xf32> to vector<16x1xf32>
    %cst_35 = arith.constant 2.560000e+02 : f32
    %81 = vector.broadcast %cst_35 : f32 to vector<16x1xf32>
    %82 = arith.divf %80, %81 : vector<16x1xf32>
    %83 = vector.broadcast %82 : vector<16x1xf32> to vector<16x256xf32>
    %84 = arith.subf %76, %83 : vector<16x256xf32>
    %85 = arith.mulf %84, %84 : vector<16x256xf32>
    %cst_36 = arith.constant dense<0.000000e+00> : vector<16xf32>
    %86 = vector.multi_reduction <add>, %85, %cst_36 [1] : vector<16x256xf32> to vector<16xf32>
    %87 = vector.shape_cast %86 : vector<16xf32> to vector<16x1xf32>
    %cst_37 = arith.constant 2.560000e+02 : f32
    %88 = vector.broadcast %cst_37 : f32 to vector<16x1xf32>
    %89 = arith.divf %87, %88 : vector<16x1xf32>
    %cst_38 = arith.constant 9.99999974E-6 : f32
    %90 = vector.broadcast %cst_38 : f32 to vector<16x1xf32>
    %91 = arith.addf %89, %90 : vector<16x1xf32>
    %92 = math.rsqrt %91 : vector<16x1xf32>
    %93 = vector.broadcast %92 : vector<16x1xf32> to vector<16x256xf32>
    %94 = arith.mulf %84, %93 : vector<16x256xf32>
    %95 = vector.broadcast %77 : vector<1x256xf32> to vector<16x256xf32>
    %96 = arith.mulf %94, %95 : vector<16x256xf32>
    %97 = vector.broadcast %78 : vector<1x256xf32> to vector<16x256xf32>
    %98 = arith.addf %96, %97 : vector<16x256xf32>
    %c0_39 = arith.constant 0 : index
    %c0_40 = arith.constant 0 : index
    %99 = vector.load %arg8[%c0_39, %c0_40] : memref<16x256xf32, #tpu.memory_space<vmem>>, vector<16x256xf32>
    tpu.vector_store %arg8[%c0_39, %c0_40], %98 {strides = array<i32>} : memref<16x256xf32, #tpu.memory_space<vmem>>, vector<16x256xf32>,
    return
  }
  func.func @transform_0(%arg0: i32) -> (i32, i32) {
    %c0_i32 = arith.constant 0 : i32
    %c0_i32_0 = arith.constant 0 : i32
    return %arg0, %c0_i32 : i32, i32
  }
  func.func @transform_1(%arg0: i32) -> (i32, i32) {
    %c0_i32 = arith.constant 0 : i32
    %c0_i32_0 = arith.constant 0 : i32
    %c0_i32_1 = arith.constant 0 : i32
    return %c0_i32, %c0_i32_0 : i32, i32
  }
  func.func @transform_2(%arg0: i32) -> (i32, i32) {
    %c0_i32 = arith.constant 0 : i32
    %c0_i32_0 = arith.constant 0 : i32
    %c0_i32_1 = arith.constant 0 : i32
    return %c0_i32, %c0_i32_0 : i32, i32
  }
  func.func @transform_3(%arg0: i32) -> (i32, i32) {
    %c0_i32 = arith.constant 0 : i32
    %c0_i32_0 = arith.constant 0 : i32
    %c0_i32_1 = arith.constant 0 : i32
    return %c0_i32, %c0_i32_0 : i32, i32
  }
  func.func @transform_4(%arg0: i32) -> (i32, i32) {
    %c0_i32 = arith.constant 0 : i32
    %c0_i32_0 = arith.constant 0 : i32
    %c0_i32_1 = arith.constant 0 : i32
    return %c0_i32, %c0_i32_0 : i32, i32
  }
  func.func @transform_5(%arg0: i32) -> (i32, i32) {
    %c0_i32 = arith.constant 0 : i32
    %c0_i32_0 = arith.constant 0 : i32
    %c0_i32_1 = arith.constant 0 : i32
    return %c0_i32, %c0_i32_0 : i32, i32
  }
  func.func @transform_6(%arg0: i32) -> (i32, i32) {
    %c0_i32 = arith.constant 0 : i32
    %c0_i32_0 = arith.constant 0 : i32
    %c0_i32_1 = arith.constant 0 : i32
    return %c0_i32, %c0_i32_0 : i32, i32
  }
  func.func @transform_7(%arg0: i32) -> (i32, i32) {
    %c0_i32 = arith.constant 0 : i32
    %c0_i32_0 = arith.constant 0 : i32
    return %arg0, %c0_i32 : i32, i32
  }
}

module attributes {stable_mosaic.version = 11 : i64} {
  func.func @_inproj_kernel(%arg0: i32, %arg1: memref<16x23xf32, #tpu.memory_space<vmem>>, %arg2: memref<23x256xf32, #tpu.memory_space<vmem>>, %arg3: memref<1x256xf32, #tpu.memory_space<vmem>>, %arg4: memref<1x256xf32, #tpu.memory_space<vmem>>, %arg5: memref<1x256xf32, #tpu.memory_space<vmem>>, %arg6: memref<16x256xf32, #tpu.memory_space<vmem>>, %arg7: memref<16x256xf32, #tpu.memory_space<vmem>>) attributes {dimension_semantics = [#tpu.dimension_semantics<parallel>], iteration_bounds = array<i64: 2>, scalar_prefetch = 0 : i64, scratch_operands = 0 : i64, tpu.core_type = #tpu.core_type<tc>, window_params = [{transform_indices = @transform_0, window_bounds = array<i64: 16, 23>}, {pipeline_mode = #tpu.pipeline_mode<synchronous>, transform_indices = @transform_1, window_bounds = array<i64: 23, 256>}, {pipeline_mode = #tpu.pipeline_mode<synchronous>, transform_indices = @transform_2, window_bounds = array<i64: 1, 256>}, {pipeline_mode = #tpu.pipeline_mode<synchronous>, transform_indices = @transform_3, window_bounds = array<i64: 1, 256>}, {pipeline_mode = #tpu.pipeline_mode<synchronous>, transform_indices = @transform_4, window_bounds = array<i64: 1, 256>}, {pipeline_mode = #tpu.pipeline_mode<synchronous>, transform_indices = @transform_5, window_bounds = array<i64: 16, 256>}, {transform_indices = @transform_6, window_bounds = array<i64: 16, 256>}]} {
    %c0 = arith.constant 0 : index
    %c0_0 = arith.constant 0 : index
    %0 = vector.load %arg1[%c0, %c0_0] : memref<16x23xf32, #tpu.memory_space<vmem>>, vector<16x23xf32>
    %c0_1 = arith.constant 0 : index
    %c0_2 = arith.constant 0 : index
    %1 = vector.load %arg2[%c0_1, %c0_2] : memref<23x256xf32, #tpu.memory_space<vmem>>, vector<23x256xf32>
    %cst = arith.constant dense<0.000000e+00> : vector<16x256xf32>
    %2 = tpu.matmul %0, %1, %cst {dimension_numbers = #tpu.dot_dimension_numbers<[1], [0], [0], [1], [0, 0, 1, 1], [], []>} : vector<16x23xf32>, vector<23x256xf32>, vector<16x256xf32> -> vector<16x256xf32>
    %c0_3 = arith.constant 0 : index
    %c0_4 = arith.constant 0 : index
    %3 = vector.load %arg3[%c0_3, %c0_4] : memref<1x256xf32, #tpu.memory_space<vmem>>, vector<1x256xf32>
    %4 = vector.broadcast %3 : vector<1x256xf32> to vector<16x256xf32>
    %5 = arith.addf %2, %4 : vector<16x256xf32>
    %c0_5 = arith.constant 0 : index
    %c0_6 = arith.constant 0 : index
    %6 = vector.load %arg4[%c0_5, %c0_6] : memref<1x256xf32, #tpu.memory_space<vmem>>, vector<1x256xf32>
    %c0_7 = arith.constant 0 : index
    %c0_8 = arith.constant 0 : index
    %7 = vector.load %arg5[%c0_7, %c0_8] : memref<1x256xf32, #tpu.memory_space<vmem>>, vector<1x256xf32>
    %cst_9 = arith.constant dense<0.000000e+00> : vector<16xf32>
    %8 = vector.multi_reduction <add>, %5, %cst_9 [1] : vector<16x256xf32> to vector<16xf32>
    %9 = vector.shape_cast %8 : vector<16xf32> to vector<16x1xf32>
    %cst_10 = arith.constant 2.560000e+02 : f32
    %10 = vector.broadcast %cst_10 : f32 to vector<16x1xf32>
    %11 = arith.divf %9, %10 : vector<16x1xf32>
    %12 = vector.broadcast %11 : vector<16x1xf32> to vector<16x256xf32>
    %13 = arith.subf %5, %12 : vector<16x256xf32>
    %14 = arith.mulf %13, %13 : vector<16x256xf32>
    %cst_11 = arith.constant dense<0.000000e+00> : vector<16xf32>
    %15 = vector.multi_reduction <add>, %14, %cst_11 [1] : vector<16x256xf32> to vector<16xf32>
    %16 = vector.shape_cast %15 : vector<16xf32> to vector<16x1xf32>
    %cst_12 = arith.constant 2.560000e+02 : f32
    %17 = vector.broadcast %cst_12 : f32 to vector<16x1xf32>
    %18 = arith.divf %16, %17 : vector<16x1xf32>
    %cst_13 = arith.constant 9.99999974E-6 : f32
    %19 = vector.broadcast %cst_13 : f32 to vector<16x1xf32>
    %20 = arith.addf %18, %19 : vector<16x1xf32>
    %21 = math.rsqrt %20 : vector<16x1xf32>
    %22 = vector.broadcast %21 : vector<16x1xf32> to vector<16x256xf32>
    %23 = arith.mulf %13, %22 : vector<16x256xf32>
    %24 = vector.broadcast %6 : vector<1x256xf32> to vector<16x256xf32>
    %25 = arith.mulf %23, %24 : vector<16x256xf32>
    %26 = vector.broadcast %7 : vector<1x256xf32> to vector<16x256xf32>
    %27 = arith.addf %25, %26 : vector<16x256xf32>
    %c0_14 = arith.constant 0 : index
    %c0_15 = arith.constant 0 : index
    %28 = vector.load %arg6[%c0_14, %c0_15] : memref<16x256xf32, #tpu.memory_space<vmem>>, vector<16x256xf32>
    %29 = arith.addf %27, %28 : vector<16x256xf32>
    %c0_16 = arith.constant 0 : index
    %c0_17 = arith.constant 0 : index
    %30 = vector.load %arg7[%c0_16, %c0_17] : memref<16x256xf32, #tpu.memory_space<vmem>>, vector<16x256xf32>
    tpu.vector_store %arg7[%c0_16, %c0_17], %29 {strides = array<i32>} : memref<16x256xf32, #tpu.memory_space<vmem>>, vector<16x256xf32>,
    return
  }
  func.func @transform_0(%arg0: i32) -> (i32, i32) {
    %c0_i32 = arith.constant 0 : i32
    %c0_i32_0 = arith.constant 0 : i32
    return %arg0, %c0_i32 : i32, i32
  }
  func.func @transform_1(%arg0: i32) -> (i32, i32) {
    %c0_i32 = arith.constant 0 : i32
    %c0_i32_0 = arith.constant 0 : i32
    %c0_i32_1 = arith.constant 0 : i32
    return %c0_i32, %c0_i32_0 : i32, i32
  }
  func.func @transform_2(%arg0: i32) -> (i32, i32) {
    %c0_i32 = arith.constant 0 : i32
    %c0_i32_0 = arith.constant 0 : i32
    %c0_i32_1 = arith.constant 0 : i32
    return %c0_i32, %c0_i32_0 : i32, i32
  }
  func.func @transform_3(%arg0: i32) -> (i32, i32) {
    %c0_i32 = arith.constant 0 : i32
    %c0_i32_0 = arith.constant 0 : i32
    %c0_i32_1 = arith.constant 0 : i32
    return %c0_i32, %c0_i32_0 : i32, i32
  }
  func.func @transform_4(%arg0: i32) -> (i32, i32) {
    %c0_i32 = arith.constant 0 : i32
    %c0_i32_0 = arith.constant 0 : i32
    %c0_i32_1 = arith.constant 0 : i32
    return %c0_i32, %c0_i32_0 : i32, i32
  }
  func.func @transform_5(%arg0: i32) -> (i32, i32) {
    %c0_i32 = arith.constant 0 : i32
    %c0_i32_0 = arith.constant 0 : i32
    %c0_i32_1 = arith.constant 0 : i32
    return %c0_i32, %c0_i32_0 : i32, i32
  }
  func.func @transform_6(%arg0: i32) -> (i32, i32) {
    %c0_i32 = arith.constant 0 : i32
    %c0_i32_0 = arith.constant 0 : i32
    return %arg0, %c0_i32 : i32, i32
  }
}

module attributes {stable_mosaic.version = 11 : i64} {
  func.func @_attn_block_kernel(%arg0: i32, %arg1: memref<16x256xf32, #tpu.memory_space<vmem>>, %arg2: memref<256x768xf32, #tpu.memory_space<vmem>>, %arg3: memref<1x768xf32, #tpu.memory_space<vmem>>, %arg4: memref<256x256xf32, #tpu.memory_space<vmem>>, %arg5: memref<1x256xf32, #tpu.memory_space<vmem>>, %arg6: memref<1x256xf32, #tpu.memory_space<vmem>>, %arg7: memref<1x256xf32, #tpu.memory_space<vmem>>, %arg8: memref<16x256xf32, #tpu.memory_space<vmem>>) attributes {dimension_semantics = [#tpu.dimension_semantics<parallel>], iteration_bounds = array<i64: 2>, scalar_prefetch = 0 : i64, scratch_operands = 0 : i64, tpu.core_type = #tpu.core_type<tc>, window_params = [{transform_indices = @transform_0, window_bounds = array<i64: 16, 256>}, {pipeline_mode = #tpu.pipeline_mode<synchronous>, transform_indices = @transform_1, window_bounds = array<i64: 256, 768>}, {pipeline_mode = #tpu.pipeline_mode<synchronous>, transform_indices = @transform_2, window_bounds = array<i64: 1, 768>}, {pipeline_mode = #tpu.pipeline_mode<synchronous>, transform_indices = @transform_3, window_bounds = array<i64: 256, 256>}, {pipeline_mode = #tpu.pipeline_mode<synchronous>, transform_indices = @transform_4, window_bounds = array<i64: 1, 256>}, {pipeline_mode = #tpu.pipeline_mode<synchronous>, transform_indices = @transform_5, window_bounds = array<i64: 1, 256>}, {pipeline_mode = #tpu.pipeline_mode<synchronous>, transform_indices = @transform_6, window_bounds = array<i64: 1, 256>}, {transform_indices = @transform_7, window_bounds = array<i64: 16, 256>}]} {
    %c0 = arith.constant 0 : index
    %c0_0 = arith.constant 0 : index
    %0 = vector.load %arg1[%c0, %c0_0] : memref<16x256xf32, #tpu.memory_space<vmem>>, vector<16x256xf32>
    %c0_1 = arith.constant 0 : index
    %c0_2 = arith.constant 0 : index
    %1 = vector.load %arg2[%c0_1, %c0_2] : memref<256x768xf32, #tpu.memory_space<vmem>>, vector<256x768xf32>
    %cst = arith.constant dense<0.000000e+00> : vector<16x768xf32>
    %2 = tpu.matmul %0, %1, %cst {dimension_numbers = #tpu.dot_dimension_numbers<[1], [0], [0], [1], [0, 0, 1, 1], [], []>} : vector<16x256xf32>, vector<256x768xf32>, vector<16x768xf32> -> vector<16x768xf32>
    %c0_3 = arith.constant 0 : index
    %c0_4 = arith.constant 0 : index
    %3 = vector.load %arg3[%c0_3, %c0_4] : memref<1x768xf32, #tpu.memory_space<vmem>>, vector<1x768xf32>
    %4 = vector.broadcast %3 : vector<1x768xf32> to vector<16x768xf32>
    %5 = arith.addf %2, %4 : vector<16x768xf32>
    %6 = vector.extract_strided_slice %5 {offsets = [0, 0], sizes = [16, 64], strides = [1, 1]} : vector<16x768xf32> to vector<16x64xf32>
    %7 = vector.extract_strided_slice %5 {offsets = [0, 256], sizes = [16, 64], strides = [1, 1]} : vector<16x768xf32> to vector<16x64xf32>
    %8 = vector.extract_strided_slice %5 {offsets = [0, 512], sizes = [16, 64], strides = [1, 1]} : vector<16x768xf32> to vector<16x64xf32>
    %cst_5 = arith.constant dense<0.000000e+00> : vector<16x16xf32>
    %9 = tpu.matmul %6, %7, %cst_5 {dimension_numbers = #tpu.dot_dimension_numbers<[1], [1], [0], [0], [0, 0, 1, 0], [], []>} : vector<16x64xf32>, vector<16x64xf32>, vector<16x16xf32> -> vector<16x16xf32>
    %cst_6 = arith.constant 1.250000e-01 : f32
    %10 = vector.broadcast %cst_6 : f32 to vector<16x16xf32>
    %11 = arith.mulf %9, %10 : vector<16x16xf32>
    %cst_7 = arith.constant dense<0xFF800000> : vector<16xf32>
    %12 = vector.multi_reduction <maximumf>, %11, %cst_7 [1] : vector<16x16xf32> to vector<16xf32>
    %13 = vector.shape_cast %12 : vector<16xf32> to vector<16x1xf32>
    %14 = vector.broadcast %13 : vector<16x1xf32> to vector<16x16xf32>
    %15 = arith.subf %11, %14 : vector<16x16xf32>
    %16 = math.exp %15 : vector<16x16xf32>
    %cst_8 = arith.constant dense<0.000000e+00> : vector<16xf32>
    %17 = vector.multi_reduction <add>, %16, %cst_8 [1] : vector<16x16xf32> to vector<16xf32>
    %18 = vector.shape_cast %17 : vector<16xf32> to vector<16x1xf32>
    %cst_9 = arith.constant dense<0.000000e+00> : vector<16x64xf32>
    %19 = tpu.matmul %16, %8, %cst_9 {dimension_numbers = #tpu.dot_dimension_numbers<[1], [0], [0], [1], [0, 0, 1, 1], [], []>} : vector<16x16xf32>, vector<16x64xf32>, vector<16x64xf32> -> vector<16x64xf32>
    %20 = vector.broadcast %18 : vector<16x1xf32> to vector<16x64xf32>
    %21 = arith.divf %19, %20 : vector<16x64xf32>
    %22 = vector.extract_strided_slice %5 {offsets = [0, 64], sizes = [16, 64], strides = [1, 1]} : vector<16x768xf32> to vector<16x64xf32>
    %23 = vector.extract_strided_slice %5 {offsets = [0, 320], sizes = [16, 64], strides = [1, 1]} : vector<16x768xf32> to vector<16x64xf32>
    %24 = vector.extract_strided_slice %5 {offsets = [0, 576], sizes = [16, 64], strides = [1, 1]} : vector<16x768xf32> to vector<16x64xf32>
    %cst_10 = arith.constant dense<0.000000e+00> : vector<16x16xf32>
    %25 = tpu.matmul %22, %23, %cst_10 {dimension_numbers = #tpu.dot_dimension_numbers<[1], [1], [0], [0], [0, 0, 1, 0], [], []>} : vector<16x64xf32>, vector<16x64xf32>, vector<16x16xf32> -> vector<16x16xf32>
    %cst_11 = arith.constant 1.250000e-01 : f32
    %26 = vector.broadcast %cst_11 : f32 to vector<16x16xf32>
    %27 = arith.mulf %25, %26 : vector<16x16xf32>
    %cst_12 = arith.constant dense<0xFF800000> : vector<16xf32>
    %28 = vector.multi_reduction <maximumf>, %27, %cst_12 [1] : vector<16x16xf32> to vector<16xf32>
    %29 = vector.shape_cast %28 : vector<16xf32> to vector<16x1xf32>
    %30 = vector.broadcast %29 : vector<16x1xf32> to vector<16x16xf32>
    %31 = arith.subf %27, %30 : vector<16x16xf32>
    %32 = math.exp %31 : vector<16x16xf32>
    %cst_13 = arith.constant dense<0.000000e+00> : vector<16xf32>
    %33 = vector.multi_reduction <add>, %32, %cst_13 [1] : vector<16x16xf32> to vector<16xf32>
    %34 = vector.shape_cast %33 : vector<16xf32> to vector<16x1xf32>
    %cst_14 = arith.constant dense<0.000000e+00> : vector<16x64xf32>
    %35 = tpu.matmul %32, %24, %cst_14 {dimension_numbers = #tpu.dot_dimension_numbers<[1], [0], [0], [1], [0, 0, 1, 1], [], []>} : vector<16x16xf32>, vector<16x64xf32>, vector<16x64xf32> -> vector<16x64xf32>
    %36 = vector.broadcast %34 : vector<16x1xf32> to vector<16x64xf32>
    %37 = arith.divf %35, %36 : vector<16x64xf32>
    %38 = vector.extract_strided_slice %5 {offsets = [0, 128], sizes = [16, 64], strides = [1, 1]} : vector<16x768xf32> to vector<16x64xf32>
    %39 = vector.extract_strided_slice %5 {offsets = [0, 384], sizes = [16, 64], strides = [1, 1]} : vector<16x768xf32> to vector<16x64xf32>
    %40 = vector.extract_strided_slice %5 {offsets = [0, 640], sizes = [16, 64], strides = [1, 1]} : vector<16x768xf32> to vector<16x64xf32>
    %cst_15 = arith.constant dense<0.000000e+00> : vector<16x16xf32>
    %41 = tpu.matmul %38, %39, %cst_15 {dimension_numbers = #tpu.dot_dimension_numbers<[1], [1], [0], [0], [0, 0, 1, 0], [], []>} : vector<16x64xf32>, vector<16x64xf32>, vector<16x16xf32> -> vector<16x16xf32>
    %cst_16 = arith.constant 1.250000e-01 : f32
    %42 = vector.broadcast %cst_16 : f32 to vector<16x16xf32>
    %43 = arith.mulf %41, %42 : vector<16x16xf32>
    %cst_17 = arith.constant dense<0xFF800000> : vector<16xf32>
    %44 = vector.multi_reduction <maximumf>, %43, %cst_17 [1] : vector<16x16xf32> to vector<16xf32>
    %45 = vector.shape_cast %44 : vector<16xf32> to vector<16x1xf32>
    %46 = vector.broadcast %45 : vector<16x1xf32> to vector<16x16xf32>
    %47 = arith.subf %43, %46 : vector<16x16xf32>
    %48 = math.exp %47 : vector<16x16xf32>
    %cst_18 = arith.constant dense<0.000000e+00> : vector<16xf32>
    %49 = vector.multi_reduction <add>, %48, %cst_18 [1] : vector<16x16xf32> to vector<16xf32>
    %50 = vector.shape_cast %49 : vector<16xf32> to vector<16x1xf32>
    %cst_19 = arith.constant dense<0.000000e+00> : vector<16x64xf32>
    %51 = tpu.matmul %48, %40, %cst_19 {dimension_numbers = #tpu.dot_dimension_numbers<[1], [0], [0], [1], [0, 0, 1, 1], [], []>} : vector<16x16xf32>, vector<16x64xf32>, vector<16x64xf32> -> vector<16x64xf32>
    %52 = vector.broadcast %50 : vector<16x1xf32> to vector<16x64xf32>
    %53 = arith.divf %51, %52 : vector<16x64xf32>
    %54 = vector.extract_strided_slice %5 {offsets = [0, 192], sizes = [16, 64], strides = [1, 1]} : vector<16x768xf32> to vector<16x64xf32>
    %55 = vector.extract_strided_slice %5 {offsets = [0, 448], sizes = [16, 64], strides = [1, 1]} : vector<16x768xf32> to vector<16x64xf32>
    %56 = vector.extract_strided_slice %5 {offsets = [0, 704], sizes = [16, 64], strides = [1, 1]} : vector<16x768xf32> to vector<16x64xf32>
    %cst_20 = arith.constant dense<0.000000e+00> : vector<16x16xf32>
    %57 = tpu.matmul %54, %55, %cst_20 {dimension_numbers = #tpu.dot_dimension_numbers<[1], [1], [0], [0], [0, 0, 1, 0], [], []>} : vector<16x64xf32>, vector<16x64xf32>, vector<16x16xf32> -> vector<16x16xf32>
    %cst_21 = arith.constant 1.250000e-01 : f32
    %58 = vector.broadcast %cst_21 : f32 to vector<16x16xf32>
    %59 = arith.mulf %57, %58 : vector<16x16xf32>
    %cst_22 = arith.constant dense<0xFF800000> : vector<16xf32>
    %60 = vector.multi_reduction <maximumf>, %59, %cst_22 [1] : vector<16x16xf32> to vector<16xf32>
    %61 = vector.shape_cast %60 : vector<16xf32> to vector<16x1xf32>
    %62 = vector.broadcast %61 : vector<16x1xf32> to vector<16x16xf32>
    %63 = arith.subf %59, %62 : vector<16x16xf32>
    %64 = math.exp %63 : vector<16x16xf32>
    %cst_23 = arith.constant dense<0.000000e+00> : vector<16xf32>
    %65 = vector.multi_reduction <add>, %64, %cst_23 [1] : vector<16x16xf32> to vector<16xf32>
    %66 = vector.shape_cast %65 : vector<16xf32> to vector<16x1xf32>
    %cst_24 = arith.constant dense<0.000000e+00> : vector<16x64xf32>
    %67 = tpu.matmul %64, %56, %cst_24 {dimension_numbers = #tpu.dot_dimension_numbers<[1], [0], [0], [1], [0, 0, 1, 1], [], []>} : vector<16x16xf32>, vector<16x64xf32>, vector<16x64xf32> -> vector<16x64xf32>
    %68 = vector.broadcast %66 : vector<16x1xf32> to vector<16x64xf32>
    %69 = arith.divf %67, %68 : vector<16x64xf32>
    %70 = tpu.concatenate %21, %37, %53, %69 in 1 : vector<16x64xf32>, vector<16x64xf32>, vector<16x64xf32>, vector<16x64xf32> -> vector<16x256xf32>
    %c0_25 = arith.constant 0 : index
    %c0_26 = arith.constant 0 : index
    %71 = vector.load %arg4[%c0_25, %c0_26] : memref<256x256xf32, #tpu.memory_space<vmem>>, vector<256x256xf32>
    %cst_27 = arith.constant dense<0.000000e+00> : vector<16x256xf32>
    %72 = tpu.matmul %70, %71, %cst_27 {dimension_numbers = #tpu.dot_dimension_numbers<[1], [0], [0], [1], [0, 0, 1, 1], [], []>} : vector<16x256xf32>, vector<256x256xf32>, vector<16x256xf32> -> vector<16x256xf32>
    %c0_28 = arith.constant 0 : index
    %c0_29 = arith.constant 0 : index
    %73 = vector.load %arg5[%c0_28, %c0_29] : memref<1x256xf32, #tpu.memory_space<vmem>>, vector<1x256xf32>
    %74 = vector.broadcast %73 : vector<1x256xf32> to vector<16x256xf32>
    %75 = arith.addf %72, %74 : vector<16x256xf32>
    %76 = arith.addf %0, %75 : vector<16x256xf32>
    %c0_30 = arith.constant 0 : index
    %c0_31 = arith.constant 0 : index
    %77 = vector.load %arg6[%c0_30, %c0_31] : memref<1x256xf32, #tpu.memory_space<vmem>>, vector<1x256xf32>
    %c0_32 = arith.constant 0 : index
    %c0_33 = arith.constant 0 : index
    %78 = vector.load %arg7[%c0_32, %c0_33] : memref<1x256xf32, #tpu.memory_space<vmem>>, vector<1x256xf32>
    %cst_34 = arith.constant dense<0.000000e+00> : vector<16xf32>
    %79 = vector.multi_reduction <add>, %76, %cst_34 [1] : vector<16x256xf32> to vector<16xf32>
    %80 = vector.shape_cast %79 : vector<16xf32> to vector<16x1xf32>
    %cst_35 = arith.constant 2.560000e+02 : f32
    %81 = vector.broadcast %cst_35 : f32 to vector<16x1xf32>
    %82 = arith.divf %80, %81 : vector<16x1xf32>
    %83 = vector.broadcast %82 : vector<16x1xf32> to vector<16x256xf32>
    %84 = arith.subf %76, %83 : vector<16x256xf32>
    %85 = arith.mulf %84, %84 : vector<16x256xf32>
    %cst_36 = arith.constant dense<0.000000e+00> : vector<16xf32>
    %86 = vector.multi_reduction <add>, %85, %cst_36 [1] : vector<16x256xf32> to vector<16xf32>
    %87 = vector.shape_cast %86 : vector<16xf32> to vector<16x1xf32>
    %cst_37 = arith.constant 2.560000e+02 : f32
    %88 = vector.broadcast %cst_37 : f32 to vector<16x1xf32>
    %89 = arith.divf %87, %88 : vector<16x1xf32>
    %cst_38 = arith.constant 9.99999974E-6 : f32
    %90 = vector.broadcast %cst_38 : f32 to vector<16x1xf32>
    %91 = arith.addf %89, %90 : vector<16x1xf32>
    %92 = math.rsqrt %91 : vector<16x1xf32>
    %93 = vector.broadcast %92 : vector<16x1xf32> to vector<16x256xf32>
    %94 = arith.mulf %84, %93 : vector<16x256xf32>
    %95 = vector.broadcast %77 : vector<1x256xf32> to vector<16x256xf32>
    %96 = arith.mulf %94, %95 : vector<16x256xf32>
    %97 = vector.broadcast %78 : vector<1x256xf32> to vector<16x256xf32>
    %98 = arith.addf %96, %97 : vector<16x256xf32>
    %c0_39 = arith.constant 0 : index
    %c0_40 = arith.constant 0 : index
    %99 = vector.load %arg8[%c0_39, %c0_40] : memref<16x256xf32, #tpu.memory_space<vmem>>, vector<16x256xf32>
    tpu.vector_store %arg8[%c0_39, %c0_40], %98 {strides = array<i32>} : memref<16x256xf32, #tpu.memory_space<vmem>>, vector<16x256xf32>,
    return
  }
  func.func @transform_0(%arg0: i32) -> (i32, i32) {
    %c0_i32 = arith.constant 0 : i32
    %c0_i32_0 = arith.constant 0 : i32
    return %arg0, %c0_i32 : i32, i32
  }
  func.func @transform_1(%arg0: i32) -> (i32, i32) {
    %c0_i32 = arith.constant 0 : i32
    %c0_i32_0 = arith.constant 0 : i32
    %c0_i32_1 = arith.constant 0 : i32
    return %c0_i32, %c0_i32_0 : i32, i32
  }
  func.func @transform_2(%arg0: i32) -> (i32, i32) {
    %c0_i32 = arith.constant 0 : i32
    %c0_i32_0 = arith.constant 0 : i32
    %c0_i32_1 = arith.constant 0 : i32
    return %c0_i32, %c0_i32_0 : i32, i32
  }
  func.func @transform_3(%arg0: i32) -> (i32, i32) {
    %c0_i32 = arith.constant 0 : i32
    %c0_i32_0 = arith.constant 0 : i32
    %c0_i32_1 = arith.constant 0 : i32
    return %c0_i32, %c0_i32_0 : i32, i32
  }
  func.func @transform_4(%arg0: i32) -> (i32, i32) {
    %c0_i32 = arith.constant 0 : i32
    %c0_i32_0 = arith.constant 0 : i32
    %c0_i32_1 = arith.constant 0 : i32
    return %c0_i32, %c0_i32_0 : i32, i32
  }
  func.func @transform_5(%arg0: i32) -> (i32, i32) {
    %c0_i32 = arith.constant 0 : i32
    %c0_i32_0 = arith.constant 0 : i32
    %c0_i32_1 = arith.constant 0 : i32
    return %c0_i32, %c0_i32_0 : i32, i32
  }
  func.func @transform_6(%arg0: i32) -> (i32, i32) {
    %c0_i32 = arith.constant 0 : i32
    %c0_i32_0 = arith.constant 0 : i32
    %c0_i32_1 = arith.constant 0 : i32
    return %c0_i32, %c0_i32_0 : i32, i32
  }
  func.func @transform_7(%arg0: i32) -> (i32, i32) {
    %c0_i32 = arith.constant 0 : i32
    %c0_i32_0 = arith.constant 0 : i32
    return %arg0, %c0_i32 : i32, i32
  }
}

module attributes {stable_mosaic.version = 11 : i64} {
  func.func @_ffn_block_kernel(%arg0: i32, %arg1: memref<16x256xf32, #tpu.memory_space<vmem>>, %arg2: memref<256x256xf32, #tpu.memory_space<vmem>>, %arg3: memref<1x256xf32, #tpu.memory_space<vmem>>, %arg4: memref<256x256xf32, #tpu.memory_space<vmem>>, %arg5: memref<1x256xf32, #tpu.memory_space<vmem>>, %arg6: memref<1x256xf32, #tpu.memory_space<vmem>>, %arg7: memref<1x256xf32, #tpu.memory_space<vmem>>, %arg8: memref<16x256xf32, #tpu.memory_space<vmem>>) attributes {dimension_semantics = [#tpu.dimension_semantics<parallel>], iteration_bounds = array<i64: 2>, scalar_prefetch = 0 : i64, scratch_operands = 0 : i64, tpu.core_type = #tpu.core_type<tc>, window_params = [{transform_indices = @transform_0, window_bounds = array<i64: 16, 256>}, {pipeline_mode = #tpu.pipeline_mode<synchronous>, transform_indices = @transform_1, window_bounds = array<i64: 256, 256>}, {pipeline_mode = #tpu.pipeline_mode<synchronous>, transform_indices = @transform_2, window_bounds = array<i64: 1, 256>}, {pipeline_mode = #tpu.pipeline_mode<synchronous>, transform_indices = @transform_3, window_bounds = array<i64: 256, 256>}, {pipeline_mode = #tpu.pipeline_mode<synchronous>, transform_indices = @transform_4, window_bounds = array<i64: 1, 256>}, {pipeline_mode = #tpu.pipeline_mode<synchronous>, transform_indices = @transform_5, window_bounds = array<i64: 1, 256>}, {pipeline_mode = #tpu.pipeline_mode<synchronous>, transform_indices = @transform_6, window_bounds = array<i64: 1, 256>}, {transform_indices = @transform_7, window_bounds = array<i64: 16, 256>}]} {
    %c0 = arith.constant 0 : index
    %c0_0 = arith.constant 0 : index
    %0 = vector.load %arg1[%c0, %c0_0] : memref<16x256xf32, #tpu.memory_space<vmem>>, vector<16x256xf32>
    %c0_1 = arith.constant 0 : index
    %c0_2 = arith.constant 0 : index
    %1 = vector.load %arg2[%c0_1, %c0_2] : memref<256x256xf32, #tpu.memory_space<vmem>>, vector<256x256xf32>
    %cst = arith.constant dense<0.000000e+00> : vector<16x256xf32>
    %2 = tpu.matmul %0, %1, %cst {dimension_numbers = #tpu.dot_dimension_numbers<[1], [0], [0], [1], [0, 0, 1, 1], [], []>} : vector<16x256xf32>, vector<256x256xf32>, vector<16x256xf32> -> vector<16x256xf32>
    %c0_3 = arith.constant 0 : index
    %c0_4 = arith.constant 0 : index
    %3 = vector.load %arg3[%c0_3, %c0_4] : memref<1x256xf32, #tpu.memory_space<vmem>>, vector<1x256xf32>
    %4 = vector.broadcast %3 : vector<1x256xf32> to vector<16x256xf32>
    %5 = arith.addf %2, %4 : vector<16x256xf32>
    %cst_5 = arith.constant 0.000000e+00 : f32
    %6 = vector.broadcast %cst_5 : f32 to vector<16x256xf32>
    %7 = arith.maximumf %5, %6 : vector<16x256xf32>
    %c0_6 = arith.constant 0 : index
    %c0_7 = arith.constant 0 : index
    %8 = vector.load %arg4[%c0_6, %c0_7] : memref<256x256xf32, #tpu.memory_space<vmem>>, vector<256x256xf32>
    %cst_8 = arith.constant dense<0.000000e+00> : vector<16x256xf32>
    %9 = tpu.matmul %7, %8, %cst_8 {dimension_numbers = #tpu.dot_dimension_numbers<[1], [0], [0], [1], [0, 0, 1, 1], [], []>} : vector<16x256xf32>, vector<256x256xf32>, vector<16x256xf32> -> vector<16x256xf32>
    %c0_9 = arith.constant 0 : index
    %c0_10 = arith.constant 0 : index
    %10 = vector.load %arg5[%c0_9, %c0_10] : memref<1x256xf32, #tpu.memory_space<vmem>>, vector<1x256xf32>
    %11 = vector.broadcast %10 : vector<1x256xf32> to vector<16x256xf32>
    %12 = arith.addf %9, %11 : vector<16x256xf32>
    %13 = arith.addf %0, %12 : vector<16x256xf32>
    %c0_11 = arith.constant 0 : index
    %c0_12 = arith.constant 0 : index
    %14 = vector.load %arg6[%c0_11, %c0_12] : memref<1x256xf32, #tpu.memory_space<vmem>>, vector<1x256xf32>
    %c0_13 = arith.constant 0 : index
    %c0_14 = arith.constant 0 : index
    %15 = vector.load %arg7[%c0_13, %c0_14] : memref<1x256xf32, #tpu.memory_space<vmem>>, vector<1x256xf32>
    %cst_15 = arith.constant dense<0.000000e+00> : vector<16xf32>
    %16 = vector.multi_reduction <add>, %13, %cst_15 [1] : vector<16x256xf32> to vector<16xf32>
    %17 = vector.shape_cast %16 : vector<16xf32> to vector<16x1xf32>
    %cst_16 = arith.constant 2.560000e+02 : f32
    %18 = vector.broadcast %cst_16 : f32 to vector<16x1xf32>
    %19 = arith.divf %17, %18 : vector<16x1xf32>
    %20 = vector.broadcast %19 : vector<16x1xf32> to vector<16x256xf32>
    %21 = arith.subf %13, %20 : vector<16x256xf32>
    %22 = arith.mulf %21, %21 : vector<16x256xf32>
    %cst_17 = arith.constant dense<0.000000e+00> : vector<16xf32>
    %23 = vector.multi_reduction <add>, %22, %cst_17 [1] : vector<16x256xf32> to vector<16xf32>
    %24 = vector.shape_cast %23 : vector<16xf32> to vector<16x1xf32>
    %cst_18 = arith.constant 2.560000e+02 : f32
    %25 = vector.broadcast %cst_18 : f32 to vector<16x1xf32>
    %26 = arith.divf %24, %25 : vector<16x1xf32>
    %cst_19 = arith.constant 9.99999974E-6 : f32
    %27 = vector.broadcast %cst_19 : f32 to vector<16x1xf32>
    %28 = arith.addf %26, %27 : vector<16x1xf32>
    %29 = math.rsqrt %28 : vector<16x1xf32>
    %30 = vector.broadcast %29 : vector<16x1xf32> to vector<16x256xf32>
    %31 = arith.mulf %21, %30 : vector<16x256xf32>
    %32 = vector.broadcast %14 : vector<1x256xf32> to vector<16x256xf32>
    %33 = arith.mulf %31, %32 : vector<16x256xf32>
    %34 = vector.broadcast %15 : vector<1x256xf32> to vector<16x256xf32>
    %35 = arith.addf %33, %34 : vector<16x256xf32>
    %c0_20 = arith.constant 0 : index
    %c0_21 = arith.constant 0 : index
    %36 = vector.load %arg8[%c0_20, %c0_21] : memref<16x256xf32, #tpu.memory_space<vmem>>, vector<16x256xf32>
    tpu.vector_store %arg8[%c0_20, %c0_21], %35 {strides = array<i32>} : memref<16x256xf32, #tpu.memory_space<vmem>>, vector<16x256xf32>,
    return
  }
  func.func @transform_0(%arg0: i32) -> (i32, i32) {
    %c0_i32 = arith.constant 0 : i32
    %c0_i32_0 = arith.constant 0 : i32
    return %arg0, %c0_i32 : i32, i32
  }
  func.func @transform_1(%arg0: i32) -> (i32, i32) {
    %c0_i32 = arith.constant 0 : i32
    %c0_i32_0 = arith.constant 0 : i32
    %c0_i32_1 = arith.constant 0 : i32
    return %c0_i32, %c0_i32_0 : i32, i32
  }
  func.func @transform_2(%arg0: i32) -> (i32, i32) {
    %c0_i32 = arith.constant 0 : i32
    %c0_i32_0 = arith.constant 0 : i32
    %c0_i32_1 = arith.constant 0 : i32
    return %c0_i32, %c0_i32_0 : i32, i32
  }
  func.func @transform_3(%arg0: i32) -> (i32, i32) {
    %c0_i32 = arith.constant 0 : i32
    %c0_i32_0 = arith.constant 0 : i32
    %c0_i32_1 = arith.constant 0 : i32
    return %c0_i32, %c0_i32_0 : i32, i32
  }
  func.func @transform_4(%arg0: i32) -> (i32, i32) {
    %c0_i32 = arith.constant 0 : i32
    %c0_i32_0 = arith.constant 0 : i32
    %c0_i32_1 = arith.constant 0 : i32
    return %c0_i32, %c0_i32_0 : i32, i32
  }
  func.func @transform_5(%arg0: i32) -> (i32, i32) {
    %c0_i32 = arith.constant 0 : i32
    %c0_i32_0 = arith.constant 0 : i32
    %c0_i32_1 = arith.constant 0 : i32
    return %c0_i32, %c0_i32_0 : i32, i32
  }
  func.func @transform_6(%arg0: i32) -> (i32, i32) {
    %c0_i32 = arith.constant 0 : i32
    %c0_i32_0 = arith.constant 0 : i32
    %c0_i32_1 = arith.constant 0 : i32
    return %c0_i32, %c0_i32_0 : i32, i32
  }
  func.func @transform_7(%arg0: i32) -> (i32, i32) {
    %c0_i32 = arith.constant 0 : i32
    %c0_i32_0 = arith.constant 0 : i32
    return %arg0, %c0_i32 : i32, i32
  }
}

</mosaic_0001>

<bundles_post_ra>
// kernel: transformer_forward.5
= control target key start
LH: loop header
LB: loop body
LE: loop exit
PB: predicated region body
PF: predicated region fallthrough
CT: control target
= control target key end

     0   :  { %11 = vsyncpa [#allocation3], 0  ;;  %s858_s0 = inlined_call_operand.hbm [shape: f32[32,23], index: 0, kind: input, shape index: {}]   ;;  %s859_s1 = inlined_call_operand.vmem [shape: f32[23,256], index: 1, kind: input, shape index: {}]   ;;  %s860_s2 = inlined_call_operand.vmem [shape: f32[1,256], index: 2, kind: input, shape index: {}]   ;;  %s861_s3 = inlined_call_operand.vmem [shape: f32[1,256], index: 3, kind: input, shape index: {}]   ;;  %s862_s4 = inlined_call_operand.vmem [shape: f32[1,256], index: 4, kind: input, shape index: {}]   ;;  %s863_s5 = inlined_call_operand.vmem [shape: f32[16,256], index: 5, kind: input, shape index: {}]   ;;  %s864_s6 = inlined_call_operand.vmem [shape: f32[32,256], index: 6, kind: output, shape index: {}]  }
   0x1   :  { %13 = vsyncpa [#allocation3 + $0x1], 0  ;;  %s712_s21 = smov 0   ;;  %s714_s22 = smov 0  }
   0x2   :  { %s716_s23 = smov 0   ;;  %s718_s24 = smov 0  }
   0x3 LB: > { %s533_s25 = sadd.s32 4294967295, %s671_s24   ;;  %s732_s26 = sadd.s32 1, %s671_s24   ;;  %s671_s24 = sphi %s718_s24, %s871_s24   ;;  %s667_s23 = sphi %s716_s23, %s870_s23   ;;  %s663_s22 = sphi %s714_s22, %s869_s22   ;;  %s659_s21 = sphi %s712_s21, %s868_s21  }
   0x4   : > { %s23_s27 = ssub.s32 %s671_s24, %s732_s26  ;;  %s26_s28 = sadd.s32 1, %s667_s23 }
   0x5   : > { %p24_p0 = scmp.eq.s32.totalorder %s23_s27, 0  ;;  %p33_p1 = scmp.ne.s32.totalorder %s667_s23, %s663_s22 }
   0x6   : > { %p34_p2 = scmp.eq.s32.totalorder %s671_s24, 0  ;;  %p39_p3 = scmp.ne.s32.totalorder %s663_s22, %s659_s21 }
   0x7   : > { %s742_s29 = scalar_select %p24_p0, %s667_s23, %s26_s28  }
   0x8   : > { %p35_p4 = por %p34_p2, %p33_p1  ;;  %p40_p5 = scmp.eq.s32.totalorder %s533_s25, 0 }
   0x9   : > { %p567_p6 = scmp.lt.s32.totalorder %s671_s24, 2  ;;  %s209_s7 = sand.u32 1, %s667_s23  }
   0xa   : > { %p747_p7 = por %p40_p5, %p39_p3  ;;  %s537_s8 = sshll.u32 %s209_s7, 4 }
   0xb   : > { %s551_s9 = sshll.u32 %s671_s24, 8  ;;  %s213_s13 = scalar_lea.vmem [#allocation2], %s537_s8 }
   0xc   : > { %s756_s12 = scalar_lea.hbm %s858_s0, %s551_s9  ;;  %s220_s14 = sshll.u32 %s213_s13, 4  ;;  %s758_s14 = int_to_ptr.vmem [resolvable:$true] %s220_s14 }
   0xd   : > { %p760_p8 = pnand %p567_p6, %p35_p4  ;;  %s765_s16 = scalar_lea.sflag [#allocation3], %s209_s7 }
   0xe   : > { %s607_s17 = scalar_lea.hbm %s756_s12, 256  ;;  %s612_s20 = scalar_lea.hbm %s858_s0, 512 }
   0xf   : > { %p608_p10 = scmp.ne.s32.totalorder %s756_s12, %s607_s17  ;;  %p609_p11 = pneg %p760_p8 }
  0x10   : > { %p613_p0 = scmp.lt.u32.totalorder %s756_s12, %s858_s0  ;;  %p614_p1 = scmp.lt.u32.totalorder %s612_s20, %s607_s17 }
  0x11   : > { %p610_p12 = pnand %p609_p11, %p608_p10  ;;  %p616_p3 = scmp.lt.u32.totalorder %s607_s17, %s756_s12 }
  0x12   : > { %p615_p2 = por %p614_p1, %p613_p0 }
  0x13   : > { %p611_p13 = pneg %p610_p12 }
  0x14   : > { %p617_p4 = por %p616_p3, %p615_p2 }
  0x16   : > { %p618_p5 = pnand %p617_p4, %p611_p13 }
  0x18   : > { %621 = shalt.err (!%p618_p5)
}
  0x19   : > { %s622_s28 = scalar_lea.vmem %s758_s14, 256  ;;  %s673_s7 = smov [#allocation2]  }
  0x1a   : > { %p623_p6 = scmp.ne.s32.totalorder %s758_s14, %s622_s28  ;;  %s627_s8 = sshll.u32 %s673_s7, 4  ;;  %s628_s8 = int_to_ptr.vmem [resolvable:$false] %s627_s8 }
  0x1b   : > { %s629_s9 = scalar_lea.vmem %s628_s8, 512  ;;  %p630_p9 = scmp.lt.s32.totalorder %s758_s14, %s628_s8 }
  0x1c   : > { %p625_p10 = pnand %p623_p6, %p609_p11  ;;  %p631_p0 = scmp.lt.s32.totalorder %s629_s9, %s622_s28 }
  0x1e   : > { %p626_p12 = pneg %p625_p10  ;;  %p632_p1 = por %p631_p0, %p630_p9 }
  0x20   : > { %p633_p2 = pnand %p632_p1, %p626_p12 }
  0x22   : > { %636 = shalt.err (!%p633_p2)
}
  0x23   : > { %s674_s10 = smov 128   ;;  %s675_s11 = smov 8  }
  0x24   : > { %566 = dma.hbm_to_vmem [thread:$0]  (!%p760_p8), %s756_s12, 256, %s758_s14, %s765_s16, %s674_s10, %s674_s10, %s675_s11  }
  0x25   : > { %p228_p11 = scmp.lt.s32.totalorder %s671_s24, 3  ;;  %p867_p13 = scmp.ge.s32.totalorder %s671_s24, 1 }
  0x27   : > { %p229_p3 = pnand %p867_p13, %p228_p11 }
  0x28   : > { %s234_s13 = sand.u32 (!%p229_p3), 1, %s663_s22  }
  0x29   : > { %232 = sbr.rel (%p229_p3) target bundleno = 595 (0x253), region = 44  ;;  %s541_s17 = sshll.u32 (!%p229_p3), %s234_s13, 4 }
  0x2a   : > { %s235_s18 = scalar_lea.sflag (!%p229_p3), [#allocation3], %s234_s13  ;;  %s238_s19 = scalar_lea.vmem (!%p229_p3), [#allocation2], %s541_s17 }
  0x30   : > { %654 = dma.done.wait (%p747_p7), %s235_s18, 256  }
  0x31   : > { %656 = vsyncadd (%p747_p7), %s235_s18, 4294967040  ;;  %v676_v0 = vmov 0.0   ;;  %v279_v1 = vld [vmem:[%s859_s1 + $0x8] sm:$0xff]  ;;  %v281_v2 = vld [vmem:[%s859_s1 + $0x18] sm:$0xff]  ;;  %vm303_vm0 = vcmask 1046528   ;;  %vm296_vm1 = vcmask 187392   ;;  %v286_v11 = vlaneseq }
  0x32   : > { %374 = vmatprep.mubr.f32.mxu0 %v676_v0  ;;  %380 = vmatprep.mubr.f32.mxu1 %v676_v0  ;;  %v278_v3 = vld [vmem:[%s859_s1] sm:$0xff]  ;;  %v553_v4 = vpack.c.bf16 %v281_v2, %v279_v1  ;;  %v280_v5 = vld [vmem:[%s859_s1 + $0x10] sm:$0xff]  ;;  %v283_v7 = vld [vmem:[%s859_s1 + $0x28] sm:$0x7f]  ;;  %s542_s13 = sshll.u32 %s533_s25, 1 }
  0x33   : > { %v555_v6 = vpack.c.bf16 %v280_v5, %v278_v3  ;;  %v282_v8 = vld [vmem:[%s859_s1 + $0x20] sm:$0x7f]  ;;  %v277_v10 = vld [vmem:[%s238_s19 + $0x8] sm:$0xff]  ;;  %v287_v12 = vshrl.u32 %v286_v11, 7  ;;  %p270_p7 = scmp.lt.s32.totalorder %s542_s13, 3 }
  0x34   : > { %554 = vmatprep.subr.bf16.mxu0 %v553_v4  ;;  %557 = vmatprep.subr.bf16.mxu1 %v553_v4  ;;  %v276_v9 = vld [vmem:[%s238_s19] sm:$0xff]  ;;  %v453_v61 = vld [vmem:[%s863_s5 + $0x8] sm:$0xff] }
  0x35   : > { %556 = vmatpush1.bf16.msra.mxu0 %v555_v6  ;;  %559 = vmatpush1.bf16.msra.mxu1 %v555_v6  ;;  %v288_v13 = vsub.s32 0, %v287_v12  ;;  %v284_v14 = vld [vmem:[%s860_s2] sm:$0x3]  ;;  %v292_v15 = vsub.s32 1, %v287_v12  ;;  %s873_s13 = smov (!%p270_p7, %s542_s13), 3  ;;  %v454_v6 = vld [vmem:[%s863_s5 + $0x10] sm:$0xff] }
  0x36   : > { %545 = vmatprep.subr.msk.mxu0 %vm303_vm0, %v283_v7  ;;  %558 = vmatprep.subr.msk.mxu1 %vm303_vm0, %v283_v7  ;;  %v387_v48 = vld [vmem:[%s861_s3] sm:$0x3]  ;;  %s552_s24 = sshll.u32 %s873_s13, 4  ;;  %v455_v7 = vld [vmem:[%s863_s5 + $0x18] sm:$0xff] }
  0x37   : > { %v289_v16 = vrot.slane %v284_v14, %v288_v13  ;;  %v293_v17 = vrot.slane %v284_v14, %v292_v15  ;;  %v388_v49 = vld [vmem:[%s862_s4] sm:$0x3]  ;;  %v426_v50 = vrot.slane %v387_v48, %v288_v13  ;;  %v430_v51 = vrot.slane %v387_v48, %v292_v15  ;;  %s274_s27 = scalar_lea.vmem %s864_s6, %s552_s24 }
  0x38   : > { %v441_v53 = vrot.slane %v388_v49, %v288_v13  ;;  %v445_v54 = vrot.slane %v388_v49, %v292_v15  ;;  %v452_v60 = vld [vmem:[%s863_s5] sm:$0xff] }
  0x39   : > { %546 = vmatpush1.msk.msra.mxu0 %vm303_vm0, %v282_v8  ;;  %560 = vmatpush1.msk.msra.mxu1 %vm303_vm0, %v282_v8 }
  0x3a   : > { %547 = vmatmul.mubr.msk.f32.vlgmr.msra.gmra.mrb[0].mxu0 %vm296_vm1, %v276_v9  ;;  %548 = vmatmul.mubr.msk.f32.vlgmr.msra.gmra.mrb[0].mxu1 %vm296_vm1, %v277_v10 }
 0x10d   : > { %v376_v18 = vpop.f32.mrb[0].mxu0  ;;  %v382_v19 = vpop.f32.mrb[0].mxu1 }
 0x10e   : > { %v377_v20 = vadd.f32 %v376_v18, %v289_v16  ;;  %v378_v21 = vpop.f32.mrb[1].mxu0  ;;  %v384_v22 = vpop.f32.mrb[1].mxu1  ;;  %v383_v24 = vadd.f32 %v382_v19, %v289_v16 }
 0x10f   : > { %v379_v23 = vadd.f32 %v378_v21, %v293_v17  ;;  %v385_v25 = vadd.f32 %v384_v22, %v293_v17 }
 0x111   : > { %v389_v26 = vadd.f32 %v379_v23, %v377_v20  ;;  %v392_v27 = vadd.f32 %v385_v25, %v383_v24 }
 0x113   : > { %390 = vadd.xlane.f32.xlu0 %v389_v26 }
 0x117   : > { %393 = vadd.xlane.f32.xlu0 %v392_v27 }
 0x1a0   : > { %v391_v28 = vpop.xlane.xlu0 %390 }
 0x1a1   : > { %v396_v29 = vmul.f32 0.00390625, %v391_v28 }
 0x1a3   : > { %v398_v30 = vsub.f32 %v377_v20, %v396_v29  ;;  %v399_v31 = vsub.f32 %v379_v23, %v396_v29 }
 0x1a4   : > { %v394_v32 = vpop.xlane.xlu0 %393 }
 0x1a5   : > { %v397_v33 = vmul.f32 0.00390625, %v394_v32  ;;  %v402_v34 = vmul.f32 %v398_v30, %v398_v30  ;;  %v403_v35 = vmul.f32 %v399_v31, %v399_v31 }
 0x1a7   : > { %v400_v36 = vsub.f32 %v383_v24, %v397_v33  ;;  %v401_v37 = vsub.f32 %v385_v25, %v397_v33  ;;  %v406_v38 = vadd.f32 %v403_v35, %v402_v34 }
 0x1a9   : > { %407 = vadd.xlane.f32.xlu1 %v406_v38  ;;  %v404_v39 = vmul.f32 %v400_v36, %v400_v36  ;;  %v405_v40 = vmul.f32 %v401_v37, %v401_v37 }
 0x1ab   : > { %v409_v41 = vadd.f32 %v405_v40, %v404_v39 }
 0x1ad   : > { %410 = vadd.xlane.f32.xlu1 %v409_v41 }
 0x236   : > { %v408_v42 = vpop.xlane.xlu1 %407 }
 0x237   : > { %v412_v43 = vmul.f32 0.00390625, %v408_v42 }
 0x239   : > { %v414_v44 = vadd.f32 1e-05, %v412_v43 }
 0x23a   : > { %v411_v45 = vpop.xlane.xlu1 %410 }
 0x23b   : > { %603 = vrsqrt.f32 %v414_v44  ;;  %v413_v46 = vmul.f32 0.00390625, %v411_v45 }
 0x23d   : > { %v415_v47 = vadd.f32 1e-05, %v413_v46 }
 0x23f   : > { %605 = vrsqrt.f32 %v415_v47 }
 0x245   : > { %v604_v52 = vpop.eup %603 }
 0x246   : > { %v418_v55 = vmul.f32 %v604_v52, %v398_v30  ;;  %v419_v56 = vmul.f32 %v604_v52, %v399_v31 }
 0x248   : > { %v433_v57 = vmul.f32 %v426_v50, %v418_v55  ;;  %v434_v58 = vmul.f32 %v430_v51, %v419_v56 }
 0x249   : > { %v606_v59 = vpop.eup %605 }
 0x24a   : > { %v448_v62 = vadd.f32 %v441_v53, %v433_v57  ;;  %v449_v63 = vadd.f32 %v445_v54, %v434_v58  ;;  %v420_v0 = vmul.f32 %v606_v59, %v400_v36  ;;  %v421_v1 = vmul.f32 %v606_v59, %v401_v37 }
 0x24c   : > { %v456_v2 = vadd.f32 %v452_v60, %v448_v62  ;;  %v457_v3 = vadd.f32 %v453_v61, %v449_v63  ;;  %v435_v4 = vmul.f32 %v426_v50, %v420_v0  ;;  %v436_v5 = vmul.f32 %v430_v51, %v421_v1 }
 0x24e   : > { %460 = vst [vmem:[%s274_s27] sm:$0xff] %v456_v2  ;;  %461 = vst [vmem:[%s274_s27 + $0x8] sm:$0xff] %v457_v3  ;;  %v450_v8 = vadd.f32 %v441_v53, %v435_v4  ;;  %v451_v9 = vadd.f32 %v445_v54, %v436_v5 }
 0x250   : > { %v458_v10 = vadd.f32 %v454_v6, %v450_v8  ;;  %v459_v11 = vadd.f32 %v455_v7, %v451_v9 }
 0x252   : > { %462 = vst [vmem:[%s274_s27 + $0x10] sm:$0xff] %v458_v10  ;;  %463 = vst [vmem:[%s274_s27 + $0x18] sm:$0xff] %v459_v11 }
 0x253 PF: > { %p16_p8 = scmp.ge.s32.totalorder %s732_s26, 4   ;;  %s868_s21 = smov %s663_s22 }
 0x254   : > { %s869_s22 = smov %s667_s23  ;;  %s870_s23 = smov %s742_s29 }
 0x255   : > { %s871_s24 = smov %s732_s26  ;;  %18 = sbr.rel (!%p16_p8) target bundleno = 3 (0x3), region = 84 }
 0x25c   :  { %488 = vsyncpa [#allocation3], 1 }
 0x25d   :  { %490 = vsyncpa [#allocation3 + $0x1], 1 }

// kernel: transformer_forward.7
= control target key start
LH: loop header
LB: loop body
LE: loop exit
PB: predicated region body
PF: predicated region fallthrough
CT: control target
= control target key end

     0   :  { %12 = vsyncpa [#allocation3], 0  ;;  %s1012_s24 = smov 0   ;;  %s1316_s0 = inlined_call_operand.vmem [shape: f32[32,256], index: 0, kind: input, shape index: {}]   ;;  %s1317_s1 = inlined_call_operand.vmem [shape: f32[256,256], index: 1, kind: input, shape index: {}]   ;;  %s1318_s2 = inlined_call_operand.vmem [shape: f32[1,256], index: 2, kind: input, shape index: {}]   ;;  %s1319_s3 = inlined_call_operand.hbm [shape: f32[256,256], index: 3, kind: input, shape index: {}]   ;;  %s1320_s4 = inlined_call_operand.vmem [shape: f32[1,256], index: 4, kind: input, shape index: {}]   ;;  %s1321_s5 = inlined_call_operand.vmem [shape: f32[1,256], index: 5, kind: input, shape index: {}]   ;;  %s1322_s6 = inlined_call_operand.vmem [shape: f32[1,256], index: 6, kind: input, shape index: {}]   ;;  %s1323_s7 = inlined_call_operand.vmem [shape: f32[32,256], index: 7, kind: output, shape index: {}]  }
   0x1 LB: > { %s759_s25 = sadd.s32 4294967295, %s967_s24   ;;  %p761_p0 = scmp.ge.s32.totalorder %s967_s24, 1  ;;  %s967_s24 = sphi %s1012_s24, %s18_s24  }
   0x2   : > { %p201_p1 = scmp.lt.s32.totalorder %s967_s24, 3  ;;  %s969_s26 = smov [#allocation2]  }
   0x3   : > { %s219_s27 = sshll.u32 %s969_s26, 4  ;;  %p1026_p3 = scmp.eq.s32.totalorder %s759_s25, 0  ;;  %s220_s27 = int_to_ptr.vmem [resolvable:$true] %s219_s27 }
   0x4   : > { %p1020_p2 = pnand %p761_p0, %p201_p1  ;;  %s929_s10 = scalar_lea.hbm %s1319_s3, 8192 }
   0x5   : > { %s1328_s29 = scalar_select %p1026_p3, 1, 0 }
   0x6   : > { %s1327_s28 = scalar_select %p1020_p2, 1, 0 }
   0x7   : > { %p908_p4 = pneg %p1020_p2  ;;  %p930_p6 = scmp.ne.s32.totalorder %s1319_s3, %s929_s10 }
   0x8   : > { %p936_p10 = scmp.lt.u32.totalorder %s929_s10, %s1319_s3 }
   0x9   : > { %p1034_p5 = pnand %p1026_p3, %p908_p4 }
   0xb   : > { %p931_p7 = pneg %p1034_p5 }
   0xd   : > { %p932_p8 = pnand %p931_p7, %p930_p6 }
   0xf   : > { %p933_p9 = pneg %p932_p8 }
  0x11   : > { %p938_p11 = pnand %p936_p10, %p933_p9 }
  0x13   : > { %941 = shalt.err (!%p938_p11)
}
  0x14   : > { %s942_s15 = scalar_lea.vmem %s220_s27, 8192  ;;  %p950_p1 = scmp.lt.s32.totalorder %s220_s27, %s220_s27 }
  0x15   : > { %p943_p12 = scmp.ne.s32.totalorder %s220_s27, %s942_s15  ;;  %p951_p4 = scmp.lt.s32.totalorder %s942_s15, %s942_s15 }
  0x17   : > { %p945_p13 = pnand %p943_p12, %p931_p7  ;;  %p952_p3 = por %p951_p4, %p950_p1 }
  0x19   : > { %p946_p0 = pneg %p945_p13 }
  0x1b   : > { %p953_p2 = pnand %p952_p3, %p946_p0 }
  0x1d   : > { %956 = shalt.err (!%p953_p2)
}
  0x1e   : > { %s970_s16 = smov 256   ;;  %s971_s17 = smov 16  }
  0x1f   : > { %911 = dma.hbm_to_vmem [thread:$0]  (!%p1034_p5), %s1319_s3, 8192, %s220_s27, [#allocation3], %s970_s16, %s970_s16, %s971_s17  }
  0x20   : > { %p1330_p6 = scmp.ne.s32.totalorder %s1327_s28, 0 }
  0x21   : > { %p1331_p8 = scmp.ne.s32.totalorder (!%p1330_p6), %s1328_s29, 0 }
  0x22   : > { %254 = sbr.rel (%p1330_p6) target bundleno = 864 (0x360), region = 48 }
  0x29   : > { %962 = dma.done.wait (%p1331_p8), [#allocation3], 8192  }
  0x2a   : > { %964 = vsyncadd (%p1331_p8), [#allocation3], 4294959104  ;;  %v307_v0 = vld [vmem:[%s1317_s1 + $0x8] sm:$0xff]  ;;  %v309_v1 = vld [vmem:[%s1317_s1 + $0x18] sm:$0xff]  ;;  %s766_s19 = sshll.u32 %s759_s25, 1 }
  0x2b   : > { %v306_v2 = vld [vmem:[%s1317_s1] sm:$0xff]  ;;  %v776_v3 = vpack.c.bf16 %v309_v1, %v307_v0  ;;  %v308_v4 = vld [vmem:[%s1317_s1 + $0x10] sm:$0xff]  ;;  %v311_v5 = vld [vmem:[%s1317_s1 + $0x28] sm:$0xff]  ;;  %p289_p2 = scmp.lt.s32.totalorder %s766_s19, 3 }
  0x2c   : > { %v313_v6 = vld [vmem:[%s1317_s1 + $0x38] sm:$0xff]  ;;  %v778_v7 = vpack.c.bf16 %v308_v4, %v306_v2  ;;  %v310_v9 = vld [vmem:[%s1317_s1 + $0x20] sm:$0xff]  ;;  %v312_v10 = vld [vmem:[%s1317_s1 + $0x30] sm:$0xff] }
  0x2d   : > { %v780_v8 = vpack.c.bf16 %v313_v6, %v311_v5  ;;  %v315_v11 = vld [vmem:[%s1317_s1 + $0x48] sm:$0xff]  ;;  %777 = vmatprep.subr.bf16.mxu0 %v776_v3  ;;  %v317_v12 = vld [vmem:[%s1317_s1 + $0x58] sm:$0xff]  ;;  %v782_v13 = vpack.c.bf16 %v312_v10, %v310_v9  ;;  %v314_v15 = vld [vmem:[%s1317_s1 + $0x40] sm:$0xff]  ;;  %s1333_s19 = smov (!%p289_p2, %s766_s19), 3 }
  0x2e   : > { %779 = vmatpush1.bf16.msra.mxu0 %v778_v7  ;;  %v784_v14 = vpack.c.bf16 %v317_v12, %v315_v11  ;;  %v316_v16 = vld [vmem:[%s1317_s1 + $0x50] sm:$0xff]  ;;  %v319_v17 = vld [vmem:[%s1317_s1 + $0x68] sm:$0xff]  ;;  %v321_v18 = vld [vmem:[%s1317_s1 + $0x78] sm:$0xff]  ;;  %s774_s23 = sshll.u32 %s1333_s19, 4 }
  0x2f   : > { %781 = vmatprep.subr.bf16.mxu0 %v780_v8  ;;  %v786_v19 = vpack.c.bf16 %v316_v16, %v314_v15  ;;  %v788_v20 = vpack.c.bf16 %v321_v18, %v319_v17  ;;  %v318_v21 = vld [vmem:[%s1317_s1 + $0x60] sm:$0xff]  ;;  %v320_v22 = vld [vmem:[%s1317_s1 + $0x70] sm:$0xff]  ;;  %v323_v23 = vld [vmem:[%s1317_s1 + $0x88] sm:$0xff]  ;;  %s1148_s12 = scalar_lea.vmem %s1316_s0, %s774_s23  ;;  %s300_s26 = scalar_lea.vmem %s1323_s7, %s774_s23 }
  0x30   : > { %v325_v24 = vld [vmem:[%s1317_s1 + $0x98] sm:$0xff]  ;;  %v790_v25 = vpack.c.bf16 %v320_v22, %v318_v21  ;;  %v322_v27 = vld [vmem:[%s1317_s1 + $0x80] sm:$0xff]  ;;  %v324_v28 = vld [vmem:[%s1317_s1 + $0x90] sm:$0xff] }
  0x31   : > { %v792_v26 = vpack.c.bf16 %v325_v24, %v323_v23  ;;  %v327_v29 = vld [vmem:[%s1317_s1 + $0xa8] sm:$0xff]  ;;  %v329_v30 = vld [vmem:[%s1317_s1 + $0xb8] sm:$0xff]  ;;  %v794_v31 = vpack.c.bf16 %v324_v28, %v322_v27  ;;  %v326_v33 = vld [vmem:[%s1317_s1 + $0xa0] sm:$0xff] }
  0x32   : > { %783 = vmatpush1.bf16.msra.mxu0 %v782_v13  ;;  %v796_v32 = vpack.c.bf16 %v329_v30, %v327_v29  ;;  %v328_v34 = vld [vmem:[%s1317_s1 + $0xb0] sm:$0xff]  ;;  %v331_v35 = vld [vmem:[%s1317_s1 + $0xc8] sm:$0xff]  ;;  %v333_v36 = vld [vmem:[%s1317_s1 + $0xd8] sm:$0xff] }
  0x33   : > { %785 = vmatprep.subr.bf16.mxu0 %v784_v14  ;;  %v798_v37 = vpack.c.bf16 %v328_v34, %v326_v33  ;;  %v800_v38 = vpack.c.bf16 %v333_v36, %v331_v35  ;;  %v330_v39 = vld [vmem:[%s1317_s1 + $0xc0] sm:$0xff]  ;;  %v332_v40 = vld [vmem:[%s1317_s1 + $0xd0] sm:$0xff]  ;;  %v1157_v41 = vld [vmem:[%s1148_s12 + $0x8] sm:$0xff] }
  0x34   : > { %v335_v42 = vld [vmem:[%s1317_s1 + $0xe8] sm:$0xff]  ;;  %v337_v43 = vld [vmem:[%s1317_s1 + $0xf8] sm:$0xff]  ;;  %446 = vmatprep.mubr.f32.mxu0 %v1157_v41  ;;  %v334_v45 = vld [vmem:[%s1317_s1 + $0xe0] sm:$0xff]  ;;  %v802_v50 = vpack.c.bf16 %v332_v40, %v330_v39 }
  0x35   : > { %v464_v44 = vld [vmem:[#allocation2 + $0x8] sm:$0xff]  ;;  %v336_v46 = vld [vmem:[%s1317_s1 + $0xf0] sm:$0xff]  ;;  %v466_v47 = vld [vmem:[#allocation2 + $0x18] sm:$0xff]  ;;  %v804_v56 = vpack.c.bf16 %v337_v43, %v335_v42 }
  0x36   : > { %787 = vmatpush1.bf16.msra.mxu0 %v786_v19  ;;  %v463_v48 = vld [vmem:[#allocation2] sm:$0xff]  ;;  %v465_v49 = vld [vmem:[#allocation2 + $0x10] sm:$0xff]  ;;  %v840_v51 = vpack.c.bf16 %v466_v47, %v464_v44  ;;  %v468_v53 = vld [vmem:[#allocation2 + $0x28] sm:$0xff]  ;;  %v806_v0 = vpack.c.bf16 %v336_v46, %v334_v45 }
  0x37   : > { %789 = vmatprep.subr.bf16.mxu0 %v788_v20  ;;  %v842_v52 = vpack.c.bf16 %v465_v49, %v463_v48  ;;  %v470_v54 = vld [vmem:[#allocation2 + $0x38] sm:$0xff]  ;;  %v467_v55 = vld [vmem:[#allocation2 + $0x20] sm:$0xff]  ;;  %v469_v58 = vld [vmem:[#allocation2 + $0x30] sm:$0xff] }
  0x38   : > { %v844_v57 = vpack.c.bf16 %v470_v54, %v468_v53  ;;  %v472_v59 = vld [vmem:[#allocation2 + $0x48] sm:$0xff]  ;;  %v474_v60 = vld [vmem:[#allocation2 + $0x58] sm:$0xff]  ;;  %841 = vmatprep.subr.bf16.mxu1 %v840_v51  ;;  %v846_v63 = vpack.c.bf16 %v469_v58, %v467_v55  ;;  %v338_v1 = vld [vmem:[%s1317_s1 + $0x100] sm:$0xff] }
  0x39   : > { %v339_v61 = vld [vmem:[%s1317_s1 + $0x108] sm:$0xff]  ;;  %v341_v62 = vld [vmem:[%s1317_s1 + $0x118] sm:$0xff]  ;;  %843 = vmatpush1.bf16.msra.mxu1 %v842_v52  ;;  %v848_v2 = vpack.c.bf16 %v474_v60, %v472_v59  ;;  %v471_v3 = vld [vmem:[#allocation2 + $0x40] sm:$0xff] }
  0x3a   : > { %791 = vmatpush1.bf16.msra.mxu0 %v790_v25  ;;  %845 = vmatprep.subr.bf16.mxu1 %v844_v57  ;;  %v473_v4 = vld [vmem:[#allocation2 + $0x50] sm:$0xff]  ;;  %v808_v5 = vpack.c.bf16 %v341_v62, %v339_v61  ;;  %v476_v7 = vld [vmem:[#allocation2 + $0x68] sm:$0xff]  ;;  %v478_v8 = vld [vmem:[#allocation2 + $0x78] sm:$0xff] }
  0x3b   : > { %793 = vmatprep.subr.bf16.mxu0 %v792_v26  ;;  %v340_v6 = vld [vmem:[%s1317_s1 + $0x110] sm:$0xff]  ;;  %v343_v9 = vld [vmem:[%s1317_s1 + $0x128] sm:$0xff]  ;;  %v345_v10 = vld [vmem:[%s1317_s1 + $0x138] sm:$0xff]  ;;  %v850_v11 = vpack.c.bf16 %v473_v4, %v471_v3  ;;  %v852_v14 = vpack.c.bf16 %v478_v8, %v476_v7 }
  0x3c   : > { %v810_v12 = vpack.c.bf16 %v340_v6, %v338_v1  ;;  %v342_v13 = vld [vmem:[%s1317_s1 + $0x120] sm:$0xff]  ;;  %v477_v16 = vld [vmem:[#allocation2 + $0x70] sm:$0xff]  ;;  %v812_v17 = vpack.c.bf16 %v345_v10, %v343_v9  ;;  %v480_v19 = vld [vmem:[#allocation2 + $0x88] sm:$0xff] }
  0x3d   : > { %847 = vmatpush1.bf16.msra.mxu1 %v846_v63  ;;  %v475_v15 = vld [vmem:[#allocation2 + $0x60] sm:$0xff]  ;;  %v344_v18 = vld [vmem:[%s1317_s1 + $0x130] sm:$0xff]  ;;  %v482_v20 = vld [vmem:[#allocation2 + $0x98] sm:$0xff] }
  0x3e   : > { %795 = vmatpush1.bf16.msra.mxu0 %v794_v31  ;;  %849 = vmatprep.subr.bf16.mxu1 %v848_v2  ;;  %v347_v21 = vld [vmem:[%s1317_s1 + $0x148] sm:$0xff]  ;;  %v349_v22 = vld [vmem:[%s1317_s1 + $0x158] sm:$0xff]  ;;  %v854_v23 = vpack.c.bf16 %v477_v16, %v475_v15  ;;  %v814_v24 = vpack.c.bf16 %v344_v18, %v342_v13  ;;  %v346_v25 = vld [vmem:[%s1317_s1 + $0x140] sm:$0xff]  ;;  %v856_v26 = vpack.c.bf16 %v482_v20, %v480_v19 }
  0x3f   : > { %797 = vmatprep.subr.bf16.mxu0 %v796_v32  ;;  %v479_v27 = vld [vmem:[#allocation2 + $0x80] sm:$0xff]  ;;  %v481_v28 = vld [vmem:[#allocation2 + $0x90] sm:$0xff]  ;;  %v816_v29 = vpack.c.bf16 %v349_v22, %v347_v21  ;;  %v484_v31 = vld [vmem:[#allocation2 + $0xa8] sm:$0xff] }
  0x40   : > { %v348_v30 = vld [vmem:[%s1317_s1 + $0x150] sm:$0xff]  ;;  %v486_v32 = vld [vmem:[#allocation2 + $0xb8] sm:$0xff]  ;;  %v351_v33 = vld [vmem:[%s1317_s1 + $0x168] sm:$0xff]  ;;  %v858_v35 = vpack.c.bf16 %v481_v28, %v479_v27 }
  0x41   : > { %851 = vmatpush1.bf16.msra.mxu1 %v850_v11  ;;  %v353_v34 = vld [vmem:[%s1317_s1 + $0x178] sm:$0xff]  ;;  %v818_v36 = vpack.c.bf16 %v348_v30, %v346_v25  ;;  %v483_v39 = vld [vmem:[#allocation2 + $0xa0] sm:$0xff]  ;;  %v485_v40 = vld [vmem:[#allocation2 + $0xb0] sm:$0xff] }
  0x42   : > { %799 = vmatpush1.bf16.msra.mxu0 %v798_v37  ;;  %853 = vmatprep.subr.bf16.mxu1 %v852_v14  ;;  %v350_v37 = vld [vmem:[%s1317_s1 + $0x160] sm:$0xff]  ;;  %v820_v42 = vpack.c.bf16 %v353_v34, %v351_v33  ;;  %v352_v43 = vld [vmem:[%s1317_s1 + $0x170] sm:$0xff]  ;;  %v488_v44 = vld [vmem:[#allocation2 + $0xc8] sm:$0xff]  ;;  %v862_v48 = vpack.c.bf16 %v485_v40, %v483_v39 }
  0x43   : > { %801 = vmatprep.subr.bf16.mxu0 %v800_v38  ;;  %v860_v38 = vpack.c.bf16 %v486_v32, %v484_v31  ;;  %v490_v45 = vld [vmem:[#allocation2 + $0xd8] sm:$0xff]  ;;  %v355_v46 = vld [vmem:[%s1317_s1 + $0x188] sm:$0xff]  ;;  %v822_v49 = vpack.c.bf16 %v352_v43, %v350_v37  ;;  %v487_v52 = vld [vmem:[#allocation2 + $0xc0] sm:$0xff] }
  0x44   : > { %v357_v47 = vld [vmem:[%s1317_s1 + $0x198] sm:$0xff]  ;;  %v864_v51 = vpack.c.bf16 %v490_v45, %v488_v44  ;;  %v489_v53 = vld [vmem:[#allocation2 + $0xd0] sm:$0xff]  ;;  %v359_v58 = vld [vmem:[%s1317_s1 + $0x1a8] sm:$0xff] }
  0x45   : > { %855 = vmatpush1.bf16.msra.mxu1 %v854_v23  ;;  %v824_v54 = vpack.c.bf16 %v357_v47, %v355_v46  ;;  %v356_v55 = vld [vmem:[%s1317_s1 + $0x190] sm:$0xff]  ;;  %v494_v57 = vld [vmem:[#allocation2 + $0xf8] sm:$0xff]  ;;  %v866_v60 = vpack.c.bf16 %v489_v53, %v487_v52  ;;  %v358_v62 = vld [vmem:[%s1317_s1 + $0x1a0] sm:$0xff] }
  0x46   : > { %803 = vmatpush1.bf16.msra.mxu0 %v802_v50  ;;  %857 = vmatprep.subr.bf16.mxu1 %v856_v26  ;;  %v354_v50 = vld [vmem:[%s1317_s1 + $0x180] sm:$0xff]  ;;  %v361_v59 = vld [vmem:[%s1317_s1 + $0x1b8] sm:$0xff]  ;;  %v493_v1 = vld [vmem:[#allocation2 + $0xf0] sm:$0xff] }
  0x47   : > { %805 = vmatprep.subr.bf16.mxu0 %v804_v56  ;;  %v492_v56 = vld [vmem:[#allocation2 + $0xe8] sm:$0xff]  ;;  %v826_v61 = vpack.c.bf16 %v356_v55, %v354_v50  ;;  %v828_v2 = vpack.c.bf16 %v361_v59, %v359_v58  ;;  %v360_v3 = vld [vmem:[%s1317_s1 + $0x1b0] sm:$0xff]  ;;  %v365_v7 = vld [vmem:[%s1317_s1 + $0x1d8] sm:$0xff] }
  0x48   : > { %v868_v63 = vpack.c.bf16 %v494_v57, %v492_v56  ;;  %v496_v4 = vld [vmem:[#allocation2 + $0x108] sm:$0xff]  ;;  %v830_v9 = vpack.c.bf16 %v360_v3, %v358_v62  ;;  %v362_v10 = vld [vmem:[%s1317_s1 + $0x1c0] sm:$0xff]  ;;  %v497_v13 = vld [vmem:[#allocation2 + $0x110] sm:$0xff] }
  0x49   : > { %859 = vmatpush1.bf16.msra.mxu1 %v858_v35  ;;  %v363_v6 = vld [vmem:[%s1317_s1 + $0x1c8] sm:$0xff]  ;;  %v364_v15 = vld [vmem:[%s1317_s1 + $0x1d0] sm:$0xff]  ;;  %v369_v19 = vld [vmem:[%s1317_s1 + $0x1f8] sm:$0xff] }
  0x4a   : > { %807 = vmatpush1.bf16.msra.mxu0 %v806_v0  ;;  %861 = vmatprep.subr.bf16.mxu1 %v860_v38  ;;  %v491_v0 = vld [vmem:[#allocation2 + $0xe0] sm:$0xff]  ;;  %v832_v14 = vpack.c.bf16 %v365_v7, %v363_v6  ;;  %v500_v16 = vld [vmem:[#allocation2 + $0x128] sm:$0xff]  ;;  %v834_v21 = vpack.c.bf16 %v364_v15, %v362_v10  ;;  %v501_v25 = vld [vmem:[#allocation2 + $0x130] sm:$0xff]  ;;  %v372_v6 = vlaneseq }
  0x4b   : > { %809 = vmatprep.subr.bf16.mxu0 %v808_v5  ;;  %v498_v5 = vld [vmem:[#allocation2 + $0x118] sm:$0xff]  ;;  %v870_v8 = vpack.c.bf16 %v493_v1, %v491_v0  ;;  %v367_v18 = vld [vmem:[%s1317_s1 + $0x1e8] sm:$0xff]  ;;  %v366_v22 = vld [vmem:[%s1317_s1 + $0x1e0] sm:$0xff] }
  0x4c   : > { %v872_v11 = vpack.c.bf16 %v498_v5, %v496_v4  ;;  %v836_v26 = vpack.c.bf16 %v369_v19, %v367_v18  ;;  %v368_v27 = vld [vmem:[%s1317_s1 + $0x1f0] sm:$0xff]  ;;  %v504_v28 = vld [vmem:[#allocation2 + $0x148] sm:$0xff]  ;;  %v503_v33 = vld [vmem:[#allocation2 + $0x140] sm:$0xff]  ;;  %v373_v7 = vshrl.u32 %v372_v6, 7 }
  0x4d   : > { %863 = vmatpush1.bf16.msra.mxu1 %v862_v48  ;;  %v838_v31 = vpack.c.bf16 %v368_v27, %v366_v22  ;;  %v505_v34 = vld [vmem:[#allocation2 + $0x150] sm:$0xff]  ;;  %v508_v35 = vld [vmem:[#allocation2 + $0x168] sm:$0xff]  ;;  %v1269_v38 = vld [vmem:[%s1148_s12] sm:$0xff] }
  0x4e   : > { %811 = vmatpush1.bf16.msra.mxu0 %v810_v12  ;;  %865 = vmatprep.subr.bf16.mxu1 %v864_v51  ;;  %v495_v12 = vld [vmem:[#allocation2 + $0x100] sm:$0xff]  ;;  %v882_v37 = vpack.c.bf16 %v505_v34, %v503_v33  ;;  %v1272_v43 = vld [vmem:[%s1148_s12 + $0x18] sm:$0xff]  ;;  %v512_v44 = vld [vmem:[#allocation2 + $0x188] sm:$0xff]  ;;  %v1285_v10 = vsub.s32 1, %v373_v7 }
  0x4f   : > { %813 = vmatprep.subr.bf16.mxu0 %v812_v17  ;;  %v502_v17 = vld [vmem:[#allocation2 + $0x138] sm:$0xff]  ;;  %v874_v20 = vpack.c.bf16 %v497_v13, %v495_v12  ;;  %v507_v40 = vld [vmem:[#allocation2 + $0x160] sm:$0xff]  ;;  %v1277_v47 = vld [vmem:[%s1148_s12 + $0x10] sm:$0xff] }
  0x50   : > { %v876_v23 = vpack.c.bf16 %v502_v17, %v500_v16  ;;  %v514_v45 = vld [vmem:[#allocation2 + $0x198] sm:$0xff]  ;;  %v513_v50 = vld [vmem:[#allocation2 + $0x190] sm:$0xff]  ;;  %v516_v51 = vld [vmem:[#allocation2 + $0x1a8] sm:$0xff] }
  0x51   : > { %867 = vmatpush1.bf16.msra.mxu1 %v866_v60  ;;  %v888_v48 = vpack.c.bf16 %v514_v45, %v512_v44  ;;  %v518_v52 = vld [vmem:[#allocation2 + $0x1b8] sm:$0xff]  ;;  %v515_v55 = vld [vmem:[#allocation2 + $0x1a0] sm:$0xff]  ;;  %v517_v56 = vld [vmem:[#allocation2 + $0x1b0] sm:$0xff] }
  0x52   : > { %815 = vmatpush1.bf16.msra.mxu0 %v814_v24  ;;  %869 = vmatprep.subr.bf16.mxu1 %v868_v63  ;;  %v499_v24 = vld [vmem:[#allocation2 + $0x120] sm:$0xff]  ;;  %v520_v57 = vld [vmem:[#allocation2 + $0x1c8] sm:$0xff]  ;;  %v522_v58 = vld [vmem:[#allocation2 + $0x1d8] sm:$0xff]  ;;  %v894_v59 = vpack.c.bf16 %v517_v56, %v515_v55 }
  0x53   : > { %817 = vmatprep.subr.bf16.mxu0 %v816_v29  ;;  %v506_v29 = vld [vmem:[#allocation2 + $0x158] sm:$0xff]  ;;  %v878_v30 = vpack.c.bf16 %v501_v25, %v499_v24  ;;  %v896_v60 = vpack.c.bf16 %v522_v58, %v520_v57  ;;  %v521_v62 = vld [vmem:[#allocation2 + $0x1d0] sm:$0xff]  ;;  %v524_v0 = vld [vmem:[#allocation2 + $0x1e8] sm:$0xff] }
  0x54   : > { %v880_v32 = vpack.c.bf16 %v506_v29, %v504_v28  ;;  %v526_v1 = vld [vmem:[#allocation2 + $0x1f8] sm:$0xff]  ;;  %v523_v3 = vld [vmem:[#allocation2 + $0x1e0] sm:$0xff]  ;;  %v525_v4 = vld [vmem:[#allocation2 + $0x1f0] sm:$0xff] }
  0x55   : > { %871 = vmatpush1.bf16.msra.mxu1 %v870_v8  ;;  %v902_v5 = vpack.c.bf16 %v525_v4, %v523_v3  ;;  %v1280_v8 = vsub.s32 0, %v373_v7  ;;  %v527_v25 = vld [vmem:[%s1320_s4] sm:$0x3] }
  0x56   : > { %819 = vmatpush1.bf16.msra.mxu0 %v818_v36  ;;  %873 = vmatprep.subr.bf16.mxu1 %v872_v11  ;;  %v510_v36 = vld [vmem:[#allocation2 + $0x178] sm:$0xff]  ;;  %v536_v27 = vrot.slane %v527_v25, %v1285_v10 }
  0x57   : > { %821 = vmatprep.subr.bf16.mxu0 %v820_v42  ;;  %v884_v39 = vpack.c.bf16 %v510_v36, %v508_v35  ;;  %v509_v42 = vld [vmem:[#allocation2 + $0x170] sm:$0xff] }
  0x58   : > { %v886_v46 = vpack.c.bf16 %v509_v42, %v507_v40 }
  0x59   : > { %875 = vmatpush1.bf16.msra.mxu1 %v874_v20 }
  0x5a   : > { %823 = vmatpush1.bf16.msra.mxu0 %v822_v49  ;;  %877 = vmatprep.subr.bf16.mxu1 %v876_v23  ;;  %v511_v49 = vld [vmem:[#allocation2 + $0x180] sm:$0xff] }
  0x5b   : > { %825 = vmatprep.subr.bf16.mxu0 %v824_v54  ;;  %v890_v53 = vpack.c.bf16 %v513_v50, %v511_v49  ;;  %v892_v54 = vpack.c.bf16 %v518_v52, %v516_v51 }
  0x5d   : > { %879 = vmatpush1.bf16.msra.mxu1 %v878_v30 }
  0x5e   : > { %827 = vmatpush1.bf16.msra.mxu0 %v826_v61  ;;  %881 = vmatprep.subr.bf16.mxu1 %v880_v32  ;;  %v519_v61 = vld [vmem:[#allocation2 + $0x1c0] sm:$0xff] }
  0x5f   : > { %829 = vmatprep.subr.bf16.mxu0 %v828_v2  ;;  %v898_v63 = vpack.c.bf16 %v521_v62, %v519_v61  ;;  %v900_v2 = vpack.c.bf16 %v526_v1, %v524_v0  ;;  %v620_v62 = vld [vmem:[%s1321_s5] sm:$0x3] }
  0x60   : > { %v659_v0 = vrot.slane %v620_v62, %v1280_v8  ;;  %v663_v1 = vrot.slane %v620_v62, %v1285_v10 }
  0x61   : > { %883 = vmatpush1.bf16.msra.mxu1 %v882_v37 }
  0x62   : > { %831 = vmatpush1.bf16.msra.mxu0 %v830_v9  ;;  %885 = vmatprep.subr.bf16.mxu1 %v884_v39  ;;  %v370_v9 = vld [vmem:[%s1318_s2] sm:$0x3] }
  0x63   : > { %833 = vmatprep.subr.bf16.mxu0 %v832_v14  ;;  %v375_v11 = vrot.slane %v370_v9, %v1280_v8  ;;  %v379_v12 = vrot.slane %v370_v9, %v1285_v10 }
  0x65   : > { %887 = vmatpush1.bf16.msra.mxu1 %v886_v46 }
  0x66   : > { %835 = vmatpush1.bf16.msra.mxu0 %v834_v21  ;;  %889 = vmatprep.subr.bf16.mxu1 %v888_v48 }
  0x67   : > { %837 = vmatprep.subr.bf16.mxu0 %v836_v26  ;;  %v532_v26 = vrot.slane %v527_v25, %v1280_v8 }
  0x69   : > { %891 = vmatpush1.bf16.msra.mxu1 %v890_v53 }
  0x6a   : > { %839 = vmatpush1.bf16.msra.mxu0 %v838_v31  ;;  %893 = vmatprep.subr.bf16.mxu1 %v892_v54 }
  0x6d   : > { %447 = vmatmul.mubr.f32.vlgmr.msra.gmra.mrb[0].mxu0 %v1269_v38  ;;  %895 = vmatpush1.bf16.msra.mxu1 %v894_v59 }
  0x6e   : > { %452 = vmatprep.mubr.f32.mxu0 %v1272_v43  ;;  %897 = vmatprep.subr.bf16.mxu1 %v896_v60 }
  0x71   : > { %453 = vmatmul.mubr.f32.gmra.mrb[2].mxu0 %v1277_v47  ;;  %899 = vmatpush1.bf16.msra.mxu1 %v898_v63  ;;  %v621_v63 = vld [vmem:[%s1322_s6] sm:$0x3] }
  0x72   : > { %901 = vmatprep.subr.bf16.mxu1 %v900_v2  ;;  %v674_v3 = vrot.slane %v621_v63, %v1280_v8  ;;  %v678_v4 = vrot.slane %v621_v63, %v1285_v10 }
  0x75   : > { %903 = vmatpush1.bf16.msra.mxu1 %v902_v5 }
 0x140   : > { %v448_v13 = vpop.f32.mrb[0].mxu0 }
 0x141   : > { %v449_v14 = vadd.f32 %v448_v13, %v375_v11  ;;  %v450_v15 = vpop.f32.mrb[1].mxu0 }
 0x142   : > { %v451_v16 = vadd.f32 %v450_v15, %v379_v12 }
 0x143   : > { %v459_v19 = vmax.f32 %v449_v14, 0.0 }
 0x144   : > { %v454_v17 = vpop.f32.mrb[2].mxu0  ;;  %v460_v18 = vmax.f32 %v451_v16, 0.0 }
 0x145   : > { %v455_v20 = vadd.f32 %v454_v17, %v375_v11  ;;  %v456_v21 = vpop.f32.mrb[3].mxu0 }
 0x146   : > { %v457_v22 = vadd.f32 %v456_v21, %v379_v12  ;;  %603 = vmatprep.mubr.f32.mxu1 %v460_v18 }
 0x147   : > { %604 = vmatmul.mubr.f32.vlgmr.msra.gmra.mrb[0].mxu1 %v459_v19  ;;  %v461_v24 = vmax.f32 %v455_v20, 0.0 }
 0x148   : > { %v462_v23 = vmax.f32 %v457_v22, 0.0 }
 0x14a   : > { %609 = vmatprep.mubr.f32.mxu1 %v462_v23 }
 0x14b   : > { %610 = vmatmul.mubr.f32.gmra.mrb[2].mxu1 %v461_v24 }
 0x21a   : > { %v605_v28 = vpop.f32.mrb[0].mxu1 }
 0x21b   : > { %v606_v29 = vadd.f32 %v605_v28, %v532_v26  ;;  %v607_v30 = vpop.f32.mrb[1].mxu1 }
 0x21c   : > { %v608_v31 = vadd.f32 %v607_v30, %v536_v27 }
 0x21d   : > { %v616_v32 = vadd.f32 %v606_v29, %v1269_v38 }
 0x21e   : > { %v611_v33 = vpop.f32.mrb[2].mxu1  ;;  %v617_v34 = vadd.f32 %v608_v31, %v1157_v41 }
 0x21f   : > { %v612_v35 = vadd.f32 %v611_v33, %v532_v26  ;;  %v613_v36 = vpop.f32.mrb[3].mxu1 }
 0x220   : > { %v614_v37 = vadd.f32 %v613_v36, %v536_v27  ;;  %v622_v39 = vadd.f32 %v617_v34, %v616_v32 }
 0x221   : > { %v618_v40 = vadd.f32 %v612_v35, %v1277_v47 }
 0x222   : > { %v619_v42 = vadd.f32 %v614_v37, %v1272_v43  ;;  %623 = vadd.xlane.f32.xlu0 %v622_v39 }
 0x224   : > { %v625_v44 = vadd.f32 %v619_v42, %v618_v40 }
 0x226   : > { %626 = vadd.xlane.f32.xlu0 %v625_v44 }
 0x2af   : > { %v624_v45 = vpop.xlane.xlu0 %623 }
 0x2b0   : > { %v629_v46 = vmul.f32 0.00390625, %v624_v45 }
 0x2b2   : > { %v631_v48 = vsub.f32 %v616_v32, %v629_v46  ;;  %v632_v49 = vsub.f32 %v617_v34, %v629_v46 }
 0x2b3   : > { %v627_v50 = vpop.xlane.xlu0 %626 }
 0x2b4   : > { %v630_v38 = vmul.f32 0.00390625, %v627_v50  ;;  %v635_v51 = vmul.f32 %v631_v48, %v631_v48  ;;  %v636_v52 = vmul.f32 %v632_v49, %v632_v49 }
 0x2b6   : > { %v633_v41 = vsub.f32 %v618_v40, %v630_v38  ;;  %v634_v53 = vsub.f32 %v619_v42, %v630_v38  ;;  %v639_v54 = vadd.f32 %v636_v52, %v635_v51 }
 0x2b8   : > { %640 = vadd.xlane.f32.xlu1 %v639_v54  ;;  %v637_v55 = vmul.f32 %v633_v41, %v633_v41  ;;  %v638_v56 = vmul.f32 %v634_v53, %v634_v53 }
 0x2ba   : > { %v642_v47 = vadd.f32 %v638_v56, %v637_v55 }
 0x2bc   : > { %643 = vadd.xlane.f32.xlu1 %v642_v47 }
 0x345   : > { %v641_v43 = vpop.xlane.xlu1 %640 }
 0x346   : > { %v645_v57 = vmul.f32 0.00390625, %v641_v43 }
 0x348   : > { %v647_v58 = vadd.f32 1e-05, %v645_v57 }
 0x349   : > { %v644_v59 = vpop.xlane.xlu1 %643 }
 0x34a   : > { %925 = vrsqrt.f32 %v647_v58  ;;  %v646_v60 = vmul.f32 0.00390625, %v644_v59 }
 0x34c   : > { %v648_v61 = vadd.f32 1e-05, %v646_v60 }
 0x34e   : > { %927 = vrsqrt.f32 %v648_v61 }
 0x354   : > { %v926_v2 = vpop.eup %925 }
 0x355   : > { %v651_v5 = vmul.f32 %v926_v2, %v631_v48  ;;  %v652_v6 = vmul.f32 %v926_v2, %v632_v49 }
 0x357   : > { %v666_v7 = vmul.f32 %v659_v0, %v651_v5  ;;  %v667_v9 = vmul.f32 %v663_v1, %v652_v6 }
 0x358   : > { %v928_v11 = vpop.eup %927 }
 0x359   : > { %v681_v12 = vadd.f32 %v674_v3, %v666_v7  ;;  %v682_v13 = vadd.f32 %v678_v4, %v667_v9  ;;  %v653_v14 = vmul.f32 %v928_v11, %v633_v41  ;;  %v654_v15 = vmul.f32 %v928_v11, %v634_v53 }
 0x35b   : > { %685 = vst [vmem:[%s300_s26] sm:$0xff] %v681_v12  ;;  %686 = vst [vmem:[%s300_s26 + $0x8] sm:$0xff] %v682_v13  ;;  %v668_v16 = vmul.f32 %v659_v0, %v653_v14  ;;  %v669_v8 = vmul.f32 %v663_v1, %v654_v15 }
 0x35d   : > { %v683_v17 = vadd.f32 %v674_v3, %v668_v16  ;;  %v684_v10 = vadd.f32 %v678_v4, %v669_v8 }
 0x35f   : > { %687 = vst [vmem:[%s300_s26 + $0x10] sm:$0xff] %v683_v17  ;;  %688 = vst [vmem:[%s300_s26 + $0x18] sm:$0xff] %v684_v10 }
 0x360 PF: > { %s18_s24 = sadd.s32 1, %s967_s24  }
 0x361   : > { %p15_p3 = scmp.ge.s32.totalorder %s18_s24, 4  }
 0x363   :  { %17 = sbr.rel (!%p15_p3) target bundleno = 1 (0x1), region = 83 }
 0x36a   :  { %713 = vsyncpa [#allocation3], 1 }
 0x36b   :  { %715 = vsyncpa [#allocation3 + $0x1], 1 }

// kernel: transformer_forward.8
= control target key start
LH: loop header
LB: loop body
LE: loop exit
PB: predicated region body
PF: predicated region fallthrough
CT: control target
= control target key end

     0   :  { %s2395_s24 = smov 0   ;;  %s3338_s0 = inlined_call_operand.vmem [shape: f32[32,256], index: 0, kind: input, shape index: {}]   ;;  %s3339_s1 = inlined_call_operand.vmem [shape: f32[256,768], index: 1, kind: input, shape index: {}]   ;;  %s3340_s2 = inlined_call_operand.vmem [shape: f32[1,768], index: 2, kind: input, shape index: {}]   ;;  %s3341_s3 = inlined_call_operand.vmem [shape: f32[256,256], index: 3, kind: input, shape index: {}]   ;;  %s3342_s4 = inlined_call_operand.vmem [shape: f32[1,256], index: 4, kind: input, shape index: {}]   ;;  %s3343_s5 = inlined_call_operand.vmem [shape: f32[1,256], index: 5, kind: input, shape index: {}]   ;;  %s3344_s6 = inlined_call_operand.vmem [shape: f32[1,256], index: 6, kind: input, shape index: {}]   ;;  %s3345_s7 = inlined_call_operand.vmem [shape: f32[32,256], index: 7, kind: output, shape index: {}]  }
   0x1 LB: > { %s1844_s25 = sadd.s32 4294967295, %s2352_s24   ;;  %p1848_p0 = scmp.ge.s32.totalorder %s2352_s24, 1  ;;  %s2352_s24 = sphi %s2395_s24, %s17_s24  }
   0x2   : > { %p239_p1 = scmp.lt.s32.totalorder %s2352_s24, 3 }
   0x4   : > { %p240_p2 = pnand %p1848_p0, %p239_p1 }
   0x5   : > { %v292_v0 = vld [vmem:[%s3339_s1 + $0x8] sm:$0xff] (!%p240_p2)  ;;  %v298_v1 = vld [vmem:[%s3339_s1 + $0x38] sm:$0xff] (!%p240_p2)  ;;  %v291_v5 = vld [vmem:[%s3339_s1] sm:$0xff] (!%p240_p2)  ;;  %s1849_s26 = sshll.u32 (!%p240_p2), %s1844_s25, 1  ;;  %vm746_vm0 = vcmask (!%p240_p2), 523264   ;;  %s2354_s15 = smov (!%p240_p2), 64  }
   0x6   : > { %243 = sbr.rel (%p240_p2) target bundleno = 1687 (0x697), region = 48  ;;  %v294_v2 = vld [vmem:[%s3339_s1 + $0x18] sm:$0xff] (!%p240_p2)  ;;  %v1971_v3 = vpack.c.bf16 (!%p240_p2), %v298_v1, %v292_v0  ;;  %v300_v4 = vld [vmem:[%s3339_s1 + $0x48] sm:$0xff] (!%p240_p2)  ;;  %v297_v6 = vld [vmem:[%s3339_s1 + $0x30] sm:$0xff] (!%p240_p2)  ;;  %p274_p3 = scmp.lt.s32.totalorder (!%p240_p2), %s1849_s26, 3  ;;  %vm836_vm2 = vcmask (!%p240_p2), 130048  }
   0x7   : > { %v2035_v7 = vpack.c.bf16 (!%p240_p2), %v300_v4, %v294_v2  ;;  %v1973_v8 = vpack.c.bf16 (!%p240_p2), %v297_v6, %v291_v5  ;;  %v293_v9 = vld [vmem:[%s3339_s1 + $0x10] sm:$0xff] (!%p240_p2)  ;;  %v299_v10 = vld [vmem:[%s3339_s1 + $0x40] sm:$0xff] (!%p240_p2)  ;;  %v304_v11 = vld [vmem:[%s3339_s1 + $0x68] sm:$0xff] (!%p240_p2) }
   0x8   : > { %1972 = vmatprep.subr.bf16.mxu0 (!%p240_p2), %v1971_v3  ;;  %v2037_v12 = vpack.c.bf16 (!%p240_p2), %v299_v10, %v293_v9  ;;  %v310_v13 = vld [vmem:[%s3339_s1 + $0x98] sm:$0xff] (!%p240_p2)  ;;  %v312_v15 = vld [vmem:[%s3339_s1 + $0xa8] sm:$0xff] (!%p240_p2)  ;;  %v303_v18 = vld [vmem:[%s3339_s1 + $0x60] sm:$0xff] (!%p240_p2) }
   0x9   : > { %v306_v14 = vld [vmem:[%s3339_s1 + $0x78] sm:$0xff] (!%p240_p2)  ;;  %2036 = vmatprep.subr.bf16.mxu1 (!%p240_p2), %v2035_v7  ;;  %1974 = vmatpush1.bf16.msra.mxu0 (!%p240_p2), %v1973_v8  ;;  %v1975_v16 = vpack.c.bf16 (!%p240_p2), %v310_v13, %v304_v11  ;;  %v309_v19 = vld [vmem:[%s3339_s1 + $0x90] sm:$0xff] (!%p240_p2)  ;;  %v311_v22 = vld [vmem:[%s3339_s1 + $0xa0] sm:$0xff] (!%p240_p2) }
   0xa   : > { %v2039_v17 = vpack.c.bf16 (!%p240_p2), %v312_v15, %v306_v14  ;;  %v305_v20 = vld [vmem:[%s3339_s1 + $0x70] sm:$0xff] (!%p240_p2)  ;;  %2038 = vmatpush1.bf16.msra.mxu1 (!%p240_p2), %v2037_v12  ;;  %v1977_v21 = vpack.c.bf16 (!%p240_p2), %v309_v19, %v303_v18  ;;  %v316_v23 = vld [vmem:[%s3339_s1 + $0xc8] sm:$0xff] (!%p240_p2)  ;;  %v322_v24 = vld [vmem:[%s3339_s1 + $0xf8] sm:$0xff] (!%p240_p2) }
   0xb   : > { %1976 = vmatprep.subr.bf16.mxu0 (!%p240_p2), %v1975_v16  ;;  %v2041_v25 = vpack.c.bf16 (!%p240_p2), %v311_v22, %v305_v20  ;;  %v1979_v26 = vpack.c.bf16 (!%p240_p2), %v322_v24, %v316_v23  ;;  %v318_v27 = vld [vmem:[%s3339_s1 + $0xd8] sm:$0xff] (!%p240_p2)  ;;  %v324_v28 = vld [vmem:[%s3339_s1 + $0x108] sm:$0xff] (!%p240_p2)  ;;  %v315_v29 = vld [vmem:[%s3339_s1 + $0xc0] sm:$0xff] (!%p240_p2) }
   0xc   : > { %2040 = vmatprep.subr.bf16.mxu1 (!%p240_p2), %v2039_v17  ;;  %v2043_v30 = vpack.c.bf16 (!%p240_p2), %v324_v28, %v318_v27  ;;  %v321_v31 = vld [vmem:[%s3339_s1 + $0xf0] sm:$0xff] (!%p240_p2)  ;;  %v323_v33 = vld [vmem:[%s3339_s1 + $0x100] sm:$0xff] (!%p240_p2)  ;;  %v328_v35 = vld [vmem:[%s3339_s1 + $0x128] sm:$0xff] (!%p240_p2) }
   0xd   : > { %v317_v32 = vld [vmem:[%s3339_s1 + $0xd0] sm:$0xff]  ;;  %1978 = vmatpush1.bf16.msra.mxu0 %v1977_v21  ;;  %v1981_v34 = vpack.c.bf16 %v321_v31, %v315_v29  ;;  %v334_v36 = vld [vmem:[%s3339_s1 + $0x158] sm:$0xff]  ;;  %v336_v40 = vld [vmem:[%s3339_s1 + $0x168] sm:$0xff]  ;;  %s3349_s26 = smov (!%p274_p3, %s1849_s26), 3 }
   0xe   : > { %v330_v37 = vld [vmem:[%s3339_s1 + $0x138] sm:$0xff]  ;;  %2042 = vmatpush1.bf16.msra.mxu1 %v2041_v25  ;;  %1980 = vmatprep.subr.bf16.mxu0 %v1979_v26  ;;  %v2045_v38 = vpack.c.bf16 %v323_v33, %v317_v32  ;;  %v1983_v39 = vpack.c.bf16 %v334_v36, %v328_v35  ;;  %v327_v41 = vld [vmem:[%s3339_s1 + $0x120] sm:$0xff]  ;;  %v333_v42 = vld [vmem:[%s3339_s1 + $0x150] sm:$0xff]  ;;  %s1881_s27 = sshll.u32 %s3349_s26, 4 }
   0xf   : > { %2044 = vmatprep.subr.bf16.mxu1 %v2043_v30  ;;  %v2047_v43 = vpack.c.bf16 %v336_v40, %v330_v37  ;;  %v329_v44 = vld [vmem:[%s3339_s1 + $0x130] sm:$0xff]  ;;  %v335_v45 = vld [vmem:[%s3339_s1 + $0x160] sm:$0xff]  ;;  %v340_v46 = vld [vmem:[%s3339_s1 + $0x188] sm:$0xff]  ;;  %v1985_v50 = vpack.c.bf16 %v333_v42, %v327_v41  ;;  %s2690_s22 = scalar_lea.vmem %s3338_s0, %s1881_s27  ;;  %s285_s29 = scalar_lea.vmem %s3345_s7, %s1881_s27 }
  0x10   : > { %v346_v47 = vld [vmem:[%s3339_s1 + $0x1b8] sm:$0xff]  ;;  %v348_v49 = vld [vmem:[%s3339_s1 + $0x1c8] sm:$0xff]  ;;  %v2049_v51 = vpack.c.bf16 %v335_v45, %v329_v44  ;;  %v339_v53 = vld [vmem:[%s3339_s1 + $0x180] sm:$0xff] }
  0x11   : > { %v342_v48 = vld [vmem:[%s3339_s1 + $0x198] sm:$0xff]  ;;  %1982 = vmatpush1.bf16.msra.mxu0 %v1981_v34  ;;  %v1987_v52 = vpack.c.bf16 %v346_v47, %v340_v46  ;;  %v345_v54 = vld [vmem:[%s3339_s1 + $0x1b0] sm:$0xff]  ;;  %v347_v57 = vld [vmem:[%s3339_s1 + $0x1c0] sm:$0xff] }
  0x12   : > { %2046 = vmatpush1.bf16.msra.mxu1 %v2045_v38  ;;  %1984 = vmatprep.subr.bf16.mxu0 %v1983_v39  ;;  %v341_v55 = vld [vmem:[%s3339_s1 + $0x190] sm:$0xff]  ;;  %v2051_v56 = vpack.c.bf16 %v348_v49, %v342_v48  ;;  %v352_v58 = vld [vmem:[%s3339_s1 + $0x1e8] sm:$0xff]  ;;  %v358_v59 = vld [vmem:[%s3339_s1 + $0x218] sm:$0xff]  ;;  %v1989_v62 = vpack.c.bf16 %v345_v54, %v339_v53 }
  0x13   : > { %2048 = vmatprep.subr.bf16.mxu1 %v2047_v43  ;;  %v354_v60 = vld [vmem:[%s3339_s1 + $0x1f8] sm:$0xff]  ;;  %v360_v61 = vld [vmem:[%s3339_s1 + $0x228] sm:$0xff]  ;;  %v2053_v63 = vpack.c.bf16 %v347_v57, %v341_v55  ;;  %v1991_v0 = vpack.c.bf16 %v358_v59, %v352_v58  ;;  %v351_v1 = vld [vmem:[%s3339_s1 + $0x1e0] sm:$0xff] }
  0x14   : > { %v357_v2 = vld [vmem:[%s3339_s1 + $0x210] sm:$0xff]  ;;  %v2055_v4 = vpack.c.bf16 %v360_v61, %v354_v60  ;;  %v359_v5 = vld [vmem:[%s3339_s1 + $0x220] sm:$0xff]  ;;  %v364_v6 = vld [vmem:[%s3339_s1 + $0x248] sm:$0xff] }
  0x15   : > { %1986 = vmatpush1.bf16.msra.mxu0 %v1985_v50  ;;  %v353_v3 = vld [vmem:[%s3339_s1 + $0x1f0] sm:$0xff]  ;;  %v370_v7 = vld [vmem:[%s3339_s1 + $0x278] sm:$0xff]  ;;  %v372_v9 = vld [vmem:[%s3339_s1 + $0x288] sm:$0xff]  ;;  %v1993_v10 = vpack.c.bf16 %v357_v2, %v351_v1 }
  0x16   : > { %2050 = vmatpush1.bf16.msra.mxu1 %v2049_v51  ;;  %1988 = vmatprep.subr.bf16.mxu0 %v1987_v52  ;;  %v366_v8 = vld [vmem:[%s3339_s1 + $0x258] sm:$0xff]  ;;  %v2057_v11 = vpack.c.bf16 %v359_v5, %v353_v3  ;;  %v1995_v12 = vpack.c.bf16 %v370_v7, %v364_v6  ;;  %v363_v13 = vld [vmem:[%s3339_s1 + $0x240] sm:$0xff]  ;;  %v369_v14 = vld [vmem:[%s3339_s1 + $0x270] sm:$0xff] }
  0x17   : > { %2052 = vmatprep.subr.bf16.mxu1 %v2051_v56  ;;  %v365_v15 = vld [vmem:[%s3339_s1 + $0x250] sm:$0xff]  ;;  %v2059_v16 = vpack.c.bf16 %v372_v9, %v366_v8  ;;  %v371_v17 = vld [vmem:[%s3339_s1 + $0x280] sm:$0xff]  ;;  %v376_v18 = vld [vmem:[%s3339_s1 + $0x2a8] sm:$0xff]  ;;  %v1997_v22 = vpack.c.bf16 %v369_v14, %v363_v13 }
  0x18   : > { %v382_v19 = vld [vmem:[%s3339_s1 + $0x2d8] sm:$0xff]  ;;  %v384_v21 = vld [vmem:[%s3339_s1 + $0x2e8] sm:$0xff]  ;;  %v2061_v23 = vpack.c.bf16 %v371_v17, %v365_v15  ;;  %v375_v25 = vld [vmem:[%s3339_s1 + $0x2a0] sm:$0xff] }
  0x19   : > { %1990 = vmatpush1.bf16.msra.mxu0 %v1989_v62  ;;  %v378_v20 = vld [vmem:[%s3339_s1 + $0x2b8] sm:$0xff]  ;;  %v1999_v24 = vpack.c.bf16 %v382_v19, %v376_v18  ;;  %v381_v26 = vld [vmem:[%s3339_s1 + $0x2d0] sm:$0xff]  ;;  %v383_v29 = vld [vmem:[%s3339_s1 + $0x2e0] sm:$0xff] }
  0x1a   : > { %2054 = vmatpush1.bf16.msra.mxu1 %v2053_v63  ;;  %1992 = vmatprep.subr.bf16.mxu0 %v1991_v0  ;;  %v377_v27 = vld [vmem:[%s3339_s1 + $0x2b0] sm:$0xff]  ;;  %v2063_v28 = vpack.c.bf16 %v384_v21, %v378_v20  ;;  %v388_v30 = vld [vmem:[%s3339_s1 + $0x308] sm:$0xff]  ;;  %v394_v31 = vld [vmem:[%s3339_s1 + $0x338] sm:$0xff]  ;;  %v2001_v34 = vpack.c.bf16 %v381_v26, %v375_v25 }
  0x1b   : > { %2056 = vmatprep.subr.bf16.mxu1 %v2055_v4  ;;  %v390_v32 = vld [vmem:[%s3339_s1 + $0x318] sm:$0xff]  ;;  %v396_v33 = vld [vmem:[%s3339_s1 + $0x348] sm:$0xff]  ;;  %v2065_v35 = vpack.c.bf16 %v383_v29, %v377_v27  ;;  %v2003_v36 = vpack.c.bf16 %v394_v31, %v388_v30  ;;  %v387_v37 = vld [vmem:[%s3339_s1 + $0x300] sm:$0xff] }
  0x1c   : > { %v393_v38 = vld [vmem:[%s3339_s1 + $0x330] sm:$0xff]  ;;  %v2067_v40 = vpack.c.bf16 %v396_v33, %v390_v32  ;;  %v395_v41 = vld [vmem:[%s3339_s1 + $0x340] sm:$0xff]  ;;  %v400_v42 = vld [vmem:[%s3339_s1 + $0x368] sm:$0xff] }
  0x1d   : > { %1994 = vmatpush1.bf16.msra.mxu0 %v1993_v10  ;;  %v389_v39 = vld [vmem:[%s3339_s1 + $0x310] sm:$0xff]  ;;  %v406_v43 = vld [vmem:[%s3339_s1 + $0x398] sm:$0xff]  ;;  %v408_v45 = vld [vmem:[%s3339_s1 + $0x3a8] sm:$0xff]  ;;  %v2005_v46 = vpack.c.bf16 %v393_v38, %v387_v37 }
  0x1e   : > { %2058 = vmatpush1.bf16.msra.mxu1 %v2057_v11  ;;  %1996 = vmatprep.subr.bf16.mxu0 %v1995_v12  ;;  %v402_v44 = vld [vmem:[%s3339_s1 + $0x378] sm:$0xff]  ;;  %v2069_v47 = vpack.c.bf16 %v395_v41, %v389_v39  ;;  %v2007_v48 = vpack.c.bf16 %v406_v43, %v400_v42  ;;  %v399_v49 = vld [vmem:[%s3339_s1 + $0x360] sm:$0xff]  ;;  %v405_v50 = vld [vmem:[%s3339_s1 + $0x390] sm:$0xff] }
  0x1f   : > { %2060 = vmatprep.subr.bf16.mxu1 %v2059_v16  ;;  %v401_v51 = vld [vmem:[%s3339_s1 + $0x370] sm:$0xff]  ;;  %v2071_v52 = vpack.c.bf16 %v408_v45, %v402_v44  ;;  %v407_v53 = vld [vmem:[%s3339_s1 + $0x3a0] sm:$0xff]  ;;  %v412_v54 = vld [vmem:[%s3339_s1 + $0x3c8] sm:$0xff]  ;;  %v2009_v58 = vpack.c.bf16 %v405_v50, %v399_v49 }
  0x20   : > { %v418_v55 = vld [vmem:[%s3339_s1 + $0x3f8] sm:$0xff]  ;;  %v420_v57 = vld [vmem:[%s3339_s1 + $0x408] sm:$0xff]  ;;  %v2073_v59 = vpack.c.bf16 %v407_v53, %v401_v51  ;;  %v411_v61 = vld [vmem:[%s3339_s1 + $0x3c0] sm:$0xff] }
  0x21   : > { %1998 = vmatpush1.bf16.msra.mxu0 %v1997_v22  ;;  %v414_v56 = vld [vmem:[%s3339_s1 + $0x3d8] sm:$0xff]  ;;  %v2011_v60 = vpack.c.bf16 %v418_v55, %v412_v54  ;;  %v417_v62 = vld [vmem:[%s3339_s1 + $0x3f0] sm:$0xff]  ;;  %v419_v1 = vld [vmem:[%s3339_s1 + $0x400] sm:$0xff] }
  0x22   : > { %2062 = vmatpush1.bf16.msra.mxu1 %v2061_v23  ;;  %2000 = vmatprep.subr.bf16.mxu0 %v1999_v24  ;;  %v413_v63 = vld [vmem:[%s3339_s1 + $0x3d0] sm:$0xff]  ;;  %v2075_v0 = vpack.c.bf16 %v420_v57, %v414_v56  ;;  %v424_v2 = vld [vmem:[%s3339_s1 + $0x428] sm:$0xff]  ;;  %v430_v3 = vld [vmem:[%s3339_s1 + $0x458] sm:$0xff]  ;;  %v2013_v6 = vpack.c.bf16 %v417_v62, %v411_v61 }
  0x23   : > { %2064 = vmatprep.subr.bf16.mxu1 %v2063_v28  ;;  %v426_v4 = vld [vmem:[%s3339_s1 + $0x438] sm:$0xff]  ;;  %v432_v5 = vld [vmem:[%s3339_s1 + $0x468] sm:$0xff]  ;;  %v423_v7 = vld [vmem:[%s3339_s1 + $0x420] sm:$0xff]  ;;  %v2077_v8 = vpack.c.bf16 %v419_v1, %v413_v63  ;;  %v2015_v9 = vpack.c.bf16 %v430_v3, %v424_v2 }
  0x24   : > { %v429_v10 = vld [vmem:[%s3339_s1 + $0x450] sm:$0xff]  ;;  %v431_v12 = vld [vmem:[%s3339_s1 + $0x460] sm:$0xff]  ;;  %v2079_v13 = vpack.c.bf16 %v432_v5, %v426_v4  ;;  %v436_v14 = vld [vmem:[%s3339_s1 + $0x488] sm:$0xff] }
  0x25   : > { %2002 = vmatpush1.bf16.msra.mxu0 %v2001_v34  ;;  %v425_v11 = vld [vmem:[%s3339_s1 + $0x430] sm:$0xff]  ;;  %v442_v15 = vld [vmem:[%s3339_s1 + $0x4b8] sm:$0xff]  ;;  %v2711_v16 = vld [vmem:[%s2690_s22 + $0x8] sm:$0xff]  ;;  %v2017_v19 = vpack.c.bf16 %v429_v10, %v423_v7 }
  0x26   : > { %2066 = vmatpush1.bf16.msra.mxu1 %v2065_v35  ;;  %2004 = vmatprep.subr.bf16.mxu0 %v2003_v36  ;;  %v438_v17 = vld [vmem:[%s3339_s1 + $0x498] sm:$0xff]  ;;  %v444_v18 = vld [vmem:[%s3339_s1 + $0x4c8] sm:$0xff]  ;;  %v2081_v20 = vpack.c.bf16 %v431_v12, %v425_v11  ;;  %v2019_v21 = vpack.c.bf16 %v442_v15, %v436_v14  ;;  %v435_v22 = vld [vmem:[%s3339_s1 + $0x480] sm:$0xff] }
  0x27   : > { %2068 = vmatprep.subr.bf16.mxu1 %v2067_v40  ;;  %579 = vmatprep.mubr.f32.mxu0 %v2711_v16  ;;  %v441_v23 = vld [vmem:[%s3339_s1 + $0x4b0] sm:$0xff]  ;;  %v2083_v25 = vpack.c.bf16 %v444_v18, %v438_v17  ;;  %v443_v26 = vld [vmem:[%s3339_s1 + $0x4c0] sm:$0xff]  ;;  %v448_v27 = vld [vmem:[%s3339_s1 + $0x4e8] sm:$0xff] }
  0x28   : > { %656 = vmatprep.mubr.f32.mxu1 %v2711_v16  ;;  %v437_v24 = vld [vmem:[%s3339_s1 + $0x490] sm:$0xff]  ;;  %v454_v28 = vld [vmem:[%s3339_s1 + $0x518] sm:$0xff]  ;;  %v456_v30 = vld [vmem:[%s3339_s1 + $0x528] sm:$0xff]  ;;  %v2021_v31 = vpack.c.bf16 %v441_v23, %v435_v22 }
  0x29   : > { %2006 = vmatpush1.bf16.msra.mxu0 %v2005_v46  ;;  %v450_v29 = vld [vmem:[%s3339_s1 + $0x4f8] sm:$0xff]  ;;  %v2085_v32 = vpack.c.bf16 %v443_v26, %v437_v24  ;;  %v2023_v33 = vpack.c.bf16 %v454_v28, %v448_v27  ;;  %v447_v34 = vld [vmem:[%s3339_s1 + $0x4e0] sm:$0xff]  ;;  %v453_v35 = vld [vmem:[%s3339_s1 + $0x510] sm:$0xff] }
  0x2a   : > { %2070 = vmatpush1.bf16.msra.mxu1 %v2069_v47  ;;  %2008 = vmatprep.subr.bf16.mxu0 %v2007_v48  ;;  %v449_v36 = vld [vmem:[%s3339_s1 + $0x4f0] sm:$0xff]  ;;  %v2087_v37 = vpack.c.bf16 %v456_v30, %v450_v29  ;;  %v455_v38 = vld [vmem:[%s3339_s1 + $0x520] sm:$0xff]  ;;  %v460_v39 = vld [vmem:[%s3339_s1 + $0x548] sm:$0xff]  ;;  %v2025_v43 = vpack.c.bf16 %v453_v35, %v447_v34 }
  0x2b   : > { %2072 = vmatprep.subr.bf16.mxu1 %v2071_v52  ;;  %v466_v40 = vld [vmem:[%s3339_s1 + $0x578] sm:$0xff]  ;;  %v468_v42 = vld [vmem:[%s3339_s1 + $0x588] sm:$0xff]  ;;  %v2089_v44 = vpack.c.bf16 %v455_v38, %v449_v36  ;;  %v459_v46 = vld [vmem:[%s3339_s1 + $0x540] sm:$0xff] }
  0x2c   : > { %v462_v41 = vld [vmem:[%s3339_s1 + $0x558] sm:$0xff]  ;;  %v2027_v45 = vpack.c.bf16 %v466_v40, %v460_v39  ;;  %v465_v47 = vld [vmem:[%s3339_s1 + $0x570] sm:$0xff]  ;;  %v467_v50 = vld [vmem:[%s3339_s1 + $0x580] sm:$0xff] }
  0x2d   : > { %2010 = vmatpush1.bf16.msra.mxu0 %v2009_v58  ;;  %v461_v48 = vld [vmem:[%s3339_s1 + $0x550] sm:$0xff]  ;;  %v2091_v49 = vpack.c.bf16 %v468_v42, %v462_v41  ;;  %v472_v51 = vld [vmem:[%s3339_s1 + $0x5a8] sm:$0xff]  ;;  %v478_v52 = vld [vmem:[%s3339_s1 + $0x5d8] sm:$0xff]  ;;  %v2029_v55 = vpack.c.bf16 %v465_v47, %v459_v46 }
  0x2e   : > { %2074 = vmatpush1.bf16.msra.mxu1 %v2073_v59  ;;  %2012 = vmatprep.subr.bf16.mxu0 %v2011_v60  ;;  %v474_v53 = vld [vmem:[%s3339_s1 + $0x5b8] sm:$0xff]  ;;  %v480_v54 = vld [vmem:[%s3339_s1 + $0x5e8] sm:$0xff]  ;;  %v2093_v56 = vpack.c.bf16 %v467_v50, %v461_v48  ;;  %v2031_v57 = vpack.c.bf16 %v478_v52, %v472_v51  ;;  %v471_v58 = vld [vmem:[%s3339_s1 + $0x5a0] sm:$0xff] }
  0x2f   : > { %2076 = vmatprep.subr.bf16.mxu1 %v2075_v0  ;;  %v477_v59 = vld [vmem:[%s3339_s1 + $0x5d0] sm:$0xff]  ;;  %v2095_v60 = vpack.c.bf16 %v480_v54, %v474_v53  ;;  %v479_v62 = vld [vmem:[%s3339_s1 + $0x5e0] sm:$0xff]  ;;  %v2809_v2 = vld [vmem:[%s2690_s22 + $0x18] sm:$0xff] }
  0x30   : > { %v473_v61 = vld [vmem:[%s3339_s1 + $0x5b0] sm:$0xff]  ;;  %v2033_v63 = vpack.c.bf16 %v477_v59, %v471_v58  ;;  %v2806_v1 = vld [vmem:[%s2690_s22] sm:$0xff]  ;;  %v296_v4 = vld [vmem:[%s3339_s1 + $0x28] sm:$0xff] }
  0x31   : > { %2014 = vmatpush1.bf16.msra.mxu0 %v2013_v6  ;;  %v2097_v0 = vpack.c.bf16 %v479_v62, %v473_v61  ;;  %v2815_v3 = vld [vmem:[%s2690_s22 + $0x10] sm:$0xff]  ;;  %v302_v5 = vld [vmem:[%s3339_s1 + $0x58] sm:$0xff]  ;;  %v295_v6 = vld [vmem:[%s3339_s1 + $0x20] sm:$0xff] }
  0x32   : > { %2078 = vmatpush1.bf16.msra.mxu1 %v2077_v8  ;;  %2016 = vmatprep.subr.bf16.mxu0 %v2015_v9  ;;  %v2099_v7 = vpack.c.bf16 %v302_v5, %v296_v4  ;;  %v301_v8 = vld [vmem:[%s3339_s1 + $0x50] sm:$0xff]  ;;  %v308_v9 = vld [vmem:[%s3339_s1 + $0x88] sm:$0xff]  ;;  %v314_v10 = vld [vmem:[%s3339_s1 + $0xb8] sm:$0xff] }
  0x33   : > { %2080 = vmatprep.subr.bf16.mxu1 %v2079_v13  ;;  %v2101_v11 = vpack.c.bf16 %v301_v8, %v295_v6  ;;  %v2103_v12 = vpack.c.bf16 %v314_v10, %v308_v9  ;;  %v307_v13 = vld [vmem:[%s3339_s1 + $0x80] sm:$0xff]  ;;  %v313_v14 = vld [vmem:[%s3339_s1 + $0xb0] sm:$0xff]  ;;  %v320_v15 = vld [vmem:[%s3339_s1 + $0xe8] sm:$0xff] }
  0x34   : > { %v2105_v17 = vpack.c.bf16 %v313_v14, %v307_v13  ;;  %v338_v22 = vld [vmem:[%s3339_s1 + $0x178] sm:$0xff]  ;;  %v337_v26 = vld [vmem:[%s3339_s1 + $0x170] sm:$0xff]  ;;  %v344_v27 = vld [vmem:[%s3339_s1 + $0x1a8] sm:$0xff] }
  0x35   : > { %2018 = vmatpush1.bf16.msra.mxu0 %v2017_v19  ;;  %v319_v19 = vld [vmem:[%s3339_s1 + $0xe0] sm:$0xff]  ;;  %v350_v28 = vld [vmem:[%s3339_s1 + $0x1d8] sm:$0xff]  ;;  %v361_v38 = vld [vmem:[%s3339_s1 + $0x230] sm:$0xff] }
  0x36   : > { %2082 = vmatpush1.bf16.msra.mxu1 %v2081_v20  ;;  %2020 = vmatprep.subr.bf16.mxu0 %v2019_v21  ;;  %v325_v20 = vld [vmem:[%s3339_s1 + $0x110] sm:$0xff]  ;;  %v332_v21 = vld [vmem:[%s3339_s1 + $0x148] sm:$0xff]  ;;  %v2115_v30 = vpack.c.bf16 %v350_v28, %v344_v27  ;;  %v362_v34 = vld [vmem:[%s3339_s1 + $0x238] sm:$0xff] }
  0x37   : > { %2084 = vmatprep.subr.bf16.mxu1 %v2083_v25  ;;  %v2109_v23 = vpack.c.bf16 %v325_v20, %v319_v19  ;;  %v2111_v24 = vpack.c.bf16 %v338_v22, %v332_v21  ;;  %v331_v25 = vld [vmem:[%s3339_s1 + $0x140] sm:$0xff]  ;;  %v368_v39 = vld [vmem:[%s3339_s1 + $0x268] sm:$0xff]  ;;  %v374_v40 = vld [vmem:[%s3339_s1 + $0x298] sm:$0xff] }
  0x38   : > { %v2113_v29 = vpack.c.bf16 %v337_v26, %v331_v25  ;;  %v2123_v42 = vpack.c.bf16 %v374_v40, %v368_v39  ;;  %v386_v46 = vld [vmem:[%s3339_s1 + $0x2f8] sm:$0xff]  ;;  %v385_v50 = vld [vmem:[%s3339_s1 + $0x2f0] sm:$0xff]  ;;  %v392_v51 = vld [vmem:[%s3339_s1 + $0x328] sm:$0xff]  ;;  %v485_v39 = vlaneseq }
  0x39   : > { %2022 = vmatpush1.bf16.msra.mxu0 %v2021_v31  ;;  %v343_v31 = vld [vmem:[%s3339_s1 + $0x1a0] sm:$0xff]  ;;  %v398_v52 = vld [vmem:[%s3339_s1 + $0x358] sm:$0xff]  ;;  %v409_v62 = vld [vmem:[%s3339_s1 + $0x3b0] sm:$0xff] }
  0x3a   : > { %2086 = vmatpush1.bf16.msra.mxu1 %v2085_v32  ;;  %2024 = vmatprep.subr.bf16.mxu0 %v2023_v33  ;;  %v349_v32 = vld [vmem:[%s3339_s1 + $0x1d0] sm:$0xff]  ;;  %v356_v33 = vld [vmem:[%s3339_s1 + $0x208] sm:$0xff]  ;;  %v2131_v54 = vpack.c.bf16 %v398_v52, %v392_v51  ;;  %v410_v58 = vld [vmem:[%s3339_s1 + $0x3b8] sm:$0xff]  ;;  %v3016_v40 = vshrl.u32 %v485_v39, 7 }
  0x3b   : > { %2088 = vmatprep.subr.bf16.mxu1 %v2087_v37  ;;  %v2117_v35 = vpack.c.bf16 %v349_v32, %v343_v31  ;;  %v2119_v36 = vpack.c.bf16 %v362_v34, %v356_v33  ;;  %v355_v37 = vld [vmem:[%s3339_s1 + $0x200] sm:$0xff]  ;;  %v428_v8 = vld [vmem:[%s3339_s1 + $0x448] sm:$0xff]  ;;  %v434_v9 = vld [vmem:[%s3339_s1 + $0x478] sm:$0xff] }
  0x3c   : > { %v2121_v41 = vpack.c.bf16 %v361_v38, %v355_v37  ;;  %v403_v61 = vld [vmem:[%s3339_s1 + $0x380] sm:$0xff]  ;;  %v433_v13 = vld [vmem:[%s3339_s1 + $0x470] sm:$0xff]  ;;  %v440_v14 = vld [vmem:[%s3339_s1 + $0x4a8] sm:$0xff]  ;;  %v3034_v51 = vsub.s32 1, %v3016_v40 }
  0x3d   : > { %2026 = vmatpush1.bf16.msra.mxu0 %v2025_v43  ;;  %v367_v43 = vld [vmem:[%s3339_s1 + $0x260] sm:$0xff]  ;;  %v2137_v4 = vpack.c.bf16 %v409_v62, %v403_v61  ;;  %v445_v19 = vld [vmem:[%s3339_s1 + $0x4d0] sm:$0xff]  ;;  %v452_v20 = vld [vmem:[%s3339_s1 + $0x508] sm:$0xff] }
  0x3e   : > { %2090 = vmatpush1.bf16.msra.mxu1 %v2089_v44  ;;  %2028 = vmatprep.subr.bf16.mxu0 %v2027_v45  ;;  %v373_v44 = vld [vmem:[%s3339_s1 + $0x290] sm:$0xff]  ;;  %v380_v45 = vld [vmem:[%s3339_s1 + $0x2c8] sm:$0xff]  ;;  %v415_v6 = vld [vmem:[%s3339_s1 + $0x3e0] sm:$0xff] }
  0x3f   : > { %2092 = vmatprep.subr.bf16.mxu1 %v2091_v49  ;;  %v2125_v47 = vpack.c.bf16 %v373_v44, %v367_v43  ;;  %v2127_v48 = vpack.c.bf16 %v386_v46, %v380_v45  ;;  %v379_v49 = vld [vmem:[%s3339_s1 + $0x2c0] sm:$0xff]  ;;  %v458_v21 = vld [vmem:[%s3339_s1 + $0x538] sm:$0xff]  ;;  %v457_v25 = vld [vmem:[%s3339_s1 + $0x530] sm:$0xff]  ;;  %v495_v43 = vsub.s32 2, %v3016_v40  ;;  %v499_v44 = vsub.s32 3, %v3016_v40 }
  0x40   : > { %v2129_v53 = vpack.c.bf16 %v385_v50, %v379_v49  ;;  %v464_v26 = vld [vmem:[%s3339_s1 + $0x568] sm:$0xff]  ;;  %v470_v27 = vld [vmem:[%s3339_s1 + $0x598] sm:$0xff]  ;;  %v469_v31 = vld [vmem:[%s3339_s1 + $0x590] sm:$0xff] }
  0x41   : > { %2030 = vmatpush1.bf16.msra.mxu0 %v2029_v55  ;;  %v391_v55 = vld [vmem:[%s3339_s1 + $0x320] sm:$0xff]  ;;  %v476_v32 = vld [vmem:[%s3339_s1 + $0x5c8] sm:$0xff]  ;;  %v482_v33 = vld [vmem:[%s3339_s1 + $0x5f8] sm:$0xff] }
  0x42   : > { %2094 = vmatpush1.bf16.msra.mxu1 %v2093_v56  ;;  %2032 = vmatprep.subr.bf16.mxu0 %v2031_v57  ;;  %v397_v56 = vld [vmem:[%s3339_s1 + $0x350] sm:$0xff]  ;;  %v404_v57 = vld [vmem:[%s3339_s1 + $0x388] sm:$0xff]  ;;  %vm3039_vm1 = vmpackc.low %vm746_vm0, %vm746_vm0 }
  0x43   : > { %2096 = vmatprep.subr.bf16.mxu1 %v2095_v60  ;;  %v2133_v59 = vpack.c.bf16 %v397_v56, %v391_v55  ;;  %v2135_v60 = vpack.c.bf16 %v410_v58, %v404_v57  ;;  %v481_v37 = vld [vmem:[%s3339_s1 + $0x5f0] sm:$0xff] }
  0x45   : > { %2034 = vmatpush1.bf16.msra.mxu0 %v2033_v63  ;;  %v416_v63 = vld [vmem:[%s3339_s1 + $0x3e8] sm:$0xff] }
  0x46   : > { %2098 = vmatpush1.bf16.msra.mxu1 %v2097_v0  ;;  %2100 = vmatprep.subr.bf16.mxu0 %v2099_v7  ;;  %v422_v0 = vld [vmem:[%s3339_s1 + $0x418] sm:$0xff]  ;;  %v421_v7 = vld [vmem:[%s3339_s1 + $0x410] sm:$0xff] }
  0x47   : > { %v2139_v5 = vpack.c.bf16 %v422_v0, %v416_v63  ;;  %v2141_v10 = vpack.c.bf16 %v421_v7, %v415_v6 }
  0x48   : > { %580 = vmatmul.mubr.f32.vlgmr.msra.gmra.mrb[0].mxu0 %v2806_v1 }
  0x49   : > { %657 = vmatmul.mubr.f32.vlgmr.msra.gmra.mrb[0].mxu1 %v2806_v1  ;;  %585 = vmatprep.mubr.f32.mxu0 %v2809_v2 }
  0x4a   : > { %662 = vmatprep.mubr.f32.mxu1 %v2809_v2  ;;  %2102 = vmatpush1.bf16.msra.mxu0 %v2101_v11  ;;  %v2143_v11 = vpack.c.bf16 %v434_v9, %v428_v8 }
  0x4b   : > { %2104 = vmatprep.subr.bf16.mxu0 %v2103_v12  ;;  %v427_v12 = vld [vmem:[%s3339_s1 + $0x440] sm:$0xff] }
  0x4c   : > { %586 = vmatmul.mubr.f32.gmra.mrb[2].mxu0 %v2815_v3 }
  0x4d   : > { %663 = vmatmul.mubr.f32.gmra.mrb[2].mxu1 %v2815_v3  ;;  %733 = vmatprep.mubr.f32.mxu0 %v2711_v16  ;;  %v326_v16 = vld [vmem:[%s3339_s1 + $0x118] sm:$0xff] }
  0x4e   : > { %v2107_v18 = vpack.c.bf16 %v326_v16, %v320_v15  ;;  %2106 = vmatpush1.bf16.msra.mxu0 %v2105_v17  ;;  %v446_v15 = vld [vmem:[%s3339_s1 + $0x4d8] sm:$0xff]  ;;  %v2145_v16 = vpack.c.bf16 %v433_v13, %v427_v12 }
  0x4f   : > { %v2147_v17 = vpack.c.bf16 %v446_v15, %v440_v14 }
  0x50   : > { %2108 = vmatprep.subr.bf16.mxu0 %v2107_v18  ;;  %v439_v18 = vld [vmem:[%s3339_s1 + $0x4a0] sm:$0xff] }
  0x51   : > { %v2149_v22 = vpack.c.bf16 %v445_v19, %v439_v18  ;;  %v503_v19 = vsub.s32 4, %v3016_v40 }
  0x52   : > { %2110 = vmatpush1.bf16.msra.mxu0 %v2109_v23  ;;  %v2151_v23 = vpack.c.bf16 %v458_v21, %v452_v20  ;;  %v507_v20 = vsub.s32 5, %v3016_v40 }
  0x53   : > { %2112 = vmatprep.subr.bf16.mxu0 %v2111_v24  ;;  %v451_v24 = vld [vmem:[%s3339_s1 + $0x500] sm:$0xff] }
  0x54   : > { %v2153_v28 = vpack.c.bf16 %v457_v25, %v451_v24 }
  0x56   : > { %2114 = vmatpush1.bf16.msra.mxu0 %v2113_v29  ;;  %v2155_v29 = vpack.c.bf16 %v470_v27, %v464_v26 }
  0x57   : > { %2116 = vmatprep.subr.bf16.mxu0 %v2115_v30  ;;  %v463_v30 = vld [vmem:[%s3339_s1 + $0x560] sm:$0xff] }
  0x58   : > { %v2157_v34 = vpack.c.bf16 %v469_v31, %v463_v30 }
  0x5a   : > { %2118 = vmatpush1.bf16.msra.mxu0 %v2117_v35  ;;  %v2159_v35 = vpack.c.bf16 %v482_v33, %v476_v32 }
  0x5b   : > { %2120 = vmatprep.subr.bf16.mxu0 %v2119_v36  ;;  %v475_v36 = vld [vmem:[%s3339_s1 + $0x5c0] sm:$0xff] }
  0x5c   : > { %v2161_v38 = vpack.c.bf16 %v481_v37, %v475_v36 }
  0x5e   : > { %2122 = vmatpush1.bf16.msra.mxu0 %v2121_v41  ;;  %v3019_v41 = vsub.s32 0, %v3016_v40 }
  0x5f   : > { %2124 = vmatprep.subr.bf16.mxu0 %v2123_v42  ;;  %v3024_v42 = vld [vmem:[%s3340_s2] sm:$0x3f] }
  0x60   : > { %v500_v49 = vrot.slane %v3024_v42, %v499_v44  ;;  %v492_v63 = vrot.slane %v3024_v42, %v3034_v51  ;;  %v504_v21 = vrot.slane %v3024_v42, %v503_v19 }
  0x62   : > { %2126 = vmatpush1.bf16.msra.mxu0 %v2125_v47  ;;  %v496_v47 = vrot.slane %v3024_v42, %v495_v43 }
  0x63   : > { %2128 = vmatprep.subr.bf16.mxu0 %v2127_v48 }
  0x66   : > { %2130 = vmatpush1.bf16.msra.mxu0 %v2129_v53 }
  0x67   : > { %2132 = vmatprep.subr.bf16.mxu0 %v2131_v54 }
  0x6a   : > { %2134 = vmatpush1.bf16.msra.mxu0 %v2133_v59 }
  0x6b   : > { %2136 = vmatprep.subr.bf16.mxu0 %v2135_v60 }
  0x6e   : > { %2138 = vmatpush1.bf16.msra.mxu0 %v2137_v4 }
  0x6f   : > { %2140 = vmatprep.subr.bf16.mxu0 %v2139_v5 }
  0x72   : > { %2142 = vmatpush1.bf16.msra.mxu0 %v2141_v10 }
  0x73   : > { %2144 = vmatprep.subr.bf16.mxu0 %v2143_v11 }
  0x76   : > { %2146 = vmatpush1.bf16.msra.mxu0 %v2145_v16 }
  0x77   : > { %2148 = vmatprep.subr.bf16.mxu0 %v2147_v17 }
  0x7a   : > { %2150 = vmatpush1.bf16.msra.mxu0 %v2149_v22 }
  0x7b   : > { %2152 = vmatprep.subr.bf16.mxu0 %v2151_v23  ;;  %v508_v23 = vrot.slane %v3024_v42, %v507_v20 }
  0x7e   : > { %2154 = vmatpush1.bf16.msra.mxu0 %v2153_v28 }
  0x7f   : > { %2156 = vmatprep.subr.bf16.mxu0 %v2155_v29 }
  0x82   : > { %2158 = vmatpush1.bf16.msra.mxu0 %v2157_v34 }
  0x83   : > { %2160 = vmatprep.subr.bf16.mxu0 %v2159_v35 }
  0x86   : > { %2162 = vmatpush1.bf16.msra.mxu0 %v2161_v38 }
  0x89   : > { %734 = vmatmul.mubr.f32.vlgmr.msra.gmra.mrb[4].mxu0 %v2806_v1  ;;  %v488_v1 = vrot.slane %v3024_v42, %v3019_v41 }
  0x8a   : > { %739 = vmatprep.mubr.f32.mxu0 %v2809_v2 }
  0x8d   : > { %740 = vmatmul.mubr.f32.gmra.mrb[6].mxu0 %v2815_v3 }
 0x11b   : > { %v581_v2 = vpop.f32.mrb[0].mxu0 }
 0x11c   : > { %v658_v3 = vpop.f32.mrb[0].mxu1  ;;  %v582_v45 = vadd.f32 %v581_v2, %v488_v1  ;;  %v583_v46 = vpop.f32.mrb[1].mxu0 }
 0x11d   : > { %v660_v48 = vpop.f32.mrb[1].mxu1  ;;  %v659_v55 = vadd.f32 %v658_v3, %v496_v47  ;;  %v584_v6 = vadd.f32 %v583_v46, %v492_v63 }
 0x11e   : > { %1919 = vmatprep.mubr.msk.f32.mxu1 %vm746_vm0, %v582_v45  ;;  %v661_v58 = vadd.f32 %v660_v48, %v500_v49 }
 0x11f   : > { %v587_v50 = vpop.f32.mrb[2].mxu0 }
 0x120   : > { %v588_v52 = vadd.f32 %v587_v50, %v488_v1  ;;  %v664_v53 = vpop.f32.mrb[2].mxu1  ;;  %v589_v54 = vpop.f32.mrb[3].mxu0 }
 0x121   : > { %v665_v56 = vadd.f32 %v664_v53, %v496_v47  ;;  %v666_v57 = vpop.f32.mrb[3].mxu1  ;;  %v590_v5 = vadd.f32 %v589_v54, %v492_v63 }
 0x122   : > { %v667_v59 = vadd.f32 %v666_v57, %v500_v49  ;;  %942 = vrot.lane.b32.xlu1 %v588_v52, %s2354_s15 }
 0x123   : > { %v2163_v61 = vpack.c.bf16 %v665_v56, %v659_v55  ;;  %v2276_v62 = vpack.i.bf16 %v665_v56, %v659_v55 }
 0x124   : > { %v2281_v0 = vpack.i.bf16 %v667_v59, %v661_v58  ;;  %v2183_v4 = vpack.c.bf16 %v667_v59, %v661_v58 }
 0x125   : > { %2277 = vrot.lane.b32.xlu0 %v2276_v62, %s2354_s15  ;;  %2165 = vmatprep.subr.msk.bf16.mxu1 %vm3039_vm1, %v2163_v61 }
 0x126   : > { %2168 = vmatpush3.bf16.xpose.msk.msra.mxu1 %vm3039_vm1, %v2163_v61  ;;  %2282 = vrot.lane.b32.xlu1 %v2281_v0, %s2354_s15 }
 0x129   : > { %940 = vrot.lane.b32.xlu0 %v582_v45, %s2354_s15 }
 0x12a   : > { %1338 = vrot.lane.b32.xlu1 %v590_v5, %s2354_s15 }
 0x12d   : > { %1336 = vrot.lane.b32.xlu0 %v584_v6, %s2354_s15  ;;  %1920 = vmatmul.mubr.msk.f32.vlgmr.msra.gmra.mrb[4].mxu1 %vm746_vm0, %v588_v52 }
 0x15c   : > { %v735_v22 = vpop.f32.mrb[4].mxu0 }
 0x15d   : > { %v737_v24 = vpop.f32.mrb[5].mxu0  ;;  %v736_v25 = vadd.f32 %v735_v22, %v504_v21 }
 0x15e   : > { %v738_v26 = vadd.f32 %v737_v24, %v508_v23 }
 0x160   : > { %v741_v27 = vpop.f32.mrb[6].mxu0 }
 0x161   : > { %v742_v28 = vadd.f32 %v741_v27, %v504_v21  ;;  %v743_v29 = vpop.f32.mrb[7].mxu0 }
 0x162   : > { %v744_v30 = vadd.f32 %v743_v29, %v508_v23 }
 0x163   : > { %v2286_v31 = vpack.i.bf16 %v742_v28, %v736_v25  ;;  %v2169_v32 = vpack.c.bf16 %v742_v28, %v736_v25 }
 0x164   : > { %v2291_v33 = vpack.i.bf16 %v744_v30, %v738_v26  ;;  %v3077_v34 = vpack.c.bf16 %v744_v30, %v738_v26 }
 0x165   : > { %2170 = vmatprep.subr.bf16.mxu1 %v2169_v32 }
 0x166   : > { %2172 = vmatpush3.bf16.msra.mxu1 %v2169_v32 }
 0x194   : > { %v943_v7 = vpop.permute.xlu1 %942 }
 0x197   : > { %v2278_v8 = vpop.permute.xlu0 %2277 }
 0x198   : > { %v2280_v9 = vunpack.i.h.bf16 %v2278_v8  ;;  %v2279_v10 = vunpack.i.l.bf16 %v2278_v8  ;;  %v2283_v13 = vpop.permute.xlu1 %2282 }
 0x199   : > { %v2285_v14 = vunpack.i.h.bf16 %v2283_v13  ;;  %v2284_v15 = vunpack.i.l.bf16 %v2283_v13 }
 0x19a   : > { %v2173_v11 = vpack.c.bf16 %v2280_v9, %v2279_v10 }
 0x19b   : > { %v941_v12 = vpop.permute.xlu0 %940  ;;  %v2193_v16 = vpack.c.bf16 %v2285_v14, %v2284_v15 }
 0x19c   : > { %2175 = vmatprep.subr.msk.bf16.mxu0 %vm3039_vm1, %v2173_v11  ;;  %1933 = vmatprep.mubr.msk.f32.mxu0 %vm746_vm0, %v941_v12  ;;  %v1339_v18 = vpop.permute.xlu1 %1338 }
 0x19d   : > { %2178 = vmatpush3.bf16.xpose.msk.msra.mxu0 %vm3039_vm1, %v2173_v11 }
 0x19e   : > { %2185 = vmatprep.subr.msk.bf16.mxu0 %vm3039_vm1, %v2183_v4 }
 0x19f   : > { %v1337_v17 = vpop.permute.xlu0 %1336 }
 0x1a4   : > { %1934 = vmatmul.mubr.msk.f32.vlgmr.msra.gmra.mrb[8].mxu0 %vm746_vm0, %v943_v7 }
 0x1a5   : > { %2188 = vmatpush3.bf16.xpose.msk.msra.mxu0 %vm3039_vm1, %v2183_v4  ;;  %1947 = vmatprep.mubr.msk.f32.mxu0 %vm746_vm0, %v584_v6 }
 0x1a6   : > { %2195 = vmatprep.subr.msk.bf16.mxu0 %vm3039_vm1, %v2193_v16 }
 0x1ac   : > { %1948 = vmatmul.mubr.msk.f32.vlgmr.msra.gmra.mrb[10].mxu0 %vm746_vm0, %v590_v5 }
 0x1ad   : > { %2198 = vmatpush3.bf16.xpose.msk.msra.mxu0 %vm3039_vm1, %v2193_v16  ;;  %1961 = vmatprep.mubr.msk.f32.mxu0 %vm746_vm0, %v1337_v17 }
 0x1b4   : > { %1962 = vmatmul.mubr.msk.f32.vlgmr.msra.gmra.mrb[12].mxu0 %vm746_vm0, %v1339_v18 }
 0x200   : > { %v1921_v35 = vpop.f32.mrb[4].mxu1 }
 0x201   : > { %v835_v36 = vmul.f32 0.125, %v1921_v35  ;;  %v825_v37 = vpop.f32.mrb[5].mxu1 }
 0x202   : > { %v834_v38 = vmul.f32 0.125, %v825_v37 }
 0x203   : > { %v840_v39 = vsel %vm836_vm2, %v835_v36, -inf }
 0x204   : > { %841 = vmax.xlane.f32.xlu1 %v840_v39  ;;  %v837_v40 = vsel %vm836_vm2, %v834_v38, -inf }
 0x205   : > { %838 = vmax.xlane.f32.xlu0 %v837_v40 }
 0x277   : > { %v1935_v42 = vpop.f32.mrb[8].mxu0 }
 0x278   : > { %v1032_v43 = vmul.f32 0.125, %v1935_v42  ;;  %v1022_v44 = vpop.f32.mrb[9].mxu0 }
 0x279   : > { %v1031_v1 = vmul.f32 0.125, %v1022_v44 }
 0x27a   : > { %v1036_v2 = vsel %vm836_vm2, %v1032_v43, -inf }
 0x27b   : > { %1037 = vmax.xlane.f32.xlu0 %v1036_v2  ;;  %v1033_v3 = vsel %vm836_vm2, %v1031_v1, -inf }
 0x27f   : > { %v1949_v45 = vpop.f32.mrb[10].mxu0  ;;  %1034 = vmax.xlane.f32.xlu0 %v1033_v3 }
 0x280   : > { %v1232_v46 = vmul.f32 0.125, %v1949_v45  ;;  %v1222_v47 = vpop.f32.mrb[11].mxu0  ;;  %v1561_v45 = vld [vmem:[%s3341_s3 + $0x8] sm:$0xff] }
 0x281   : > { %v1231_v48 = vmul.f32 0.125, %v1222_v47  ;;  %v1560_v47 = vld [vmem:[%s3341_s3] sm:$0xff] }
 0x282   : > { %v1236_v49 = vsel %vm836_vm2, %v1232_v46, -inf }
 0x283   : > { %1237 = vmax.xlane.f32.xlu0 %v1236_v49  ;;  %v1233_v50 = vsel %vm836_vm2, %v1231_v48, -inf  ;;  %v1562_v49 = vld [vmem:[%s3341_s3 + $0x10] sm:$0xff] }
 0x284   : > { %1234 = vmax.xlane.f32.xlu1 %v1233_v50  ;;  %v1565_v50 = vld [vmem:[%s3341_s3 + $0x28] sm:$0xff] }
 0x287   : > { %v1963_v52 = vpop.f32.mrb[12].mxu0 }
 0x288   : > { %v1428_v53 = vmul.f32 0.125, %v1963_v52  ;;  %v1418_v54 = vpop.f32.mrb[13].mxu0  ;;  %v1567_v52 = vld [vmem:[%s3341_s3 + $0x38] sm:$0xff] }
 0x289   : > { %v1427_v55 = vmul.f32 0.125, %v1418_v54  ;;  %v2207_v54 = vpack.c.bf16 %v1567_v52, %v1565_v50  ;;  %v1605_v50 = vld [vmem:[%s3341_s3 + $0x168] sm:$0xff]  ;;  %v1607_v52 = vld [vmem:[%s3341_s3 + $0x178] sm:$0xff] }
 0x28a   : > { %v1432_v56 = vsel %vm836_vm2, %v1428_v53, -inf }
 0x28b   : > { %1433 = vmax.xlane.f32.xlu0 %v1432_v56  ;;  %v1429_v57 = vsel %vm836_vm2, %v1427_v55, -inf  ;;  %v1566_v56 = vld [vmem:[%s3341_s3 + $0x30] sm:$0xff] }
 0x28c   : > { %1430 = vmax.xlane.f32.xlu1 %v1429_v57  ;;  %v1569_v57 = vld [vmem:[%s3341_s3 + $0x48] sm:$0xff] }
 0x291   : > { %v842_v58 = vpop.xlane.xlu1 %841 }
 0x292   : > { %v844_v59 = vsub.f32 %v835_v36, %v842_v58  ;;  %v839_v60 = vpop.xlane.xlu0 %838  ;;  %v1571_v58 = vld [vmem:[%s3341_s3 + $0x58] sm:$0xff] }
 0x293   : > { %v843_v61 = vsub.f32 %v834_v38, %v839_v60  ;;  %v2211_v60 = vpack.c.bf16 %v1571_v58, %v1569_v57  ;;  %v1609_v57 = vld [vmem:[%s3341_s3 + $0x188] sm:$0xff]  ;;  %v1611_v58 = vld [vmem:[%s3341_s3 + $0x198] sm:$0xff] }
 0x294   : > { %v847_v62 = vmul.f32 1.442695, %v844_v59 }
 0x295   : > { %v845_v63 = vmul.f32 1.442695, %v843_v61  ;;  %v1568_v61 = vld [vmem:[%s3341_s3 + $0x40] sm:$0xff] }
 0x297   : > { %2306 = vpow2.f32 %v845_v63  ;;  %v1573_v63 = vld [vmem:[%s3341_s3 + $0x68] sm:$0xff] }
 0x298   : > { %2308 = vpow2.f32 %v847_v62  ;;  %v1570_v62 = vld [vmem:[%s3341_s3 + $0x50] sm:$0xff] }
 0x29d   : > { %2287 = vrot.lane.b32.xlu1 %v2286_v31, %s2354_s15 }
 0x2a1   : > { %v2307_v0 = vpop.eup %2306  ;;  %2292 = vrot.lane.b32.xlu0 %v2291_v33, %s2354_s15 }
 0x2a2   : > { %v2309_v4 = vpop.eup %2308  ;;  %1926 = vmatprep.mubr.msk.f32.mxu1 %vm836_vm2, %v2307_v0  ;;  %v849_v35 = vsel %vm836_vm2, %v2307_v0, 0.0  ;;  %v1575_v0 = vld [vmem:[%s3341_s3 + $0x78] sm:$0xff] }
 0x2a3   : > { %1927 = vmatmul.mubr.msk.f32.vlgmr.msra.gmra.mrb[6].mxu1 %vm836_vm2, %v2309_v4  ;;  %v852_v39 = vsel %vm836_vm2, %v2309_v4, 0.0  ;;  %v2213_v4 = vpack.c.bf16 %v1570_v62, %v1568_v61  ;;  %v1608_v61 = vld [vmem:[%s3341_s3 + $0x180] sm:$0xff]  ;;  %v1610_v62 = vld [vmem:[%s3341_s3 + $0x190] sm:$0xff] }
 0x308   : > { %v1038_v5 = vpop.xlane.xlu0 %1037 }
 0x309   : > { %v1040_v6 = vsub.f32 %v1032_v43, %v1038_v5  ;;  %v2215_v5 = vpack.c.bf16 %v1575_v0, %v1573_v63  ;;  %v1613_v63 = vld [vmem:[%s3341_s3 + $0x1a8] sm:$0xff]  ;;  %v1615_v0 = vld [vmem:[%s3341_s3 + $0x1b8] sm:$0xff] }
 0x30b   : > { %v1043_v9 = vmul.f32 1.442695, %v1040_v6  ;;  %v1572_v6 = vld [vmem:[%s3341_s3 + $0x60] sm:$0xff] }
 0x30c   : > { %v1035_v7 = vpop.xlane.xlu0 %1034 }
 0x30d   : > { %v1039_v8 = vsub.f32 %v1031_v1, %v1035_v7  ;;  %v1574_v7 = vld [vmem:[%s3341_s3 + $0x70] sm:$0xff] }
 0x30f   : > { %v1041_v10 = vmul.f32 1.442695, %v1039_v8  ;;  %v1577_v8 = vld [vmem:[%s3341_s3 + $0x88] sm:$0xff] }
 0x310   : > { %v1238_v12 = vpop.xlane.xlu0 %1237 }
 0x311   : > { %2310 = vpow2.f32 %v1041_v10  ;;  %v1235_v11 = vpop.xlane.xlu1 %1234  ;;  %v1240_v14 = vsub.f32 %v1232_v46, %v1238_v12  ;;  %v1563_v46 = vld [vmem:[%s3341_s3 + $0x18] sm:$0xff]  ;;  %v2217_v10 = vpack.c.bf16 %v1574_v7, %v1572_v6  ;;  %v1576_v12 = vld [vmem:[%s3341_s3 + $0x80] sm:$0xff]  ;;  %v1614_v7 = vld [vmem:[%s3341_s3 + $0x1b0] sm:$0xff] }
 0x312   : > { %2312 = vpow2.f32 %v1043_v9  ;;  %v1239_v13 = vsub.f32 %v1231_v48, %v1235_v11  ;;  %v2203_v48 = vpack.c.bf16 %v1563_v46, %v1561_v45  ;;  %v1579_v9 = vld [vmem:[%s3341_s3 + $0x98] sm:$0xff]  ;;  %v1612_v6 = vld [vmem:[%s3341_s3 + $0x1a0] sm:$0xff] }
 0x313   : > { %v1243_v21 = vmul.f32 1.442695, %v1240_v14  ;;  %v2219_v11 = vpack.c.bf16 %v1579_v9, %v1577_v8  ;;  %v1581_v14 = vld [vmem:[%s3341_s3 + $0xa8] sm:$0xff]  ;;  %v1603_v45 = vld [vmem:[%s3341_s3 + $0x158] sm:$0xff] }
 0x314   : > { %v1241_v15 = vmul.f32 1.442695, %v1239_v13  ;;  %v1578_v13 = vld [vmem:[%s3341_s3 + $0x90] sm:$0xff]  ;;  %v1617_v8 = vld [vmem:[%s3341_s3 + $0x1c8] sm:$0xff]  ;;  %v1619_v9 = vld [vmem:[%s3341_s3 + $0x1d8] sm:$0xff] }
 0x316   : > { %2314 = vpow2.f32 %v1241_v15  ;;  %v1583_v15 = vld [vmem:[%s3341_s3 + $0xb8] sm:$0xff] }
 0x318   : > { %v1434_v16 = vpop.xlane.xlu0 %1433 }
 0x319   : > { %v1436_v17 = vsub.f32 %v1428_v53, %v1434_v16  ;;  %v1431_v18 = vpop.xlane.xlu1 %1430  ;;  %v2205_v53 = vpack.c.bf16 %v1562_v49, %v1560_v47  ;;  %v2221_v16 = vpack.c.bf16 %v1578_v13, %v1576_v12  ;;  %v1602_v49 = vld [vmem:[%s3341_s3 + $0x150] sm:$0xff]  ;;  %v1616_v12 = vld [vmem:[%s3341_s3 + $0x1c0] sm:$0xff] }
 0x31a   : > { %v1435_v19 = vsub.f32 %v1427_v55, %v1431_v18  ;;  %v1564_v55 = vld [vmem:[%s3341_s3 + $0x20] sm:$0xff]  ;;  %v1618_v13 = vld [vmem:[%s3341_s3 + $0x1d0] sm:$0xff] }
 0x31b   : > { %v2311_v20 = vpop.eup %2310  ;;  %v1439_v22 = vmul.f32 1.442695, %v1436_v17  ;;  %v2209_v59 = vpack.c.bf16 %v1566_v56, %v1564_v55  ;;  %v2223_v17 = vpack.c.bf16 %v1583_v15, %v1581_v14  ;;  %v1580_v18 = vld [vmem:[%s3341_s3 + $0xa0] sm:$0xff]  ;;  %v1606_v56 = vld [vmem:[%s3341_s3 + $0x170] sm:$0xff]  ;;  %v2261_v14 = vpack.c.bf16 %v1618_v13, %v1616_v12 }
 0x31c   : > { %v1437_v23 = vmul.f32 1.442695, %v1435_v19  ;;  %1940 = vmatprep.mubr.msk.f32.mxu1 %vm836_vm2, %v2311_v20  ;;  %v1045_v24 = vsel %vm836_vm2, %v2311_v20, 0.0  ;;  %v2313_v25 = vpop.eup %2312  ;;  %v2293_v29 = vpop.permute.xlu0 %2292  ;;  %v1582_v19 = vld [vmem:[%s3341_s3 + $0xb0] sm:$0xff]  ;;  %v1585_v20 = vld [vmem:[%s3341_s3 + $0xc8] sm:$0xff]  ;;  %v1604_v55 = vld [vmem:[%s3341_s3 + $0x160] sm:$0xff] }
 0x31d   : > { %v2288_v26 = vpop.permute.xlu1 %2287  ;;  %1046 = vadd.xlane.f32.xlu0 %v1045_v24  ;;  %v1048_v31 = vsel %vm836_vm2, %v2313_v25, 0.0  ;;  %v2295_v32 = vunpack.i.h.bf16 %v2293_v29  ;;  %v2294_v33 = vunpack.i.l.bf16 %v2293_v29  ;;  %v1584_v24 = vld [vmem:[%s3341_s3 + $0xc0] sm:$0xff] }
 0x31e   : > { %2316 = vpow2.f32 %v1437_v23  ;;  %v2290_v27 = vunpack.i.h.bf16 %v2288_v26  ;;  %v2289_v28 = vunpack.i.l.bf16 %v2288_v26  ;;  %v1589_v26 = vld [vmem:[%s3341_s3 + $0xe8] sm:$0xff] }
 0x31f   : > { %2318 = vpow2.f32 %v1243_v21  ;;  %v2199_v37 = vpack.c.bf16 %v2295_v32, %v2294_v33  ;;  %v1587_v21 = vld [vmem:[%s3341_s3 + $0xd8] sm:$0xff]  ;;  %v1593_v32 = vld [vmem:[%s3341_s3 + $0x108] sm:$0xff] }
 0x320   : > { %2320 = vpow2.f32 %v1439_v22  ;;  %v2179_v30 = vpack.c.bf16 %v2290_v27, %v2289_v28  ;;  %v2315_v36 = vpop.eup %2314  ;;  %v2225_v22 = vpack.c.bf16 %v1582_v19, %v1580_v18  ;;  %v2227_v23 = vpack.c.bf16 %v1587_v21, %v1585_v20  ;;  %v1591_v27 = vld [vmem:[%s3341_s3 + $0xf8] sm:$0xff]  ;;  %v1621_v19 = vld [vmem:[%s3341_s3 + $0x1e8] sm:$0xff] }
 0x321   : > { %1049 = vadd.xlane.f32.xlu0 %v1048_v31  ;;  %v2231_v29 = vpack.c.bf16 %v1591_v27, %v1589_v26  ;;  %v1590_v31 = vld [vmem:[%s3341_s3 + $0xf0] sm:$0xff]  ;;  %v1595_v33 = vld [vmem:[%s3341_s3 + $0x118] sm:$0xff] }
 0x322   : > { %2180 = vmatprep.subr.bf16.mxu1 %v2179_v30  ;;  %v1623_v20 = vld [vmem:[%s3341_s3 + $0x1f8] sm:$0xff] }
 0x323   : > { %2182 = vmatpush3.bf16.msra.mxu1 %v2179_v30  ;;  %v1588_v30 = vld [vmem:[%s3341_s3 + $0xe0] sm:$0xff]  ;;  %v2263_v21 = vpack.c.bf16 %v1623_v20, %v1621_v19  ;;  %v2345_v19 = vld [vmem:[%s2690_s22 + $0x18] sm:$0xff] }
 0x324   : > { %2190 = vmatprep.subr.bf16.mxu1 %v3077_v34 }
 0x325   : > { %850 = vadd.xlane.f32.xlu0 %v849_v35  ;;  %v2233_v35 = vpack.c.bf16 %v1590_v31, %v1588_v30 }
 0x326   : > { %1941 = vmatmul.mubr.msk.f32.vlgmr.msra.gmra.mrb[8].mxu1 %vm836_vm2, %v2313_v25  ;;  %v1586_v25 = vld [vmem:[%s3341_s3 + $0xd0] sm:$0xff] }
 0x327   : > { %2192 = vmatpush3.bf16.msra.mxu1 %v3077_v34  ;;  %1954 = vmatprep.mubr.msk.f32.mxu1 %vm836_vm2, %v2315_v36  ;;  %v1245_v34 = vsel %vm836_vm2, %v2315_v36, 0.0  ;;  %v2229_v28 = vpack.c.bf16 %v1586_v25, %v1584_v24  ;;  %v2235_v36 = vpack.c.bf16 %v1595_v33, %v1593_v32 }
 0x328   : > { %v2317_v38 = vpop.eup %2316  ;;  %2200 = vmatprep.subr.bf16.mxu1 %v2199_v37 }
 0x329   : > { %v2319_v40 = vpop.eup %2318  ;;  %853 = vadd.xlane.f32.xlu0 %v852_v39  ;;  %v1441_v42 = vsel %vm836_vm2, %v2317_v38, 0.0  ;;  %v1597_v39 = vld [vmem:[%s3341_s3 + $0x128] sm:$0xff] }
 0x32a   : > { %v2321_v43 = vpop.eup %2320  ;;  %1442 = vadd.xlane.f32.xlu1 %v1441_v42  ;;  %1955 = vmatmul.mubr.msk.f32.vlgmr.msra.gmra.mrb[10].mxu1 %vm836_vm2, %v2319_v40  ;;  %v1248_v1 = vsel %vm836_vm2, %v2319_v40, 0.0  ;;  %v1599_v40 = vld [vmem:[%s3341_s3 + $0x138] sm:$0xff] }
 0x32b   : > { %2202 = vmatpush3.bf16.msra.mxu1 %v2199_v37  ;;  %1968 = vmatprep.mubr.msk.f32.mxu1 %vm836_vm2, %v2317_v38  ;;  %v1444_v44 = vsel %vm836_vm2, %v2321_v43, 0.0  ;;  %v1592_v37 = vld [vmem:[%s3341_s3 + $0x100] sm:$0xff]  ;;  %v1594_v38 = vld [vmem:[%s3341_s3 + $0x110] sm:$0xff] }
 0x32c   : > { %2204 = vmatprep.subr.bf16.mxu1 %v2203_v48  ;;  %v2237_v42 = vpack.c.bf16 %v1594_v38, %v1592_v37  ;;  %v1600_v48 = vld [vmem:[%s3341_s3 + $0x140] sm:$0xff] }
 0x32e   : > { %1445 = vadd.xlane.f32.xlu1 %v1444_v44  ;;  %1969 = vmatmul.mubr.msk.f32.vlgmr.msra.gmra.mrb[12].mxu1 %vm836_vm2, %v2321_v43  ;;  %v2239_v43 = vpack.c.bf16 %v1599_v40, %v1597_v39  ;;  %v1596_v44 = vld [vmem:[%s3341_s3 + $0x120] sm:$0xff] }
 0x32f   : > { %2206 = vmatpush1.bf16.msra.mxu1 %v2205_v53  ;;  %v2245_v53 = vpack.c.bf16 %v1602_v49, %v1600_v48 }
 0x330   : > { %2208 = vmatprep.subr.bf16.mxu1 %v2207_v54  ;;  %v2247_v54 = vpack.c.bf16 %v1607_v52, %v1605_v50 }
 0x332   : > { %1246 = vadd.xlane.f32.xlu1 %v1245_v34  ;;  %v1598_v34 = vld [vmem:[%s3341_s3 + $0x130] sm:$0xff] }
 0x333   : > { %2210 = vmatpush1.bf16.msra.mxu1 %v2209_v59  ;;  %v2241_v46 = vpack.c.bf16 %v1598_v34, %v1596_v44  ;;  %v2249_v59 = vpack.c.bf16 %v1606_v56, %v1604_v55 }
 0x334   : > { %2212 = vmatprep.subr.bf16.mxu1 %v2211_v60  ;;  %v2251_v60 = vpack.c.bf16 %v1611_v58, %v1609_v57 }
 0x336   : > { %1249 = vadd.xlane.f32.xlu1 %v1248_v1  ;;  %v1601_v1 = vld [vmem:[%s3341_s3 + $0x148] sm:$0xff] }
 0x337   : > { %2214 = vmatpush1.bf16.msra.mxu1 %v2213_v4  ;;  %v2243_v47 = vpack.c.bf16 %v1603_v45, %v1601_v1  ;;  %v2253_v4 = vpack.c.bf16 %v1610_v62, %v1608_v61 }
 0x338   : > { %2216 = vmatprep.subr.bf16.mxu1 %v2215_v5  ;;  %v2255_v5 = vpack.c.bf16 %v1615_v0, %v1613_v63  ;;  %v1624_v63 = vld [vmem:[%s3342_s4] sm:$0x3] }
 0x339   : > { %v1629_v0 = vrot.slane %v1624_v63, %v3019_v41 }
 0x33b   : > { %2218 = vmatpush1.bf16.msra.mxu1 %v2217_v10  ;;  %v2257_v10 = vpack.c.bf16 %v1614_v7, %v1612_v6 }
 0x33c   : > { %2220 = vmatprep.subr.bf16.mxu1 %v2219_v11  ;;  %v2259_v11 = vpack.c.bf16 %v1619_v9, %v1617_v8  ;;  %v2342_v9 = vld [vmem:[%s2690_s22] sm:$0xff] }
 0x33f   : > { %2222 = vmatpush1.bf16.msra.mxu1 %v2221_v16 }
 0x340   : > { %2224 = vmatprep.subr.bf16.mxu1 %v2223_v17 }
 0x343   : > { %2226 = vmatpush1.bf16.msra.mxu1 %v2225_v22  ;;  %v1620_v22 = vld [vmem:[%s3341_s3 + $0x1e0] sm:$0xff] }
 0x344   : > { %2228 = vmatprep.subr.bf16.mxu1 %v2227_v23  ;;  %v1622_v23 = vld [vmem:[%s3341_s3 + $0x1f0] sm:$0xff] }
 0x345   : > { %v2265_v25 = vpack.c.bf16 %v1622_v23, %v1620_v22 }
 0x347   : > { %2230 = vmatpush1.bf16.msra.mxu1 %v2229_v28 }
 0x348   : > { %2232 = vmatprep.subr.bf16.mxu1 %v2231_v29 }
 0x34b   : > { %2234 = vmatpush1.bf16.msra.mxu1 %v2233_v35 }
 0x34c   : > { %2236 = vmatprep.subr.bf16.mxu1 %v2235_v36 }
 0x34f   : > { %2238 = vmatpush1.bf16.msra.mxu1 %v2237_v42 }
 0x350   : > { %2240 = vmatprep.subr.bf16.mxu1 %v2239_v43 }
 0x353   : > { %2242 = vmatpush1.bf16.msra.mxu1 %v2241_v46 }
 0x354   : > { %2244 = vmatprep.subr.bf16.mxu1 %v2243_v47 }
 0x357   : > { %2246 = vmatpush1.bf16.msra.mxu1 %v2245_v53 }
 0x358   : > { %2248 = vmatprep.subr.bf16.mxu1 %v2247_v54 }
 0x35b   : > { %2250 = vmatpush1.bf16.msra.mxu1 %v2249_v59 }
 0x35c   : > { %2252 = vmatprep.subr.bf16.mxu1 %v2251_v60 }
 0x35f   : > { %2254 = vmatpush1.bf16.msra.mxu1 %v2253_v4  ;;  %v1633_v4 = vrot.slane %v1624_v63, %v3034_v51 }
 0x360   : > { %2256 = vmatprep.subr.bf16.mxu1 %v2255_v5 }
 0x363   : > { %2258 = vmatpush1.bf16.msra.mxu1 %v2257_v10 }
 0x364   : > { %2260 = vmatprep.subr.bf16.mxu1 %v2259_v11 }
 0x367   : > { %2262 = vmatpush1.bf16.msra.mxu1 %v2261_v14 }
 0x368   : > { %2264 = vmatprep.subr.bf16.mxu1 %v2263_v21 }
 0x36b   : > { %2266 = vmatpush1.bf16.msra.mxu1 %v2265_v25 }
 0x376   : > { %v3107_v2 = vpop.f32.mrb[6].mxu1 }
 0x377   : > { %v3109_v3 = vpop.f32.mrb[7].mxu1 }
 0x3aa   : > { %v1047_v15 = vpop.xlane.xlu0 %1046 }
 0x3ab   : > { %2322 = vrcp.f32 %v1047_v15 }
 0x3ae   : > { %v1050_v17 = vpop.xlane.xlu0 %1049 }
 0x3af   : > { %2324 = vrcp.f32 %v1050_v17  ;;  %v2344_v17 = vld [vmem:[%s2690_s22 + $0x10] sm:$0xff] }
 0x3b2   : > { %v851_v44 = vpop.xlane.xlu0 %850 }
 0x3b5   : > { %v2323_v29 = vpop.eup %2322 }
 0x3b6   : > { %v854_v1 = vpop.xlane.xlu0 %853 }
 0x3b7   : > { %v1443_v16 = vpop.xlane.xlu1 %1442 }
 0x3b9   : > { %v2325_v30 = vpop.eup %2324 }
 0x3bb   : > { %v1446_v18 = vpop.xlane.xlu1 %1445 }
 0x3bc   : > { %2326 = vrcp.f32 %v1446_v18 }
 0x3bd   : > { %2328 = vrcp.f32 %v1443_v16 }
 0x3be   : > { %2330 = vrcp.f32 %v851_v44  ;;  %v1717_v44 = vld [vmem:[%s3343_s5] sm:$0x3] }
 0x3bf   : > { %v1247_v43 = vpop.xlane.xlu1 %1246 }
 0x3c0   : > { %2332 = vrcp.f32 %v1247_v43 }
 0x3c3   : > { %v1250_v34 = vpop.xlane.xlu1 %1249 }
 0x3c4   : > { %2334 = vrcp.f32 %v1250_v34  ;;  %v1718_v34 = vld [vmem:[%s3344_s6] sm:$0x3] }
 0x3c5   : > { %2336 = vrcp.f32 %v854_v1  ;;  %v1756_v1 = vrot.slane %v1717_v44, %v3019_v41 }
 0x3c6   : > { %v2327_v31 = vpop.eup %2326 }
 0x3c7   : > { %v2329_v33 = vpop.eup %2328 }
 0x3c8   : > { %v2331_v45 = vpop.eup %2330 }
 0x3c9   : > { %v937_v49 = vmul.f32 %v2331_v45, %v3109_v3  ;;  %v1760_v45 = vrot.slane %v1717_v44, %v3034_v51 }
 0x3ca   : > { %v2333_v47 = vpop.eup %2332 }
 0x3ce   : > { %v2335_v55 = vpop.eup %2334 }
 0x3cf   : > { %v2337_v56 = vpop.eup %2336 }
 0x3d0   : > { %v939_v3 = vmul.f32 %v2337_v56, %v3107_v2  ;;  %v2343_v2 = vld [vmem:[%s2690_s22 + $0x8] sm:$0xff] }
 0x3f9   : > { %v1942_v24 = vpop.f32.mrb[8].mxu1 }
 0x3fa   : > { %v1131_v26 = vpop.f32.mrb[9].mxu1  ;;  %v1143_v35 = vmul.f32 %v2325_v30, %v1942_v24 }
 0x3fb   : > { %v1141_v38 = vmul.f32 %v2323_v29, %v1131_v26 }
 0x3fd   : > { %v1956_v27 = vpop.f32.mrb[10].mxu1 }
 0x3fe   : > { %v1323_v28 = vpop.f32.mrb[11].mxu1  ;;  %v1335_v57 = vmul.f32 %v2335_v55, %v1956_v27 }
 0x3ff   : > { %v1333_v50 = vmul.f32 %v2333_v47, %v1323_v28  ;;  %v1771_v47 = vrot.slane %v1718_v34, %v3019_v41 }
 0x401   : > { %v1970_v32 = vpop.f32.mrb[12].mxu1 }
 0x402   : > { %v1539_v36 = vmul.f32 %v2327_v31, %v1970_v32  ;;  %v1527_v37 = vpop.f32.mrb[13].mxu1 }
 0x403   : > { %v1537_v39 = vmul.f32 %v2329_v33, %v1527_v37 }
 0x404   : > { %v2301_v40 = vpack.i.bf16 %v1143_v35, %v1539_v36 }
 0x405   : > { %v2296_v42 = vpack.i.bf16 %v1141_v38, %v1537_v39 }
 0x406   : > { %2302 = vrot.lane.b32.xlu0 %v2301_v40, %s2354_s15 }
 0x407   : > { %2297 = vrot.lane.b32.xlu1 %v2296_v42, %s2354_s15 }
 0x478   : > { %v2303_v46 = vpop.permute.xlu0 %2302 }
 0x479   : > { %v2298_v48 = vpop.permute.xlu1 %2297  ;;  %v2304_v52 = vunpack.i.l.bf16 %v2303_v46  ;;  %v2305_v60 = vunpack.i.h.bf16 %v2303_v46 }
 0x47a   : > { %v2300_v53 = vunpack.i.h.bf16 %v2298_v48  ;;  %v2299_v54 = vunpack.i.l.bf16 %v2298_v48  ;;  %v1775_v48 = vrot.slane %v1718_v34, %v3034_v51 }
 0x47b   : > { %v1559_v61 = vsel %vm746_vm0, %v1335_v57, %v2304_v52  ;;  %v1557_v62 = vsel %vm746_vm0, %v939_v3, %v2305_v60 }
 0x47c   : > { %v1558_v58 = vsel %vm746_vm0, %v1333_v50, %v2299_v54  ;;  %v1556_v59 = vsel %vm746_vm0, %v937_v49, %v2300_v53 }
 0x47d   : > { %1700 = vmatprep.mubr.f32.mxu1 %v1558_v58 }
 0x47e   : > { %1701 = vmatmul.mubr.f32.vlgmr.msra.gmra.mrb[14].mxu1 %v1556_v59 }
 0x47f   : > { %1706 = vmatprep.mubr.f32.mxu1 %v1559_v61 }
 0x482   : > { %1707 = vmatmul.mubr.f32.gmra.mrb[16].mxu1 %v1557_v62 }
 0x551   : > { %v1702_v5 = vpop.f32.mrb[14].mxu1 }
 0x552   : > { %v1703_v6 = vadd.f32 %v1702_v5, %v1629_v0  ;;  %v1704_v7 = vpop.f32.mrb[15].mxu1 }
 0x553   : > { %v1705_v8 = vadd.f32 %v1704_v7, %v1633_v4 }
 0x554   : > { %v1713_v10 = vadd.f32 %v2342_v9, %v1703_v6 }
 0x555   : > { %v1714_v11 = vadd.f32 %v2343_v2, %v1705_v8  ;;  %v1708_v12 = vpop.f32.mrb[16].mxu1 }
 0x556   : > { %v1709_v13 = vadd.f32 %v1708_v12, %v1629_v0  ;;  %v1710_v14 = vpop.f32.mrb[17].mxu1 }
 0x557   : > { %v1711_v15 = vadd.f32 %v1710_v14, %v1633_v4  ;;  %v1719_v16 = vadd.f32 %v1714_v11, %v1713_v10 }
 0x558   : > { %v1715_v18 = vadd.f32 %v2344_v17, %v1709_v13 }
 0x559   : > { %v1716_v20 = vadd.f32 %v2345_v19, %v1711_v15  ;;  %1720 = vadd.xlane.f32.xlu1 %v1719_v16 }
 0x55b   : > { %v1722_v21 = vadd.f32 %v1716_v20, %v1715_v18 }
 0x55d   : > { %1723 = vadd.xlane.f32.xlu0 %v1722_v21 }
 0x5e6   : > { %v1721_v22 = vpop.xlane.xlu1 %1720 }
 0x5e7   : > { %v1726_v23 = vmul.f32 0.00390625, %v1721_v22 }
 0x5e9   : > { %v1728_v24 = vsub.f32 %v1713_v10, %v1726_v23  ;;  %v1729_v25 = vsub.f32 %v1714_v11, %v1726_v23 }
 0x5ea   : > { %v1724_v26 = vpop.xlane.xlu0 %1723 }
 0x5eb   : > { %v1727_v27 = vmul.f32 0.00390625, %v1724_v26  ;;  %v1732_v28 = vmul.f32 %v1728_v24, %v1728_v24  ;;  %v1733_v29 = vmul.f32 %v1729_v25, %v1729_v25 }
 0x5ed   : > { %v1730_v30 = vsub.f32 %v1715_v18, %v1727_v27  ;;  %v1731_v31 = vsub.f32 %v1716_v20, %v1727_v27  ;;  %v1736_v32 = vadd.f32 %v1733_v29, %v1732_v28 }
 0x5ef   : > { %1737 = vadd.xlane.f32.xlu1 %v1736_v32  ;;  %v1734_v33 = vmul.f32 %v1730_v30, %v1730_v30  ;;  %v1735_v35 = vmul.f32 %v1731_v31, %v1731_v31 }
 0x5f1   : > { %v1739_v36 = vadd.f32 %v1735_v35, %v1734_v33 }
 0x5f3   : > { %1740 = vadd.xlane.f32.xlu0 %v1739_v36 }
 0x67c   : > { %v1738_v37 = vpop.xlane.xlu1 %1737 }
 0x67d   : > { %v1742_v38 = vmul.f32 0.00390625, %v1738_v37 }
 0x67f   : > { %v1744_v39 = vadd.f32 1e-05, %v1742_v38 }
 0x680   : > { %v1741_v40 = vpop.xlane.xlu0 %1740 }
 0x681   : > { %2338 = vrsqrt.f32 %v1744_v39  ;;  %v1743_v42 = vmul.f32 0.00390625, %v1741_v40 }
 0x683   : > { %v1745_v43 = vadd.f32 1e-05, %v1743_v42 }
 0x685   : > { %2340 = vrsqrt.f32 %v1745_v43 }
 0x68b   : > { %v2339_v46 = vpop.eup %2338 }
 0x68c   : > { %v1748_v49 = vmul.f32 %v2339_v46, %v1728_v24  ;;  %v1749_v50 = vmul.f32 %v2339_v46, %v1729_v25 }
 0x68e   : > { %v1763_v52 = vmul.f32 %v1756_v1, %v1748_v49  ;;  %v1764_v53 = vmul.f32 %v1760_v45, %v1749_v50 }
 0x68f   : > { %v2341_v54 = vpop.eup %2340 }
 0x690   : > { %v1778_v55 = vadd.f32 %v1771_v47, %v1763_v52  ;;  %v1779_v56 = vadd.f32 %v1775_v48, %v1764_v53  ;;  %v1750_v57 = vmul.f32 %v2341_v54, %v1730_v30  ;;  %v1751_v58 = vmul.f32 %v2341_v54, %v1731_v31 }
 0x692   : > { %1782 = vst [vmem:[%s285_s29] sm:$0xff] %v1778_v55  ;;  %1783 = vst [vmem:[%s285_s29 + $0x8] sm:$0xff] %v1779_v56  ;;  %v1765_v59 = vmul.f32 %v1756_v1, %v1750_v57  ;;  %v1766_v41 = vmul.f32 %v1760_v45, %v1751_v58 }
 0x694   : > { %v1780_v60 = vadd.f32 %v1771_v47, %v1765_v59  ;;  %v1781_v51 = vadd.f32 %v1775_v48, %v1766_v41 }
 0x696   : > { %1784 = vst [vmem:[%s285_s29 + $0x10] sm:$0xff] %v1780_v60  ;;  %1785 = vst [vmem:[%s285_s29 + $0x18] sm:$0xff] %v1781_v51 }
 0x697 PF: > { %s17_s24 = sadd.s32 1, %s2352_s24  }
 0x698   : > { %p14_p4 = scmp.ge.s32.totalorder %s17_s24, 4  }
 0x69a   :  { %16 = sbr.rel (!%p14_p4) target bundleno = 1 (0x1), region = 78 }

// kernel: transformer_forward.6
= control target key start
LH: loop header
LB: loop body
LE: loop exit
PB: predicated region body
PF: predicated region fallthrough
CT: control target
= control target key end

     0   :  { %12 = vsyncpa [#allocation3], 0  ;;  %s2798_s0 = inlined_call_operand.vmem [shape: f32[32,256], index: 0, kind: input, shape index: {}]   ;;  %s2799_s1 = inlined_call_operand.hbm [shape: f32[256,768], index: 1, kind: input, shape index: {}]   ;;  %s2800_s2 = inlined_call_operand.vmem [shape: f32[1,768], index: 2, kind: input, shape index: {}]   ;;  %s2801_s3 = inlined_call_operand.hbm [shape: f32[256,256], index: 3, kind: input, shape index: {}]   ;;  %s2802_s4 = inlined_call_operand.vmem [shape: f32[1,256], index: 4, kind: input, shape index: {}]   ;;  %s2803_s5 = inlined_call_operand.vmem [shape: f32[1,256], index: 5, kind: input, shape index: {}]   ;;  %s2804_s6 = inlined_call_operand.vmem [shape: f32[1,256], index: 6, kind: input, shape index: {}]   ;;  %s2805_s7 = inlined_call_operand.vmem [shape: f32[32,256], index: 7, kind: output, shape index: {}]  }
   0x1   :  { %13 = vsyncpa [#allocation5], 0  ;;  %s2546_s24 = smov 0  }
   0x2 LB: > { %s2499_s25 = smov [#allocation2]   ;;  %s1896_s27 = sadd.s32 4294967295, %s2497_s24   ;;  %s2497_s24 = sphi %s2546_s24, %s19_s24  }
   0x3   : > { %s214_s26 = sshll.u32 %s2499_s25, 4  ;;  %p1898_p0 = scmp.ge.s32.totalorder %s2497_s24, 1  ;;  %s215_s26 = int_to_ptr.vmem [resolvable:$true] %s214_s26 }
   0x4   : > { %p202_p1 = scmp.lt.s32.totalorder %s2497_s24, 3  ;;  %p2560_p3 = scmp.eq.s32.totalorder %s1896_s27, 0 }
   0x5   : > { %s2500_s30 = smov [#allocation4]   ;;  %s2427_s12 = scalar_lea.hbm %s2799_s1, 24576 }
   0x6   : > { %p2554_p2 = pnand %p1898_p0, %p202_p1  ;;  %s230_s8 = sshll.u32 %s2500_s30, 4  ;;  %s2572_s8 = int_to_ptr.vmem [resolvable:$true] %s230_s8 }
   0x7   : > { %s2810_s29 = scalar_select %p2560_p3, 1, 0 }
   0x8   : > { %s2809_s28 = scalar_select %p2554_p2, 1, 0 }
   0x9   : > { %p2331_p4 = pneg %p2554_p2  ;;  %p2428_p6 = scmp.ne.s32.totalorder %s2799_s1, %s2427_s12 }
   0xa   : > { %p2434_p10 = scmp.lt.u32.totalorder %s2427_s12, %s2799_s1 }
   0xb   : > { %p2568_p5 = pnand %p2560_p3, %p2331_p4 }
   0xd   : > { %p2429_p7 = pneg %p2568_p5 }
   0xf   : > { %p2430_p8 = pnand %p2429_p7, %p2428_p6 }
  0x11   : > { %p2431_p9 = pneg %p2430_p8 }
  0x13   : > { %p2436_p11 = pnand %p2434_p10, %p2431_p9 }
  0x15   : > { %2439 = shalt.err (!%p2436_p11)
}
  0x16   : > { %s2440_s17 = scalar_lea.vmem %s215_s26, 24576  ;;  %p2448_p1 = scmp.lt.s32.totalorder %s215_s26, %s215_s26 }
  0x17   : > { %p2441_p12 = scmp.ne.s32.totalorder %s215_s26, %s2440_s17  ;;  %p2449_p4 = scmp.lt.s32.totalorder %s2440_s17, %s2440_s17 }
  0x19   : > { %p2443_p13 = pnand %p2441_p12, %p2429_p7  ;;  %p2450_p3 = por %p2449_p4, %p2448_p1 }
  0x1b   : > { %p2444_p0 = pneg %p2443_p13 }
  0x1d   : > { %p2451_p2 = pnand %p2450_p3, %p2444_p0 }
  0x1f   : > { %2454 = shalt.err (!%p2451_p2)
}
  0x20   : > { %s2501_s18 = smov 768   ;;  %s2502_s19 = smov 48  }
  0x21   : > { %2334 = dma.hbm_to_vmem [thread:$0]  (!%p2568_p5), %s2799_s1, 24576, %s215_s26, [#allocation3], %s2501_s18, %s2501_s18, %s2502_s19  }
  0x22   : > { %s2455_s25 = scalar_lea.hbm %s2801_s3, 8192 }
  0x23   : > { %p2456_p6 = scmp.ne.s32.totalorder %s2801_s3, %s2455_s25  ;;  %p2462_p8 = scmp.lt.u32.totalorder %s2455_s25, %s2801_s3 }
  0x25   : > { %p2458_p2 = pnand %p2456_p6, %p2429_p7 }
  0x27   : > { %p2459_p3 = pneg %p2458_p2 }
  0x29   : > { %p2464_p9 = pnand %p2462_p8, %p2459_p3 }
  0x2b   : > { %2467 = shalt.err (!%p2464_p9)
}
  0x2c   : > { %s2468_s26 = scalar_lea.vmem %s2572_s8, 8192  ;;  %p2476_p13 = scmp.lt.s32.totalorder %s2572_s8, %s2572_s8 }
  0x2d   : > { %p2469_p10 = scmp.ne.s32.totalorder %s2572_s8, %s2468_s26  ;;  %p2477_p0 = scmp.lt.s32.totalorder %s2468_s26, %s2468_s26 }
  0x2f   : > { %p2471_p11 = pnand %p2469_p10, %p2429_p7  ;;  %p2478_p1 = por %p2477_p0, %p2476_p13 }
  0x31   : > { %p2472_p12 = pneg %p2471_p11 }
  0x33   : > { %p2479_p4 = pnand %p2478_p1, %p2472_p12 }
  0x35   : > { %2482 = shalt.err (!%p2479_p4)
}
  0x36   : > { %s2503_s13 = smov 256   ;;  %s2504_s14 = smov 16  }
  0x37   : > { %2337 = dma.hbm_to_vmem [thread:$0]  (!%p2568_p5), %s2801_s3, 8192, %s2572_s8, [#allocation5], %s2503_s13, %s2503_s13, %s2504_s14  }
  0x38   : > { %p2812_p6 = scmp.ne.s32.totalorder %s2809_s28, 0 }
  0x39   : > { %p2813_p7 = scmp.ne.s32.totalorder (!%p2812_p6), %s2810_s29, 0 }
  0x3a   : > { %265 = sbr.rel (%p2812_p6) target bundleno = 1751 (0x6d7), region = 48 }
  0x41   : > { %2488 = dma.done.wait (%p2813_p7), [#allocation3], 24576  }
  0x42   : > { %2490 = vsyncadd (%p2813_p7), [#allocation3], 4294942720 }
  0x43   : > { %2492 = dma.done.wait (%p2813_p7), [#allocation5], 8192  }
  0x44   : > { %2494 = vsyncadd (%p2813_p7), [#allocation5], 4294959104  ;;  %v322_v0 = vld [vmem:[#allocation2 + $0x8] sm:$0xff]  ;;  %v328_v1 = vld [vmem:[#allocation2 + $0x38] sm:$0xff]  ;;  %s1905_s28 = sshll.u32 %s1896_s27, 1  ;;  %vm776_vm0 = vcmask 523264  }
  0x45   : > { %v324_v2 = vld [vmem:[#allocation2 + $0x18] sm:$0xff]  ;;  %v2027_v3 = vpack.c.bf16 %v328_v1, %v322_v0  ;;  %v330_v4 = vld [vmem:[#allocation2 + $0x48] sm:$0xff]  ;;  %v321_v5 = vld [vmem:[#allocation2] sm:$0xff]  ;;  %p304_p5 = scmp.lt.s32.totalorder %s1905_s28, 3  ;;  %s2505_s19 = smov 64   ;;  %vm866_vm2 = vcmask 130048  }
  0x46   : > { %v327_v6 = vld [vmem:[#allocation2 + $0x30] sm:$0xff]  ;;  %v2091_v7 = vpack.c.bf16 %v330_v4, %v324_v2  ;;  %v329_v10 = vld [vmem:[#allocation2 + $0x40] sm:$0xff]  ;;  %v334_v11 = vld [vmem:[#allocation2 + $0x68] sm:$0xff] }
  0x47   : > { %v2029_v8 = vpack.c.bf16 %v327_v6, %v321_v5  ;;  %v323_v9 = vld [vmem:[#allocation2 + $0x10] sm:$0xff]  ;;  %2028 = vmatprep.subr.bf16.mxu0 %v2027_v3  ;;  %v340_v13 = vld [vmem:[#allocation2 + $0x98] sm:$0xff]  ;;  %v342_v15 = vld [vmem:[#allocation2 + $0xa8] sm:$0xff]  ;;  %s2817_s28 = smov (!%p304_p5, %s1905_s28), 3 }
  0x48   : > { %v2093_v12 = vpack.c.bf16 %v329_v10, %v323_v9  ;;  %v336_v14 = vld [vmem:[#allocation2 + $0x78] sm:$0xff]  ;;  %2092 = vmatprep.subr.bf16.mxu1 %v2091_v7  ;;  %v2031_v16 = vpack.c.bf16 %v340_v13, %v334_v11  ;;  %v333_v18 = vld [vmem:[#allocation2 + $0x60] sm:$0xff]  ;;  %v339_v19 = vld [vmem:[#allocation2 + $0x90] sm:$0xff]  ;;  %s1937_s27 = sshll.u32 %s2817_s28, 4 }
  0x49   : > { %2030 = vmatpush1.bf16.msra.mxu0 %v2029_v8  ;;  %v2095_v17 = vpack.c.bf16 %v342_v15, %v336_v14  ;;  %v335_v20 = vld [vmem:[#allocation2 + $0x70] sm:$0xff]  ;;  %v2033_v21 = vpack.c.bf16 %v339_v19, %v333_v18  ;;  %v341_v22 = vld [vmem:[#allocation2 + $0xa0] sm:$0xff]  ;;  %v346_v23 = vld [vmem:[#allocation2 + $0xc8] sm:$0xff]  ;;  %s2642_s9 = scalar_lea.vmem %s2798_s0, %s1937_s27  ;;  %s315_s12 = scalar_lea.vmem %s2805_s7, %s1937_s27 }
  0x4a   : > { %2094 = vmatpush1.bf16.msra.mxu1 %v2093_v12  ;;  %v352_v24 = vld [vmem:[#allocation2 + $0xf8] sm:$0xff]  ;;  %2032 = vmatprep.subr.bf16.mxu0 %v2031_v16  ;;  %v2097_v25 = vpack.c.bf16 %v341_v22, %v335_v20  ;;  %v354_v28 = vld [vmem:[#allocation2 + $0x108] sm:$0xff]  ;;  %v345_v29 = vld [vmem:[#allocation2 + $0xc0] sm:$0xff] }
  0x4b   : > { %2096 = vmatprep.subr.bf16.mxu1 %v2095_v17  ;;  %v2035_v26 = vpack.c.bf16 %v352_v24, %v346_v23  ;;  %v348_v27 = vld [vmem:[#allocation2 + $0xd8] sm:$0xff]  ;;  %v351_v31 = vld [vmem:[#allocation2 + $0xf0] sm:$0xff]  ;;  %v353_v33 = vld [vmem:[#allocation2 + $0x100] sm:$0xff] }
  0x4c   : > { %v2099_v30 = vpack.c.bf16 %v354_v28, %v348_v27  ;;  %v347_v32 = vld [vmem:[#allocation2 + $0xd0] sm:$0xff]  ;;  %v2037_v34 = vpack.c.bf16 %v351_v31, %v345_v29  ;;  %v358_v35 = vld [vmem:[#allocation2 + $0x128] sm:$0xff]  ;;  %v364_v36 = vld [vmem:[#allocation2 + $0x158] sm:$0xff] }
  0x4d   : > { %2034 = vmatpush1.bf16.msra.mxu0 %v2033_v21  ;;  %v360_v37 = vld [vmem:[#allocation2 + $0x138] sm:$0xff]  ;;  %v2101_v38 = vpack.c.bf16 %v353_v33, %v347_v32  ;;  %v2039_v39 = vpack.c.bf16 %v364_v36, %v358_v35  ;;  %v366_v40 = vld [vmem:[#allocation2 + $0x168] sm:$0xff]  ;;  %v357_v41 = vld [vmem:[#allocation2 + $0x120] sm:$0xff] }
  0x4e   : > { %2098 = vmatpush1.bf16.msra.mxu1 %v2097_v25  ;;  %2036 = vmatprep.subr.bf16.mxu0 %v2035_v26  ;;  %v363_v42 = vld [vmem:[#allocation2 + $0x150] sm:$0xff]  ;;  %v2103_v43 = vpack.c.bf16 %v366_v40, %v360_v37  ;;  %v365_v45 = vld [vmem:[#allocation2 + $0x160] sm:$0xff]  ;;  %v370_v46 = vld [vmem:[#allocation2 + $0x188] sm:$0xff] }
  0x4f   : > { %2100 = vmatprep.subr.bf16.mxu1 %v2099_v30  ;;  %v359_v44 = vld [vmem:[#allocation2 + $0x130] sm:$0xff]  ;;  %v376_v47 = vld [vmem:[#allocation2 + $0x1b8] sm:$0xff]  ;;  %v378_v49 = vld [vmem:[#allocation2 + $0x1c8] sm:$0xff]  ;;  %v2041_v50 = vpack.c.bf16 %v363_v42, %v357_v41 }
  0x50   : > { %v372_v48 = vld [vmem:[#allocation2 + $0x198] sm:$0xff]  ;;  %v2105_v51 = vpack.c.bf16 %v365_v45, %v359_v44  ;;  %v2043_v52 = vpack.c.bf16 %v376_v47, %v370_v46  ;;  %v369_v53 = vld [vmem:[#allocation2 + $0x180] sm:$0xff]  ;;  %v375_v54 = vld [vmem:[#allocation2 + $0x1b0] sm:$0xff] }
  0x51   : > { %2038 = vmatpush1.bf16.msra.mxu0 %v2037_v34  ;;  %v371_v55 = vld [vmem:[#allocation2 + $0x190] sm:$0xff]  ;;  %v2107_v56 = vpack.c.bf16 %v378_v49, %v372_v48  ;;  %v377_v57 = vld [vmem:[#allocation2 + $0x1c0] sm:$0xff]  ;;  %v382_v58 = vld [vmem:[#allocation2 + $0x1e8] sm:$0xff]  ;;  %v2045_v62 = vpack.c.bf16 %v375_v54, %v369_v53 }
  0x52   : > { %2102 = vmatpush1.bf16.msra.mxu1 %v2101_v38  ;;  %2040 = vmatprep.subr.bf16.mxu0 %v2039_v39  ;;  %v388_v59 = vld [vmem:[#allocation2 + $0x218] sm:$0xff]  ;;  %v390_v61 = vld [vmem:[#allocation2 + $0x228] sm:$0xff]  ;;  %v2109_v63 = vpack.c.bf16 %v377_v57, %v371_v55  ;;  %v381_v1 = vld [vmem:[#allocation2 + $0x1e0] sm:$0xff] }
  0x53   : > { %2104 = vmatprep.subr.bf16.mxu1 %v2103_v43  ;;  %v384_v60 = vld [vmem:[#allocation2 + $0x1f8] sm:$0xff]  ;;  %v2047_v0 = vpack.c.bf16 %v388_v59, %v382_v58  ;;  %v387_v2 = vld [vmem:[#allocation2 + $0x210] sm:$0xff]  ;;  %v389_v5 = vld [vmem:[#allocation2 + $0x220] sm:$0xff] }
  0x54   : > { %v383_v3 = vld [vmem:[#allocation2 + $0x1f0] sm:$0xff]  ;;  %v2111_v4 = vpack.c.bf16 %v390_v61, %v384_v60  ;;  %v394_v6 = vld [vmem:[#allocation2 + $0x248] sm:$0xff]  ;;  %v400_v7 = vld [vmem:[#allocation2 + $0x278] sm:$0xff]  ;;  %v2049_v10 = vpack.c.bf16 %v387_v2, %v381_v1 }
  0x55   : > { %2042 = vmatpush1.bf16.msra.mxu0 %v2041_v50  ;;  %v396_v8 = vld [vmem:[#allocation2 + $0x258] sm:$0xff]  ;;  %v402_v9 = vld [vmem:[#allocation2 + $0x288] sm:$0xff]  ;;  %v2113_v11 = vpack.c.bf16 %v389_v5, %v383_v3  ;;  %v2051_v12 = vpack.c.bf16 %v400_v7, %v394_v6  ;;  %v393_v13 = vld [vmem:[#allocation2 + $0x240] sm:$0xff] }
  0x56   : > { %2106 = vmatpush1.bf16.msra.mxu1 %v2105_v51  ;;  %2044 = vmatprep.subr.bf16.mxu0 %v2043_v52  ;;  %v399_v14 = vld [vmem:[#allocation2 + $0x270] sm:$0xff]  ;;  %v2115_v16 = vpack.c.bf16 %v402_v9, %v396_v8  ;;  %v401_v17 = vld [vmem:[#allocation2 + $0x280] sm:$0xff]  ;;  %v406_v18 = vld [vmem:[#allocation2 + $0x2a8] sm:$0xff] }
  0x57   : > { %2108 = vmatprep.subr.bf16.mxu1 %v2107_v56  ;;  %v395_v15 = vld [vmem:[#allocation2 + $0x250] sm:$0xff]  ;;  %v412_v19 = vld [vmem:[#allocation2 + $0x2d8] sm:$0xff]  ;;  %v414_v21 = vld [vmem:[#allocation2 + $0x2e8] sm:$0xff]  ;;  %v2053_v22 = vpack.c.bf16 %v399_v14, %v393_v13 }
  0x58   : > { %v408_v20 = vld [vmem:[#allocation2 + $0x2b8] sm:$0xff]  ;;  %v2117_v23 = vpack.c.bf16 %v401_v17, %v395_v15  ;;  %v2055_v24 = vpack.c.bf16 %v412_v19, %v406_v18  ;;  %v405_v25 = vld [vmem:[#allocation2 + $0x2a0] sm:$0xff]  ;;  %v411_v26 = vld [vmem:[#allocation2 + $0x2d0] sm:$0xff] }
  0x59   : > { %2046 = vmatpush1.bf16.msra.mxu0 %v2045_v62  ;;  %v407_v27 = vld [vmem:[#allocation2 + $0x2b0] sm:$0xff]  ;;  %v2119_v28 = vpack.c.bf16 %v414_v21, %v408_v20  ;;  %v413_v29 = vld [vmem:[#allocation2 + $0x2e0] sm:$0xff]  ;;  %v418_v30 = vld [vmem:[#allocation2 + $0x308] sm:$0xff]  ;;  %v2057_v34 = vpack.c.bf16 %v411_v26, %v405_v25 }
  0x5a   : > { %2110 = vmatpush1.bf16.msra.mxu1 %v2109_v63  ;;  %2048 = vmatprep.subr.bf16.mxu0 %v2047_v0  ;;  %v424_v31 = vld [vmem:[#allocation2 + $0x338] sm:$0xff]  ;;  %v426_v33 = vld [vmem:[#allocation2 + $0x348] sm:$0xff]  ;;  %v2121_v35 = vpack.c.bf16 %v413_v29, %v407_v27  ;;  %v417_v37 = vld [vmem:[#allocation2 + $0x300] sm:$0xff] }
  0x5b   : > { %2112 = vmatprep.subr.bf16.mxu1 %v2111_v4  ;;  %v420_v32 = vld [vmem:[#allocation2 + $0x318] sm:$0xff]  ;;  %v2059_v36 = vpack.c.bf16 %v424_v31, %v418_v30  ;;  %v423_v38 = vld [vmem:[#allocation2 + $0x330] sm:$0xff]  ;;  %v425_v41 = vld [vmem:[#allocation2 + $0x340] sm:$0xff] }
  0x5c   : > { %v419_v39 = vld [vmem:[#allocation2 + $0x310] sm:$0xff]  ;;  %v2123_v40 = vpack.c.bf16 %v426_v33, %v420_v32  ;;  %v430_v42 = vld [vmem:[#allocation2 + $0x368] sm:$0xff]  ;;  %v436_v43 = vld [vmem:[#allocation2 + $0x398] sm:$0xff]  ;;  %v2061_v46 = vpack.c.bf16 %v423_v38, %v417_v37 }
  0x5d   : > { %2050 = vmatpush1.bf16.msra.mxu0 %v2049_v10  ;;  %v432_v44 = vld [vmem:[#allocation2 + $0x378] sm:$0xff]  ;;  %v438_v45 = vld [vmem:[#allocation2 + $0x3a8] sm:$0xff]  ;;  %v2125_v47 = vpack.c.bf16 %v425_v41, %v419_v39  ;;  %v2063_v48 = vpack.c.bf16 %v436_v43, %v430_v42  ;;  %v429_v49 = vld [vmem:[#allocation2 + $0x360] sm:$0xff] }
  0x5e   : > { %2114 = vmatpush1.bf16.msra.mxu1 %v2113_v11  ;;  %2052 = vmatprep.subr.bf16.mxu0 %v2051_v12  ;;  %v435_v50 = vld [vmem:[#allocation2 + $0x390] sm:$0xff]  ;;  %v2127_v52 = vpack.c.bf16 %v438_v45, %v432_v44  ;;  %v437_v53 = vld [vmem:[#allocation2 + $0x3a0] sm:$0xff]  ;;  %v442_v54 = vld [vmem:[#allocation2 + $0x3c8] sm:$0xff] }
  0x5f   : > { %2116 = vmatprep.subr.bf16.mxu1 %v2115_v16  ;;  %v431_v51 = vld [vmem:[#allocation2 + $0x370] sm:$0xff]  ;;  %v448_v55 = vld [vmem:[#allocation2 + $0x3f8] sm:$0xff]  ;;  %v450_v57 = vld [vmem:[#allocation2 + $0x408] sm:$0xff]  ;;  %v2065_v58 = vpack.c.bf16 %v435_v50, %v429_v49 }
  0x60   : > { %v444_v56 = vld [vmem:[#allocation2 + $0x3d8] sm:$0xff]  ;;  %v2129_v59 = vpack.c.bf16 %v437_v53, %v431_v51  ;;  %v2067_v60 = vpack.c.bf16 %v448_v55, %v442_v54  ;;  %v441_v61 = vld [vmem:[#allocation2 + $0x3c0] sm:$0xff]  ;;  %v447_v62 = vld [vmem:[#allocation2 + $0x3f0] sm:$0xff] }
  0x61   : > { %2054 = vmatpush1.bf16.msra.mxu0 %v2053_v22  ;;  %v443_v63 = vld [vmem:[#allocation2 + $0x3d0] sm:$0xff]  ;;  %v2131_v0 = vpack.c.bf16 %v450_v57, %v444_v56  ;;  %v449_v1 = vld [vmem:[#allocation2 + $0x400] sm:$0xff]  ;;  %v454_v2 = vld [vmem:[#allocation2 + $0x428] sm:$0xff]  ;;  %v2069_v6 = vpack.c.bf16 %v447_v62, %v441_v61 }
  0x62   : > { %2118 = vmatpush1.bf16.msra.mxu1 %v2117_v23  ;;  %2056 = vmatprep.subr.bf16.mxu0 %v2055_v24  ;;  %v460_v3 = vld [vmem:[#allocation2 + $0x458] sm:$0xff]  ;;  %v462_v5 = vld [vmem:[#allocation2 + $0x468] sm:$0xff]  ;;  %v453_v7 = vld [vmem:[#allocation2 + $0x420] sm:$0xff]  ;;  %v2133_v8 = vpack.c.bf16 %v449_v1, %v443_v63 }
  0x63   : > { %2120 = vmatprep.subr.bf16.mxu1 %v2119_v28  ;;  %v456_v4 = vld [vmem:[#allocation2 + $0x438] sm:$0xff]  ;;  %v2071_v9 = vpack.c.bf16 %v460_v3, %v454_v2  ;;  %v459_v10 = vld [vmem:[#allocation2 + $0x450] sm:$0xff]  ;;  %v461_v12 = vld [vmem:[#allocation2 + $0x460] sm:$0xff] }
  0x64   : > { %v455_v11 = vld [vmem:[#allocation2 + $0x430] sm:$0xff]  ;;  %v2135_v13 = vpack.c.bf16 %v462_v5, %v456_v4  ;;  %v466_v14 = vld [vmem:[#allocation2 + $0x488] sm:$0xff]  ;;  %v472_v15 = vld [vmem:[#allocation2 + $0x4b8] sm:$0xff]  ;;  %v2073_v19 = vpack.c.bf16 %v459_v10, %v453_v7 }
  0x65   : > { %2058 = vmatpush1.bf16.msra.mxu0 %v2057_v34  ;;  %v2645_v16 = vld [vmem:[%s2642_s9 + $0x8] sm:$0xff]  ;;  %v468_v17 = vld [vmem:[#allocation2 + $0x498] sm:$0xff]  ;;  %v2137_v20 = vpack.c.bf16 %v461_v12, %v455_v11  ;;  %v2075_v21 = vpack.c.bf16 %v472_v15, %v466_v14  ;;  %v465_v22 = vld [vmem:[#allocation2 + $0x480] sm:$0xff] }
  0x66   : > { %2122 = vmatpush1.bf16.msra.mxu1 %v2121_v35  ;;  %2060 = vmatprep.subr.bf16.mxu0 %v2059_v36  ;;  %v474_v18 = vld [vmem:[#allocation2 + $0x4c8] sm:$0xff]  ;;  %v471_v23 = vld [vmem:[#allocation2 + $0x4b0] sm:$0xff]  ;;  %v473_v26 = vld [vmem:[#allocation2 + $0x4c0] sm:$0xff] }
  0x67   : > { %2124 = vmatprep.subr.bf16.mxu1 %v2123_v40  ;;  %609 = vmatprep.mubr.f32.mxu0 %v2645_v16  ;;  %v467_v24 = vld [vmem:[#allocation2 + $0x490] sm:$0xff]  ;;  %v2139_v25 = vpack.c.bf16 %v474_v18, %v468_v17  ;;  %v478_v27 = vld [vmem:[#allocation2 + $0x4e8] sm:$0xff]  ;;  %v484_v28 = vld [vmem:[#allocation2 + $0x518] sm:$0xff]  ;;  %v2077_v31 = vpack.c.bf16 %v471_v23, %v465_v22 }
  0x68   : > { %686 = vmatprep.mubr.f32.mxu1 %v2645_v16  ;;  %v480_v29 = vld [vmem:[#allocation2 + $0x4f8] sm:$0xff]  ;;  %v486_v30 = vld [vmem:[#allocation2 + $0x528] sm:$0xff]  ;;  %v2141_v32 = vpack.c.bf16 %v473_v26, %v467_v24  ;;  %v2079_v33 = vpack.c.bf16 %v484_v28, %v478_v27  ;;  %v477_v34 = vld [vmem:[#allocation2 + $0x4e0] sm:$0xff] }
  0x69   : > { %2062 = vmatpush1.bf16.msra.mxu0 %v2061_v46  ;;  %v483_v35 = vld [vmem:[#allocation2 + $0x510] sm:$0xff]  ;;  %v2143_v37 = vpack.c.bf16 %v486_v30, %v480_v29  ;;  %v485_v38 = vld [vmem:[#allocation2 + $0x520] sm:$0xff]  ;;  %v490_v39 = vld [vmem:[#allocation2 + $0x548] sm:$0xff] }
  0x6a   : > { %2126 = vmatpush1.bf16.msra.mxu1 %v2125_v47  ;;  %2064 = vmatprep.subr.bf16.mxu0 %v2063_v48  ;;  %v479_v36 = vld [vmem:[#allocation2 + $0x4f0] sm:$0xff]  ;;  %v496_v40 = vld [vmem:[#allocation2 + $0x578] sm:$0xff]  ;;  %v498_v42 = vld [vmem:[#allocation2 + $0x588] sm:$0xff]  ;;  %v2081_v43 = vpack.c.bf16 %v483_v35, %v477_v34 }
  0x6b   : > { %2128 = vmatprep.subr.bf16.mxu1 %v2127_v52  ;;  %v492_v41 = vld [vmem:[#allocation2 + $0x558] sm:$0xff]  ;;  %v2145_v44 = vpack.c.bf16 %v485_v38, %v479_v36  ;;  %v2083_v45 = vpack.c.bf16 %v496_v40, %v490_v39  ;;  %v489_v46 = vld [vmem:[#allocation2 + $0x540] sm:$0xff]  ;;  %v495_v47 = vld [vmem:[#allocation2 + $0x570] sm:$0xff] }
  0x6c   : > { %v491_v48 = vld [vmem:[#allocation2 + $0x550] sm:$0xff]  ;;  %v2147_v49 = vpack.c.bf16 %v498_v42, %v492_v41  ;;  %v497_v50 = vld [vmem:[#allocation2 + $0x580] sm:$0xff]  ;;  %v502_v51 = vld [vmem:[#allocation2 + $0x5a8] sm:$0xff]  ;;  %v2085_v55 = vpack.c.bf16 %v495_v47, %v489_v46 }
  0x6d   : > { %2066 = vmatpush1.bf16.msra.mxu0 %v2065_v58  ;;  %v508_v52 = vld [vmem:[#allocation2 + $0x5d8] sm:$0xff]  ;;  %v510_v54 = vld [vmem:[#allocation2 + $0x5e8] sm:$0xff]  ;;  %v2149_v56 = vpack.c.bf16 %v497_v50, %v491_v48  ;;  %v501_v58 = vld [vmem:[#allocation2 + $0x5a0] sm:$0xff] }
  0x6e   : > { %2130 = vmatpush1.bf16.msra.mxu1 %v2129_v59  ;;  %2068 = vmatprep.subr.bf16.mxu0 %v2067_v60  ;;  %v504_v53 = vld [vmem:[#allocation2 + $0x5b8] sm:$0xff]  ;;  %v2087_v57 = vpack.c.bf16 %v508_v52, %v502_v51  ;;  %v507_v59 = vld [vmem:[#allocation2 + $0x5d0] sm:$0xff]  ;;  %v509_v62 = vld [vmem:[#allocation2 + $0x5e0] sm:$0xff] }
  0x6f   : > { %2132 = vmatprep.subr.bf16.mxu1 %v2131_v0  ;;  %v2151_v60 = vpack.c.bf16 %v510_v54, %v504_v53  ;;  %v503_v61 = vld [vmem:[#allocation2 + $0x5b0] sm:$0xff]  ;;  %v2089_v63 = vpack.c.bf16 %v507_v59, %v501_v58  ;;  %v2650_v1 = vld [vmem:[%s2642_s9] sm:$0xff]  ;;  %v2653_v2 = vld [vmem:[%s2642_s9 + $0x18] sm:$0xff] }
  0x70   : > { %v2153_v0 = vpack.c.bf16 %v509_v62, %v503_v61  ;;  %v2659_v3 = vld [vmem:[%s2642_s9 + $0x10] sm:$0xff]  ;;  %v326_v4 = vld [vmem:[#allocation2 + $0x28] sm:$0xff]  ;;  %v332_v5 = vld [vmem:[#allocation2 + $0x58] sm:$0xff] }
  0x71   : > { %2070 = vmatpush1.bf16.msra.mxu0 %v2069_v6  ;;  %v325_v6 = vld [vmem:[#allocation2 + $0x20] sm:$0xff]  ;;  %v2155_v7 = vpack.c.bf16 %v332_v5, %v326_v4  ;;  %v344_v10 = vld [vmem:[#allocation2 + $0xb8] sm:$0xff]  ;;  %v343_v14 = vld [vmem:[#allocation2 + $0xb0] sm:$0xff] }
  0x72   : > { %2134 = vmatpush1.bf16.msra.mxu1 %v2133_v8  ;;  %2072 = vmatprep.subr.bf16.mxu0 %v2071_v9  ;;  %v331_v8 = vld [vmem:[#allocation2 + $0x50] sm:$0xff]  ;;  %v338_v9 = vld [vmem:[#allocation2 + $0x88] sm:$0xff]  ;;  %v356_v17 = vld [vmem:[#allocation2 + $0x118] sm:$0xff] }
  0x73   : > { %2136 = vmatprep.subr.bf16.mxu1 %v2135_v13  ;;  %v2157_v11 = vpack.c.bf16 %v331_v8, %v325_v6  ;;  %v2159_v12 = vpack.c.bf16 %v344_v10, %v338_v9  ;;  %v337_v13 = vld [vmem:[#allocation2 + $0x80] sm:$0xff]  ;;  %v350_v15 = vld [vmem:[#allocation2 + $0xe8] sm:$0xff]  ;;  %v368_v22 = vld [vmem:[#allocation2 + $0x178] sm:$0xff] }
  0x74   : > { %v2161_v18 = vpack.c.bf16 %v343_v14, %v337_v13  ;;  %v367_v26 = vld [vmem:[#allocation2 + $0x170] sm:$0xff]  ;;  %v374_v27 = vld [vmem:[#allocation2 + $0x1a8] sm:$0xff]  ;;  %v380_v28 = vld [vmem:[#allocation2 + $0x1d8] sm:$0xff] }
  0x75   : > { %2074 = vmatpush1.bf16.msra.mxu0 %v2073_v19  ;;  %v2163_v19 = vpack.c.bf16 %v356_v17, %v350_v15  ;;  %v2171_v30 = vpack.c.bf16 %v380_v28, %v374_v27  ;;  %v392_v34 = vld [vmem:[#allocation2 + $0x238] sm:$0xff]  ;;  %v391_v38 = vld [vmem:[#allocation2 + $0x230] sm:$0xff]  ;;  %v398_v39 = vld [vmem:[#allocation2 + $0x268] sm:$0xff] }
  0x76   : > { %2138 = vmatpush1.bf16.msra.mxu1 %v2137_v20  ;;  %2076 = vmatprep.subr.bf16.mxu0 %v2075_v21  ;;  %v349_v20 = vld [vmem:[#allocation2 + $0xe0] sm:$0xff]  ;;  %v362_v21 = vld [vmem:[#allocation2 + $0x148] sm:$0xff]  ;;  %v404_v40 = vld [vmem:[#allocation2 + $0x298] sm:$0xff] }
  0x77   : > { %2140 = vmatprep.subr.bf16.mxu1 %v2139_v25  ;;  %v2167_v24 = vpack.c.bf16 %v368_v22, %v362_v21  ;;  %v361_v25 = vld [vmem:[#allocation2 + $0x140] sm:$0xff]  ;;  %v2179_v42 = vpack.c.bf16 %v404_v40, %v398_v39  ;;  %v416_v46 = vld [vmem:[#allocation2 + $0x2f8] sm:$0xff]  ;;  %v415_v50 = vld [vmem:[#allocation2 + $0x2f0] sm:$0xff]  ;;  %v515_v39 = vlaneseq }
  0x78   : > { %v2169_v29 = vpack.c.bf16 %v367_v26, %v361_v25  ;;  %v422_v51 = vld [vmem:[#allocation2 + $0x328] sm:$0xff]  ;;  %v428_v52 = vld [vmem:[#allocation2 + $0x358] sm:$0xff]  ;;  %v433_v61 = vld [vmem:[#allocation2 + $0x380] sm:$0xff] }
  0x79   : > { %2078 = vmatpush1.bf16.msra.mxu0 %v2077_v31  ;;  %v373_v31 = vld [vmem:[#allocation2 + $0x1a0] sm:$0xff]  ;;  %v2187_v54 = vpack.c.bf16 %v428_v52, %v422_v51  ;;  %v440_v58 = vld [vmem:[#allocation2 + $0x3b8] sm:$0xff]  ;;  %v439_v62 = vld [vmem:[#allocation2 + $0x3b0] sm:$0xff]  ;;  %v2668_v40 = vshrl.u32 %v515_v39, 7 }
  0x7a   : > { %2142 = vmatpush1.bf16.msra.mxu1 %v2141_v32  ;;  %2080 = vmatprep.subr.bf16.mxu0 %v2079_v33  ;;  %v379_v32 = vld [vmem:[#allocation2 + $0x1d0] sm:$0xff]  ;;  %v386_v33 = vld [vmem:[#allocation2 + $0x208] sm:$0xff]  ;;  %v2193_v4 = vpack.c.bf16 %v439_v62, %v433_v61  ;;  %v445_v6 = vld [vmem:[#allocation2 + $0x3e0] sm:$0xff] }
  0x7b   : > { %2144 = vmatprep.subr.bf16.mxu1 %v2143_v37  ;;  %v2173_v35 = vpack.c.bf16 %v379_v32, %v373_v31  ;;  %v2175_v36 = vpack.c.bf16 %v392_v34, %v386_v33  ;;  %v385_v37 = vld [vmem:[#allocation2 + $0x200] sm:$0xff]  ;;  %v458_v8 = vld [vmem:[#allocation2 + $0x448] sm:$0xff]  ;;  %v464_v9 = vld [vmem:[#allocation2 + $0x478] sm:$0xff]  ;;  %v2686_v51 = vsub.s32 1, %v2668_v40 }
  0x7c   : > { %v2177_v41 = vpack.c.bf16 %v391_v38, %v385_v37  ;;  %v463_v13 = vld [vmem:[#allocation2 + $0x470] sm:$0xff]  ;;  %v470_v14 = vld [vmem:[#allocation2 + $0x4a8] sm:$0xff]  ;;  %v476_v15 = vld [vmem:[#allocation2 + $0x4d8] sm:$0xff] }
  0x7d   : > { %2082 = vmatpush1.bf16.msra.mxu0 %v2081_v43  ;;  %v397_v43 = vld [vmem:[#allocation2 + $0x260] sm:$0xff]  ;;  %v488_v21 = vld [vmem:[#allocation2 + $0x538] sm:$0xff]  ;;  %v487_v25 = vld [vmem:[#allocation2 + $0x530] sm:$0xff] }
  0x7e   : > { %2146 = vmatpush1.bf16.msra.mxu1 %v2145_v44  ;;  %2084 = vmatprep.subr.bf16.mxu0 %v2083_v45  ;;  %v403_v44 = vld [vmem:[#allocation2 + $0x290] sm:$0xff]  ;;  %v410_v45 = vld [vmem:[#allocation2 + $0x2c8] sm:$0xff]  ;;  %v500_v27 = vld [vmem:[#allocation2 + $0x598] sm:$0xff] }
  0x7f   : > { %2148 = vmatprep.subr.bf16.mxu1 %v2147_v49  ;;  %v2181_v47 = vpack.c.bf16 %v403_v44, %v397_v43  ;;  %v2183_v48 = vpack.c.bf16 %v416_v46, %v410_v45  ;;  %v409_v49 = vld [vmem:[#allocation2 + $0x2c0] sm:$0xff]  ;;  %v494_v26 = vld [vmem:[#allocation2 + $0x568] sm:$0xff]  ;;  %v499_v31 = vld [vmem:[#allocation2 + $0x590] sm:$0xff]  ;;  %v525_v43 = vsub.s32 2, %v2668_v40  ;;  %v529_v44 = vsub.s32 3, %v2668_v40 }
  0x80   : > { %v2185_v53 = vpack.c.bf16 %v415_v50, %v409_v49  ;;  %v506_v32 = vld [vmem:[#allocation2 + $0x5c8] sm:$0xff]  ;;  %v512_v33 = vld [vmem:[#allocation2 + $0x5f8] sm:$0xff]  ;;  %v511_v37 = vld [vmem:[#allocation2 + $0x5f0] sm:$0xff] }
  0x81   : > { %2086 = vmatpush1.bf16.msra.mxu0 %v2085_v55  ;;  %v421_v55 = vld [vmem:[#allocation2 + $0x320] sm:$0xff]  ;;  %vm2691_vm1 = vmpackc.low %vm776_vm0, %vm776_vm0 }
  0x82   : > { %2150 = vmatpush1.bf16.msra.mxu1 %v2149_v56  ;;  %2088 = vmatprep.subr.bf16.mxu0 %v2087_v57  ;;  %v427_v56 = vld [vmem:[#allocation2 + $0x350] sm:$0xff]  ;;  %v434_v57 = vld [vmem:[#allocation2 + $0x388] sm:$0xff] }
  0x83   : > { %2152 = vmatprep.subr.bf16.mxu1 %v2151_v60  ;;  %v2189_v59 = vpack.c.bf16 %v427_v56, %v421_v55  ;;  %v2191_v60 = vpack.c.bf16 %v440_v58, %v434_v57 }
  0x85   : > { %2090 = vmatpush1.bf16.msra.mxu0 %v2089_v63  ;;  %v446_v63 = vld [vmem:[#allocation2 + $0x3e8] sm:$0xff] }
  0x86   : > { %2154 = vmatpush1.bf16.msra.mxu1 %v2153_v0  ;;  %2156 = vmatprep.subr.bf16.mxu0 %v2155_v7  ;;  %v452_v0 = vld [vmem:[#allocation2 + $0x418] sm:$0xff]  ;;  %v451_v7 = vld [vmem:[#allocation2 + $0x410] sm:$0xff] }
  0x87   : > { %v2195_v5 = vpack.c.bf16 %v452_v0, %v446_v63  ;;  %v2197_v10 = vpack.c.bf16 %v451_v7, %v445_v6 }
  0x88   : > { %610 = vmatmul.mubr.f32.vlgmr.msra.gmra.mrb[0].mxu0 %v2650_v1 }
  0x89   : > { %687 = vmatmul.mubr.f32.vlgmr.msra.gmra.mrb[0].mxu1 %v2650_v1  ;;  %615 = vmatprep.mubr.f32.mxu0 %v2653_v2 }
  0x8a   : > { %692 = vmatprep.mubr.f32.mxu1 %v2653_v2  ;;  %2158 = vmatpush1.bf16.msra.mxu0 %v2157_v11  ;;  %v2199_v11 = vpack.c.bf16 %v464_v9, %v458_v8 }
  0x8b   : > { %2160 = vmatprep.subr.bf16.mxu0 %v2159_v12  ;;  %v457_v12 = vld [vmem:[#allocation2 + $0x440] sm:$0xff] }
  0x8c   : > { %616 = vmatmul.mubr.f32.gmra.mrb[2].mxu0 %v2659_v3  ;;  %v2201_v17 = vpack.c.bf16 %v463_v13, %v457_v12 }
  0x8d   : > { %693 = vmatmul.mubr.f32.gmra.mrb[2].mxu1 %v2659_v3  ;;  %763 = vmatprep.mubr.f32.mxu0 %v2645_v16  ;;  %v355_v16 = vld [vmem:[#allocation2 + $0x110] sm:$0xff] }
  0x8e   : > { %2162 = vmatpush1.bf16.msra.mxu0 %v2161_v18  ;;  %v2165_v23 = vpack.c.bf16 %v355_v16, %v349_v20  ;;  %v2203_v18 = vpack.c.bf16 %v476_v15, %v470_v14  ;;  %v475_v20 = vld [vmem:[#allocation2 + $0x4d0] sm:$0xff]  ;;  %v482_v16 = vld [vmem:[#allocation2 + $0x508] sm:$0xff] }
  0x8f   : > { %2164 = vmatprep.subr.bf16.mxu0 %v2163_v19  ;;  %v469_v19 = vld [vmem:[#allocation2 + $0x4a0] sm:$0xff] }
  0x90   : > { %v2205_v22 = vpack.c.bf16 %v475_v20, %v469_v19  ;;  %v533_v20 = vsub.s32 4, %v2668_v40 }
  0x92   : > { %2166 = vmatpush1.bf16.msra.mxu0 %v2165_v23  ;;  %v2207_v23 = vpack.c.bf16 %v488_v21, %v482_v16  ;;  %v537_v16 = vsub.s32 5, %v2668_v40 }
  0x93   : > { %2168 = vmatprep.subr.bf16.mxu0 %v2167_v24  ;;  %v481_v24 = vld [vmem:[#allocation2 + $0x500] sm:$0xff] }
  0x94   : > { %v2209_v28 = vpack.c.bf16 %v487_v25, %v481_v24 }
  0x96   : > { %2170 = vmatpush1.bf16.msra.mxu0 %v2169_v29  ;;  %v2211_v29 = vpack.c.bf16 %v500_v27, %v494_v26 }
  0x97   : > { %2172 = vmatprep.subr.bf16.mxu0 %v2171_v30  ;;  %v493_v30 = vld [vmem:[#allocation2 + $0x560] sm:$0xff] }
  0x98   : > { %v2213_v34 = vpack.c.bf16 %v499_v31, %v493_v30 }
  0x9a   : > { %2174 = vmatpush1.bf16.msra.mxu0 %v2173_v35  ;;  %v2215_v35 = vpack.c.bf16 %v512_v33, %v506_v32 }
  0x9b   : > { %2176 = vmatprep.subr.bf16.mxu0 %v2175_v36  ;;  %v505_v36 = vld [vmem:[#allocation2 + $0x5c0] sm:$0xff] }
  0x9c   : > { %v2217_v38 = vpack.c.bf16 %v511_v37, %v505_v36 }
  0x9e   : > { %2178 = vmatpush1.bf16.msra.mxu0 %v2177_v41  ;;  %v2671_v41 = vsub.s32 0, %v2668_v40 }
  0x9f   : > { %2180 = vmatprep.subr.bf16.mxu0 %v2179_v42  ;;  %v2676_v42 = vld [vmem:[%s2800_s2] sm:$0x3f] }
  0xa0   : > { %v530_v49 = vrot.slane %v2676_v42, %v529_v44  ;;  %v522_v63 = vrot.slane %v2676_v42, %v2686_v51  ;;  %v534_v21 = vrot.slane %v2676_v42, %v533_v20 }
  0xa2   : > { %2182 = vmatpush1.bf16.msra.mxu0 %v2181_v47  ;;  %v526_v47 = vrot.slane %v2676_v42, %v525_v43 }
  0xa3   : > { %2184 = vmatprep.subr.bf16.mxu0 %v2183_v48 }
  0xa6   : > { %2186 = vmatpush1.bf16.msra.mxu0 %v2185_v53 }
  0xa7   : > { %2188 = vmatprep.subr.bf16.mxu0 %v2187_v54 }
  0xaa   : > { %2190 = vmatpush1.bf16.msra.mxu0 %v2189_v59 }
  0xab   : > { %2192 = vmatprep.subr.bf16.mxu0 %v2191_v60 }
  0xae   : > { %2194 = vmatpush1.bf16.msra.mxu0 %v2193_v4 }
  0xaf   : > { %2196 = vmatprep.subr.bf16.mxu0 %v2195_v5 }
  0xb2   : > { %2198 = vmatpush1.bf16.msra.mxu0 %v2197_v10 }
  0xb3   : > { %2200 = vmatprep.subr.bf16.mxu0 %v2199_v11 }
  0xb6   : > { %2202 = vmatpush1.bf16.msra.mxu0 %v2201_v17 }
  0xb7   : > { %2204 = vmatprep.subr.bf16.mxu0 %v2203_v18 }
  0xba   : > { %2206 = vmatpush1.bf16.msra.mxu0 %v2205_v22 }
  0xbb   : > { %2208 = vmatprep.subr.bf16.mxu0 %v2207_v23  ;;  %v538_v23 = vrot.slane %v2676_v42, %v537_v16 }
  0xbe   : > { %2210 = vmatpush1.bf16.msra.mxu0 %v2209_v28 }
  0xbf   : > { %2212 = vmatprep.subr.bf16.mxu0 %v2211_v29 }
  0xc2   : > { %2214 = vmatpush1.bf16.msra.mxu0 %v2213_v34 }
  0xc3   : > { %2216 = vmatprep.subr.bf16.mxu0 %v2215_v35 }
  0xc6   : > { %2218 = vmatpush1.bf16.msra.mxu0 %v2217_v38 }
  0xc9   : > { %764 = vmatmul.mubr.f32.vlgmr.msra.gmra.mrb[4].mxu0 %v2650_v1  ;;  %v518_v1 = vrot.slane %v2676_v42, %v2671_v41 }
  0xca   : > { %769 = vmatprep.mubr.f32.mxu0 %v2653_v2 }
  0xcd   : > { %770 = vmatmul.mubr.f32.gmra.mrb[6].mxu0 %v2659_v3 }
 0x15b   : > { %v611_v2 = vpop.f32.mrb[0].mxu0 }
 0x15c   : > { %v688_v3 = vpop.f32.mrb[0].mxu1  ;;  %v612_v45 = vadd.f32 %v611_v2, %v518_v1  ;;  %v613_v46 = vpop.f32.mrb[1].mxu0 }
 0x15d   : > { %v690_v48 = vpop.f32.mrb[1].mxu1  ;;  %v689_v55 = vadd.f32 %v688_v3, %v526_v47  ;;  %v614_v6 = vadd.f32 %v613_v46, %v522_v63 }
 0x15e   : > { %1975 = vmatprep.mubr.msk.f32.mxu1 %vm776_vm0, %v612_v45  ;;  %v691_v58 = vadd.f32 %v690_v48, %v530_v49 }
 0x15f   : > { %v617_v50 = vpop.f32.mrb[2].mxu0 }
 0x160   : > { %v618_v52 = vadd.f32 %v617_v50, %v518_v1  ;;  %v694_v53 = vpop.f32.mrb[2].mxu1  ;;  %v619_v54 = vpop.f32.mrb[3].mxu0 }
 0x161   : > { %v695_v56 = vadd.f32 %v694_v53, %v526_v47  ;;  %v696_v57 = vpop.f32.mrb[3].mxu1  ;;  %v620_v5 = vadd.f32 %v619_v54, %v522_v63 }
 0x162   : > { %v697_v59 = vadd.f32 %v696_v57, %v530_v49  ;;  %972 = vrot.lane.b32.xlu1 %v618_v52, %s2505_s19 }
 0x163   : > { %v2219_v61 = vpack.c.bf16 %v695_v56, %v689_v55  ;;  %v2357_v62 = vpack.i.bf16 %v695_v56, %v689_v55 }
 0x164   : > { %v2362_v0 = vpack.i.bf16 %v697_v59, %v691_v58  ;;  %v2239_v4 = vpack.c.bf16 %v697_v59, %v691_v58 }
 0x165   : > { %2358 = vrot.lane.b32.xlu0 %v2357_v62, %s2505_s19  ;;  %2221 = vmatprep.subr.msk.bf16.mxu1 %vm2691_vm1, %v2219_v61 }
 0x166   : > { %2224 = vmatpush3.bf16.xpose.msk.msra.mxu1 %vm2691_vm1, %v2219_v61  ;;  %2363 = vrot.lane.b32.xlu1 %v2362_v0, %s2505_s19 }
 0x169   : > { %970 = vrot.lane.b32.xlu0 %v612_v45, %s2505_s19 }
 0x16a   : > { %1368 = vrot.lane.b32.xlu1 %v620_v5, %s2505_s19 }
 0x16d   : > { %1366 = vrot.lane.b32.xlu0 %v614_v6, %s2505_s19  ;;  %1976 = vmatmul.mubr.msk.f32.vlgmr.msra.gmra.mrb[4].mxu1 %vm776_vm0, %v618_v52 }
 0x19c   : > { %v765_v22 = vpop.f32.mrb[4].mxu0 }
 0x19d   : > { %v767_v24 = vpop.f32.mrb[5].mxu0  ;;  %v766_v25 = vadd.f32 %v765_v22, %v534_v21 }
 0x19e   : > { %v768_v26 = vadd.f32 %v767_v24, %v538_v23 }
 0x1a0   : > { %v771_v27 = vpop.f32.mrb[6].mxu0 }
 0x1a1   : > { %v772_v28 = vadd.f32 %v771_v27, %v534_v21  ;;  %v773_v29 = vpop.f32.mrb[7].mxu0 }
 0x1a2   : > { %v774_v30 = vadd.f32 %v773_v29, %v538_v23 }
 0x1a3   : > { %v2367_v31 = vpack.i.bf16 %v772_v28, %v766_v25  ;;  %v2225_v32 = vpack.c.bf16 %v772_v28, %v766_v25 }
 0x1a4   : > { %v2372_v33 = vpack.i.bf16 %v774_v30, %v768_v26  ;;  %v2729_v34 = vpack.c.bf16 %v774_v30, %v768_v26 }
 0x1a5   : > { %2226 = vmatprep.subr.bf16.mxu1 %v2225_v32 }
 0x1a6   : > { %2228 = vmatpush3.bf16.msra.mxu1 %v2225_v32 }
 0x1d4   : > { %v973_v7 = vpop.permute.xlu1 %972 }
 0x1d7   : > { %v2359_v8 = vpop.permute.xlu0 %2358 }
 0x1d8   : > { %v2361_v9 = vunpack.i.h.bf16 %v2359_v8  ;;  %v2360_v10 = vunpack.i.l.bf16 %v2359_v8  ;;  %v2364_v13 = vpop.permute.xlu1 %2363 }
 0x1d9   : > { %v2366_v14 = vunpack.i.h.bf16 %v2364_v13  ;;  %v2365_v15 = vunpack.i.l.bf16 %v2364_v13 }
 0x1da   : > { %v2229_v11 = vpack.c.bf16 %v2361_v9, %v2360_v10 }
 0x1db   : > { %v971_v12 = vpop.permute.xlu0 %970  ;;  %v2249_v17 = vpack.c.bf16 %v2366_v14, %v2365_v15 }
 0x1dc   : > { %2231 = vmatprep.subr.msk.bf16.mxu0 %vm2691_vm1, %v2229_v11  ;;  %1989 = vmatprep.mubr.msk.f32.mxu0 %vm776_vm0, %v971_v12  ;;  %v1369_v19 = vpop.permute.xlu1 %1368 }
 0x1dd   : > { %2234 = vmatpush3.bf16.xpose.msk.msra.mxu0 %vm2691_vm1, %v2229_v11 }
 0x1de   : > { %2241 = vmatprep.subr.msk.bf16.mxu0 %vm2691_vm1, %v2239_v4 }
 0x1df   : > { %v1367_v18 = vpop.permute.xlu0 %1366 }
 0x1e4   : > { %1990 = vmatmul.mubr.msk.f32.vlgmr.msra.gmra.mrb[8].mxu0 %vm776_vm0, %v973_v7 }
 0x1e5   : > { %2244 = vmatpush3.bf16.xpose.msk.msra.mxu0 %vm2691_vm1, %v2239_v4  ;;  %2003 = vmatprep.mubr.msk.f32.mxu0 %vm776_vm0, %v614_v6 }
 0x1e6   : > { %2251 = vmatprep.subr.msk.bf16.mxu0 %vm2691_vm1, %v2249_v17 }
 0x1ec   : > { %2004 = vmatmul.mubr.msk.f32.vlgmr.msra.gmra.mrb[10].mxu0 %vm776_vm0, %v620_v5 }
 0x1ed   : > { %2254 = vmatpush3.bf16.xpose.msk.msra.mxu0 %vm2691_vm1, %v2249_v17  ;;  %2017 = vmatprep.mubr.msk.f32.mxu0 %vm776_vm0, %v1367_v18 }
 0x1f4   : > { %2018 = vmatmul.mubr.msk.f32.vlgmr.msra.gmra.mrb[12].mxu0 %vm776_vm0, %v1369_v19 }
 0x240   : > { %v1977_v35 = vpop.f32.mrb[4].mxu1 }
 0x241   : > { %v865_v36 = vmul.f32 0.125, %v1977_v35  ;;  %v855_v37 = vpop.f32.mrb[5].mxu1 }
 0x242   : > { %v864_v38 = vmul.f32 0.125, %v855_v37 }
 0x243   : > { %v870_v39 = vsel %vm866_vm2, %v865_v36, -inf }
 0x244   : > { %871 = vmax.xlane.f32.xlu1 %v870_v39  ;;  %v867_v40 = vsel %vm866_vm2, %v864_v38, -inf }
 0x245   : > { %868 = vmax.xlane.f32.xlu0 %v867_v40 }
 0x2b7   : > { %v1991_v42 = vpop.f32.mrb[8].mxu0 }
 0x2b8   : > { %v1062_v43 = vmul.f32 0.125, %v1991_v42  ;;  %v1052_v44 = vpop.f32.mrb[9].mxu0 }
 0x2b9   : > { %v1061_v1 = vmul.f32 0.125, %v1052_v44 }
 0x2ba   : > { %v1066_v2 = vsel %vm866_vm2, %v1062_v43, -inf }
 0x2bb   : > { %1067 = vmax.xlane.f32.xlu0 %v1066_v2  ;;  %v1063_v3 = vsel %vm866_vm2, %v1061_v1, -inf }
 0x2bf   : > { %v2005_v45 = vpop.f32.mrb[10].mxu0  ;;  %1064 = vmax.xlane.f32.xlu0 %v1063_v3 }
 0x2c0   : > { %v1262_v46 = vmul.f32 0.125, %v2005_v45  ;;  %v1252_v47 = vpop.f32.mrb[11].mxu0  ;;  %v1591_v45 = vld [vmem:[#allocation4 + $0x8] sm:$0xff] }
 0x2c1   : > { %v1261_v48 = vmul.f32 0.125, %v1252_v47  ;;  %v1590_v47 = vld [vmem:[#allocation4] sm:$0xff] }
 0x2c2   : > { %v1266_v49 = vsel %vm866_vm2, %v1262_v46, -inf }
 0x2c3   : > { %1267 = vmax.xlane.f32.xlu0 %v1266_v49  ;;  %v1263_v50 = vsel %vm866_vm2, %v1261_v48, -inf  ;;  %v1592_v49 = vld [vmem:[#allocation4 + $0x10] sm:$0xff] }
 0x2c4   : > { %1264 = vmax.xlane.f32.xlu1 %v1263_v50  ;;  %v1595_v50 = vld [vmem:[#allocation4 + $0x28] sm:$0xff] }
 0x2c7   : > { %v2019_v52 = vpop.f32.mrb[12].mxu0 }
 0x2c8   : > { %v1458_v53 = vmul.f32 0.125, %v2019_v52  ;;  %v1448_v54 = vpop.f32.mrb[13].mxu0  ;;  %v1597_v52 = vld [vmem:[#allocation4 + $0x38] sm:$0xff] }
 0x2c9   : > { %v1457_v55 = vmul.f32 0.125, %v1448_v54  ;;  %v2263_v54 = vpack.c.bf16 %v1597_v52, %v1595_v50  ;;  %v1635_v50 = vld [vmem:[#allocation4 + $0x168] sm:$0xff]  ;;  %v1637_v52 = vld [vmem:[#allocation4 + $0x178] sm:$0xff] }
 0x2ca   : > { %v1462_v56 = vsel %vm866_vm2, %v1458_v53, -inf }
 0x2cb   : > { %1463 = vmax.xlane.f32.xlu0 %v1462_v56  ;;  %v1459_v57 = vsel %vm866_vm2, %v1457_v55, -inf  ;;  %v1596_v56 = vld [vmem:[#allocation4 + $0x30] sm:$0xff] }
 0x2cc   : > { %1460 = vmax.xlane.f32.xlu1 %v1459_v57  ;;  %v1599_v57 = vld [vmem:[#allocation4 + $0x48] sm:$0xff] }
 0x2d1   : > { %v872_v58 = vpop.xlane.xlu1 %871 }
 0x2d2   : > { %v874_v59 = vsub.f32 %v865_v36, %v872_v58  ;;  %v869_v60 = vpop.xlane.xlu0 %868  ;;  %v1601_v58 = vld [vmem:[#allocation4 + $0x58] sm:$0xff] }
 0x2d3   : > { %v873_v61 = vsub.f32 %v864_v38, %v869_v60  ;;  %v2267_v60 = vpack.c.bf16 %v1601_v58, %v1599_v57  ;;  %v1639_v57 = vld [vmem:[#allocation4 + $0x188] sm:$0xff]  ;;  %v1641_v58 = vld [vmem:[#allocation4 + $0x198] sm:$0xff] }
 0x2d4   : > { %v877_v62 = vmul.f32 1.442695, %v874_v59 }
 0x2d5   : > { %v875_v63 = vmul.f32 1.442695, %v873_v61  ;;  %v1598_v61 = vld [vmem:[#allocation4 + $0x40] sm:$0xff] }
 0x2d7   : > { %2387 = vpow2.f32 %v875_v63  ;;  %v1603_v63 = vld [vmem:[#allocation4 + $0x68] sm:$0xff] }
 0x2d8   : > { %2389 = vpow2.f32 %v877_v62  ;;  %v1600_v62 = vld [vmem:[#allocation4 + $0x50] sm:$0xff] }
 0x2dd   : > { %2368 = vrot.lane.b32.xlu1 %v2367_v31, %s2505_s19 }
 0x2e1   : > { %v2388_v0 = vpop.eup %2387  ;;  %2373 = vrot.lane.b32.xlu0 %v2372_v33, %s2505_s19 }
 0x2e2   : > { %v2390_v4 = vpop.eup %2389  ;;  %1982 = vmatprep.mubr.msk.f32.mxu1 %vm866_vm2, %v2388_v0  ;;  %v879_v35 = vsel %vm866_vm2, %v2388_v0, 0.0  ;;  %v1605_v0 = vld [vmem:[#allocation4 + $0x78] sm:$0xff] }
 0x2e3   : > { %1983 = vmatmul.mubr.msk.f32.vlgmr.msra.gmra.mrb[6].mxu1 %vm866_vm2, %v2390_v4  ;;  %v882_v39 = vsel %vm866_vm2, %v2390_v4, 0.0  ;;  %v2269_v4 = vpack.c.bf16 %v1600_v62, %v1598_v61  ;;  %v1638_v61 = vld [vmem:[#allocation4 + $0x180] sm:$0xff]  ;;  %v1640_v62 = vld [vmem:[#allocation4 + $0x190] sm:$0xff] }
 0x348   : > { %v1068_v5 = vpop.xlane.xlu0 %1067 }
 0x349   : > { %v1070_v6 = vsub.f32 %v1062_v43, %v1068_v5  ;;  %v2271_v5 = vpack.c.bf16 %v1605_v0, %v1603_v63  ;;  %v1643_v63 = vld [vmem:[#allocation4 + $0x1a8] sm:$0xff]  ;;  %v1645_v0 = vld [vmem:[#allocation4 + $0x1b8] sm:$0xff] }
 0x34b   : > { %v1073_v9 = vmul.f32 1.442695, %v1070_v6  ;;  %v1602_v6 = vld [vmem:[#allocation4 + $0x60] sm:$0xff] }
 0x34c   : > { %v1065_v7 = vpop.xlane.xlu0 %1064 }
 0x34d   : > { %v1069_v8 = vsub.f32 %v1061_v1, %v1065_v7  ;;  %v1604_v7 = vld [vmem:[#allocation4 + $0x70] sm:$0xff] }
 0x34f   : > { %v1071_v10 = vmul.f32 1.442695, %v1069_v8  ;;  %v1607_v8 = vld [vmem:[#allocation4 + $0x88] sm:$0xff] }
 0x350   : > { %v1268_v12 = vpop.xlane.xlu0 %1267 }
 0x351   : > { %2391 = vpow2.f32 %v1071_v10  ;;  %v1265_v11 = vpop.xlane.xlu1 %1264  ;;  %v1270_v14 = vsub.f32 %v1262_v46, %v1268_v12  ;;  %v1593_v46 = vld [vmem:[#allocation4 + $0x18] sm:$0xff]  ;;  %v2273_v10 = vpack.c.bf16 %v1604_v7, %v1602_v6  ;;  %v1606_v12 = vld [vmem:[#allocation4 + $0x80] sm:$0xff]  ;;  %v1644_v7 = vld [vmem:[#allocation4 + $0x1b0] sm:$0xff] }
 0x352   : > { %2393 = vpow2.f32 %v1073_v9  ;;  %v1269_v13 = vsub.f32 %v1261_v48, %v1265_v11  ;;  %v2259_v48 = vpack.c.bf16 %v1593_v46, %v1591_v45  ;;  %v1609_v9 = vld [vmem:[#allocation4 + $0x98] sm:$0xff]  ;;  %v1642_v6 = vld [vmem:[#allocation4 + $0x1a0] sm:$0xff] }
 0x353   : > { %v1273_v21 = vmul.f32 1.442695, %v1270_v14  ;;  %v2275_v11 = vpack.c.bf16 %v1609_v9, %v1607_v8  ;;  %v1611_v14 = vld [vmem:[#allocation4 + $0xa8] sm:$0xff]  ;;  %v1633_v45 = vld [vmem:[#allocation4 + $0x158] sm:$0xff] }
 0x354   : > { %v1271_v15 = vmul.f32 1.442695, %v1269_v13  ;;  %v1608_v13 = vld [vmem:[#allocation4 + $0x90] sm:$0xff]  ;;  %v1647_v8 = vld [vmem:[#allocation4 + $0x1c8] sm:$0xff]  ;;  %v1649_v9 = vld [vmem:[#allocation4 + $0x1d8] sm:$0xff] }
 0x356   : > { %2395 = vpow2.f32 %v1271_v15  ;;  %v1613_v15 = vld [vmem:[#allocation4 + $0xb8] sm:$0xff] }
 0x358   : > { %v1464_v17 = vpop.xlane.xlu0 %1463 }
 0x359   : > { %v1466_v18 = vsub.f32 %v1458_v53, %v1464_v17  ;;  %v1461_v19 = vpop.xlane.xlu1 %1460  ;;  %v2261_v53 = vpack.c.bf16 %v1592_v49, %v1590_v47  ;;  %v2277_v17 = vpack.c.bf16 %v1608_v13, %v1606_v12  ;;  %v1632_v49 = vld [vmem:[#allocation4 + $0x150] sm:$0xff]  ;;  %v1646_v12 = vld [vmem:[#allocation4 + $0x1c0] sm:$0xff] }
 0x35a   : > { %v1465_v20 = vsub.f32 %v1457_v55, %v1461_v19  ;;  %v1594_v55 = vld [vmem:[#allocation4 + $0x20] sm:$0xff]  ;;  %v1648_v13 = vld [vmem:[#allocation4 + $0x1d0] sm:$0xff] }
 0x35b   : > { %v2392_v16 = vpop.eup %2391  ;;  %v1469_v22 = vmul.f32 1.442695, %v1466_v18  ;;  %v2265_v59 = vpack.c.bf16 %v1596_v56, %v1594_v55  ;;  %v2279_v18 = vpack.c.bf16 %v1613_v15, %v1611_v14  ;;  %v1610_v19 = vld [vmem:[#allocation4 + $0xa0] sm:$0xff]  ;;  %v1636_v56 = vld [vmem:[#allocation4 + $0x170] sm:$0xff]  ;;  %v2317_v14 = vpack.c.bf16 %v1648_v13, %v1646_v12 }
 0x35c   : > { %v1467_v23 = vmul.f32 1.442695, %v1465_v20  ;;  %1996 = vmatprep.mubr.msk.f32.mxu1 %vm866_vm2, %v2392_v16  ;;  %v1075_v24 = vsel %vm866_vm2, %v2392_v16, 0.0  ;;  %v2394_v25 = vpop.eup %2393  ;;  %v2374_v29 = vpop.permute.xlu0 %2373  ;;  %v1612_v20 = vld [vmem:[#allocation4 + $0xb0] sm:$0xff]  ;;  %v1615_v16 = vld [vmem:[#allocation4 + $0xc8] sm:$0xff]  ;;  %v1634_v55 = vld [vmem:[#allocation4 + $0x160] sm:$0xff] }
 0x35d   : > { %v2369_v26 = vpop.permute.xlu1 %2368  ;;  %1076 = vadd.xlane.f32.xlu0 %v1075_v24  ;;  %v1078_v31 = vsel %vm866_vm2, %v2394_v25, 0.0  ;;  %v2376_v32 = vunpack.i.h.bf16 %v2374_v29  ;;  %v2375_v33 = vunpack.i.l.bf16 %v2374_v29  ;;  %v1614_v24 = vld [vmem:[#allocation4 + $0xc0] sm:$0xff] }
 0x35e   : > { %2397 = vpow2.f32 %v1467_v23  ;;  %v2371_v27 = vunpack.i.h.bf16 %v2369_v26  ;;  %v2370_v28 = vunpack.i.l.bf16 %v2369_v26  ;;  %v1619_v26 = vld [vmem:[#allocation4 + $0xe8] sm:$0xff] }
 0x35f   : > { %2399 = vpow2.f32 %v1273_v21  ;;  %v2255_v37 = vpack.c.bf16 %v2376_v32, %v2375_v33  ;;  %v1617_v21 = vld [vmem:[#allocation4 + $0xd8] sm:$0xff]  ;;  %v1623_v32 = vld [vmem:[#allocation4 + $0x108] sm:$0xff] }
 0x360   : > { %2401 = vpow2.f32 %v1469_v22  ;;  %v2235_v30 = vpack.c.bf16 %v2371_v27, %v2370_v28  ;;  %v2396_v36 = vpop.eup %2395  ;;  %v2281_v22 = vpack.c.bf16 %v1612_v20, %v1610_v19  ;;  %v2283_v23 = vpack.c.bf16 %v1617_v21, %v1615_v16  ;;  %v1621_v27 = vld [vmem:[#allocation4 + $0xf8] sm:$0xff]  ;;  %v1651_v20 = vld [vmem:[#allocation4 + $0x1e8] sm:$0xff] }
 0x361   : > { %1079 = vadd.xlane.f32.xlu0 %v1078_v31  ;;  %v2287_v29 = vpack.c.bf16 %v1621_v27, %v1619_v26  ;;  %v1620_v31 = vld [vmem:[#allocation4 + $0xf0] sm:$0xff]  ;;  %v1625_v33 = vld [vmem:[#allocation4 + $0x118] sm:$0xff] }
 0x362   : > { %2236 = vmatprep.subr.bf16.mxu1 %v2235_v30  ;;  %v1653_v16 = vld [vmem:[#allocation4 + $0x1f8] sm:$0xff] }
 0x363   : > { %2238 = vmatpush3.bf16.msra.mxu1 %v2235_v30  ;;  %v1618_v30 = vld [vmem:[#allocation4 + $0xe0] sm:$0xff]  ;;  %v2319_v21 = vpack.c.bf16 %v1653_v16, %v1651_v20  ;;  %v2426_v20 = vld [vmem:[%s2642_s9 + $0x18] sm:$0xff] }
 0x364   : > { %2246 = vmatprep.subr.bf16.mxu1 %v2729_v34 }
 0x365   : > { %880 = vadd.xlane.f32.xlu0 %v879_v35  ;;  %v2289_v35 = vpack.c.bf16 %v1620_v31, %v1618_v30 }
 0x366   : > { %1997 = vmatmul.mubr.msk.f32.vlgmr.msra.gmra.mrb[8].mxu1 %vm866_vm2, %v2394_v25  ;;  %v1616_v25 = vld [vmem:[#allocation4 + $0xd0] sm:$0xff] }
 0x367   : > { %2248 = vmatpush3.bf16.msra.mxu1 %v2729_v34  ;;  %2010 = vmatprep.mubr.msk.f32.mxu1 %vm866_vm2, %v2396_v36  ;;  %v1275_v34 = vsel %vm866_vm2, %v2396_v36, 0.0  ;;  %v2285_v28 = vpack.c.bf16 %v1616_v25, %v1614_v24  ;;  %v2291_v36 = vpack.c.bf16 %v1625_v33, %v1623_v32 }
 0x368   : > { %v2398_v38 = vpop.eup %2397  ;;  %2256 = vmatprep.subr.bf16.mxu1 %v2255_v37 }
 0x369   : > { %v2400_v40 = vpop.eup %2399  ;;  %883 = vadd.xlane.f32.xlu0 %v882_v39  ;;  %v1471_v42 = vsel %vm866_vm2, %v2398_v38, 0.0  ;;  %v1627_v39 = vld [vmem:[#allocation4 + $0x128] sm:$0xff] }
 0x36a   : > { %v2402_v43 = vpop.eup %2401  ;;  %1472 = vadd.xlane.f32.xlu1 %v1471_v42  ;;  %2011 = vmatmul.mubr.msk.f32.vlgmr.msra.gmra.mrb[10].mxu1 %vm866_vm2, %v2400_v40  ;;  %v1278_v1 = vsel %vm866_vm2, %v2400_v40, 0.0  ;;  %v1629_v40 = vld [vmem:[#allocation4 + $0x138] sm:$0xff] }
 0x36b   : > { %2258 = vmatpush3.bf16.msra.mxu1 %v2255_v37  ;;  %2024 = vmatprep.mubr.msk.f32.mxu1 %vm866_vm2, %v2398_v38  ;;  %v1474_v44 = vsel %vm866_vm2, %v2402_v43, 0.0  ;;  %v1622_v37 = vld [vmem:[#allocation4 + $0x100] sm:$0xff]  ;;  %v1624_v38 = vld [vmem:[#allocation4 + $0x110] sm:$0xff] }
 0x36c   : > { %2260 = vmatprep.subr.bf16.mxu1 %v2259_v48  ;;  %v2293_v42 = vpack.c.bf16 %v1624_v38, %v1622_v37  ;;  %v1630_v48 = vld [vmem:[#allocation4 + $0x140] sm:$0xff] }
 0x36e   : > { %1475 = vadd.xlane.f32.xlu1 %v1474_v44  ;;  %2025 = vmatmul.mubr.msk.f32.vlgmr.msra.gmra.mrb[12].mxu1 %vm866_vm2, %v2402_v43  ;;  %v2295_v43 = vpack.c.bf16 %v1629_v40, %v1627_v39  ;;  %v1626_v44 = vld [vmem:[#allocation4 + $0x120] sm:$0xff] }
 0x36f   : > { %2262 = vmatpush1.bf16.msra.mxu1 %v2261_v53  ;;  %v2301_v53 = vpack.c.bf16 %v1632_v49, %v1630_v48 }
 0x370   : > { %2264 = vmatprep.subr.bf16.mxu1 %v2263_v54  ;;  %v2303_v54 = vpack.c.bf16 %v1637_v52, %v1635_v50 }
 0x372   : > { %1276 = vadd.xlane.f32.xlu1 %v1275_v34  ;;  %v1628_v34 = vld [vmem:[#allocation4 + $0x130] sm:$0xff] }
 0x373   : > { %2266 = vmatpush1.bf16.msra.mxu1 %v2265_v59  ;;  %v2297_v46 = vpack.c.bf16 %v1628_v34, %v1626_v44  ;;  %v2305_v59 = vpack.c.bf16 %v1636_v56, %v1634_v55 }
 0x374   : > { %2268 = vmatprep.subr.bf16.mxu1 %v2267_v60  ;;  %v2307_v60 = vpack.c.bf16 %v1641_v58, %v1639_v57 }
 0x376   : > { %1279 = vadd.xlane.f32.xlu1 %v1278_v1  ;;  %v1631_v1 = vld [vmem:[#allocation4 + $0x148] sm:$0xff] }
 0x377   : > { %2270 = vmatpush1.bf16.msra.mxu1 %v2269_v4  ;;  %v2299_v47 = vpack.c.bf16 %v1633_v45, %v1631_v1  ;;  %v2309_v4 = vpack.c.bf16 %v1640_v62, %v1638_v61 }
 0x378   : > { %2272 = vmatprep.subr.bf16.mxu1 %v2271_v5  ;;  %v2311_v5 = vpack.c.bf16 %v1645_v0, %v1643_v63  ;;  %v1654_v63 = vld [vmem:[%s2802_s4] sm:$0x3] }
 0x379   : > { %v1659_v0 = vrot.slane %v1654_v63, %v2671_v41 }
 0x37b   : > { %2274 = vmatpush1.bf16.msra.mxu1 %v2273_v10  ;;  %v2313_v10 = vpack.c.bf16 %v1644_v7, %v1642_v6 }
 0x37c   : > { %2276 = vmatprep.subr.bf16.mxu1 %v2275_v11  ;;  %v2315_v11 = vpack.c.bf16 %v1649_v9, %v1647_v8  ;;  %v2423_v9 = vld [vmem:[%s2642_s9] sm:$0xff] }
 0x37f   : > { %2278 = vmatpush1.bf16.msra.mxu1 %v2277_v17 }
 0x380   : > { %2280 = vmatprep.subr.bf16.mxu1 %v2279_v18 }
 0x383   : > { %2282 = vmatpush1.bf16.msra.mxu1 %v2281_v22  ;;  %v1650_v22 = vld [vmem:[#allocation4 + $0x1e0] sm:$0xff] }
 0x384   : > { %2284 = vmatprep.subr.bf16.mxu1 %v2283_v23  ;;  %v1652_v23 = vld [vmem:[#allocation4 + $0x1f0] sm:$0xff] }
 0x385   : > { %v2321_v25 = vpack.c.bf16 %v1652_v23, %v1650_v22 }
 0x387   : > { %2286 = vmatpush1.bf16.msra.mxu1 %v2285_v28 }
 0x388   : > { %2288 = vmatprep.subr.bf16.mxu1 %v2287_v29 }
 0x38b   : > { %2290 = vmatpush1.bf16.msra.mxu1 %v2289_v35 }
 0x38c   : > { %2292 = vmatprep.subr.bf16.mxu1 %v2291_v36 }
 0x38f   : > { %2294 = vmatpush1.bf16.msra.mxu1 %v2293_v42 }
 0x390   : > { %2296 = vmatprep.subr.bf16.mxu1 %v2295_v43 }
 0x393   : > { %2298 = vmatpush1.bf16.msra.mxu1 %v2297_v46 }
 0x394   : > { %2300 = vmatprep.subr.bf16.mxu1 %v2299_v47 }
 0x397   : > { %2302 = vmatpush1.bf16.msra.mxu1 %v2301_v53 }
 0x398   : > { %2304 = vmatprep.subr.bf16.mxu1 %v2303_v54 }
 0x39b   : > { %2306 = vmatpush1.bf16.msra.mxu1 %v2305_v59 }
 0x39c   : > { %2308 = vmatprep.subr.bf16.mxu1 %v2307_v60 }
 0x39f   : > { %2310 = vmatpush1.bf16.msra.mxu1 %v2309_v4  ;;  %v1663_v4 = vrot.slane %v1654_v63, %v2686_v51 }
 0x3a0   : > { %2312 = vmatprep.subr.bf16.mxu1 %v2311_v5 }
 0x3a3   : > { %2314 = vmatpush1.bf16.msra.mxu1 %v2313_v10 }
 0x3a4   : > { %2316 = vmatprep.subr.bf16.mxu1 %v2315_v11 }
 0x3a7   : > { %2318 = vmatpush1.bf16.msra.mxu1 %v2317_v14 }
 0x3a8   : > { %2320 = vmatprep.subr.bf16.mxu1 %v2319_v21 }
 0x3ab   : > { %2322 = vmatpush1.bf16.msra.mxu1 %v2321_v25 }
 0x3b6   : > { %v2759_v2 = vpop.f32.mrb[6].mxu1 }
 0x3b7   : > { %v2761_v3 = vpop.f32.mrb[7].mxu1 }
 0x3ea   : > { %v1077_v15 = vpop.xlane.xlu0 %1076 }
 0x3eb   : > { %2403 = vrcp.f32 %v1077_v15 }
 0x3ee   : > { %v1080_v18 = vpop.xlane.xlu0 %1079 }
 0x3ef   : > { %2405 = vrcp.f32 %v1080_v18  ;;  %v2425_v18 = vld [vmem:[%s2642_s9 + $0x10] sm:$0xff] }
 0x3f2   : > { %v881_v44 = vpop.xlane.xlu0 %880 }
 0x3f5   : > { %v2404_v29 = vpop.eup %2403 }
 0x3f6   : > { %v884_v1 = vpop.xlane.xlu0 %883 }
 0x3f7   : > { %v1473_v17 = vpop.xlane.xlu1 %1472 }
 0x3f9   : > { %v2406_v30 = vpop.eup %2405 }
 0x3fb   : > { %v1476_v19 = vpop.xlane.xlu1 %1475 }
 0x3fc   : > { %2407 = vrcp.f32 %v1476_v19 }
 0x3fd   : > { %2409 = vrcp.f32 %v1473_v17 }
 0x3fe   : > { %2411 = vrcp.f32 %v881_v44  ;;  %v1747_v44 = vld [vmem:[%s2803_s5] sm:$0x3] }
 0x3ff   : > { %v1277_v43 = vpop.xlane.xlu1 %1276 }
 0x400   : > { %2413 = vrcp.f32 %v1277_v43 }
 0x403   : > { %v1280_v34 = vpop.xlane.xlu1 %1279 }
 0x404   : > { %2415 = vrcp.f32 %v1280_v34  ;;  %v1748_v34 = vld [vmem:[%s2804_s6] sm:$0x3] }
 0x405   : > { %2417 = vrcp.f32 %v884_v1  ;;  %v1786_v1 = vrot.slane %v1747_v44, %v2671_v41 }
 0x406   : > { %v2408_v31 = vpop.eup %2407 }
 0x407   : > { %v2410_v33 = vpop.eup %2409 }
 0x408   : > { %v2412_v45 = vpop.eup %2411 }
 0x409   : > { %v967_v49 = vmul.f32 %v2412_v45, %v2761_v3  ;;  %v1790_v45 = vrot.slane %v1747_v44, %v2686_v51 }
 0x40a   : > { %v2414_v47 = vpop.eup %2413 }
 0x40e   : > { %v2416_v55 = vpop.eup %2415 }
 0x40f   : > { %v2418_v56 = vpop.eup %2417 }
 0x410   : > { %v969_v3 = vmul.f32 %v2418_v56, %v2759_v2  ;;  %v2424_v2 = vld [vmem:[%s2642_s9 + $0x8] sm:$0xff] }
 0x439   : > { %v1998_v24 = vpop.f32.mrb[8].mxu1 }
 0x43a   : > { %v1161_v26 = vpop.f32.mrb[9].mxu1  ;;  %v1173_v35 = vmul.f32 %v2406_v30, %v1998_v24 }
 0x43b   : > { %v1171_v38 = vmul.f32 %v2404_v29, %v1161_v26 }
 0x43d   : > { %v2012_v27 = vpop.f32.mrb[10].mxu1 }
 0x43e   : > { %v1353_v28 = vpop.f32.mrb[11].mxu1  ;;  %v1365_v57 = vmul.f32 %v2416_v55, %v2012_v27 }
 0x43f   : > { %v1363_v50 = vmul.f32 %v2414_v47, %v1353_v28  ;;  %v1801_v47 = vrot.slane %v1748_v34, %v2671_v41 }
 0x441   : > { %v2026_v32 = vpop.f32.mrb[12].mxu1 }
 0x442   : > { %v1569_v36 = vmul.f32 %v2408_v31, %v2026_v32  ;;  %v1557_v37 = vpop.f32.mrb[13].mxu1 }
 0x443   : > { %v1567_v39 = vmul.f32 %v2410_v33, %v1557_v37 }
 0x444   : > { %v2382_v40 = vpack.i.bf16 %v1173_v35, %v1569_v36 }
 0x445   : > { %v2377_v42 = vpack.i.bf16 %v1171_v38, %v1567_v39 }
 0x446   : > { %2383 = vrot.lane.b32.xlu0 %v2382_v40, %s2505_s19 }
 0x447   : > { %2378 = vrot.lane.b32.xlu1 %v2377_v42, %s2505_s19 }
 0x4b8   : > { %v2384_v46 = vpop.permute.xlu0 %2383 }
 0x4b9   : > { %v2379_v48 = vpop.permute.xlu1 %2378  ;;  %v2385_v52 = vunpack.i.l.bf16 %v2384_v46  ;;  %v2386_v60 = vunpack.i.h.bf16 %v2384_v46 }
 0x4ba   : > { %v2381_v53 = vunpack.i.h.bf16 %v2379_v48  ;;  %v2380_v54 = vunpack.i.l.bf16 %v2379_v48  ;;  %v1805_v48 = vrot.slane %v1748_v34, %v2686_v51 }
 0x4bb   : > { %v1589_v61 = vsel %vm776_vm0, %v1365_v57, %v2385_v52  ;;  %v1587_v62 = vsel %vm776_vm0, %v969_v3, %v2386_v60 }
 0x4bc   : > { %v1588_v58 = vsel %vm776_vm0, %v1363_v50, %v2380_v54  ;;  %v1586_v59 = vsel %vm776_vm0, %v967_v49, %v2381_v53 }
 0x4bd   : > { %1730 = vmatprep.mubr.f32.mxu1 %v1588_v58 }
 0x4be   : > { %1731 = vmatmul.mubr.f32.vlgmr.msra.gmra.mrb[14].mxu1 %v1586_v59 }
 0x4bf   : > { %1736 = vmatprep.mubr.f32.mxu1 %v1589_v61 }
 0x4c2   : > { %1737 = vmatmul.mubr.f32.gmra.mrb[16].mxu1 %v1587_v62 }
 0x591   : > { %v1732_v5 = vpop.f32.mrb[14].mxu1 }
 0x592   : > { %v1733_v6 = vadd.f32 %v1732_v5, %v1659_v0  ;;  %v1734_v7 = vpop.f32.mrb[15].mxu1 }
 0x593   : > { %v1735_v8 = vadd.f32 %v1734_v7, %v1663_v4 }
 0x594   : > { %v1743_v10 = vadd.f32 %v2423_v9, %v1733_v6 }
 0x595   : > { %v1744_v11 = vadd.f32 %v2424_v2, %v1735_v8  ;;  %v1738_v12 = vpop.f32.mrb[16].mxu1 }
 0x596   : > { %v1739_v13 = vadd.f32 %v1738_v12, %v1659_v0  ;;  %v1740_v14 = vpop.f32.mrb[17].mxu1 }
 0x597   : > { %v1741_v15 = vadd.f32 %v1740_v14, %v1663_v4  ;;  %v1749_v17 = vadd.f32 %v1744_v11, %v1743_v10 }
 0x598   : > { %v1745_v19 = vadd.f32 %v2425_v18, %v1739_v13 }
 0x599   : > { %v1746_v16 = vadd.f32 %v2426_v20, %v1741_v15  ;;  %1750 = vadd.xlane.f32.xlu1 %v1749_v17 }
 0x59b   : > { %v1752_v21 = vadd.f32 %v1746_v16, %v1745_v19 }
 0x59d   : > { %1753 = vadd.xlane.f32.xlu0 %v1752_v21 }
 0x626   : > { %v1751_v22 = vpop.xlane.xlu1 %1750 }
 0x627   : > { %v1756_v23 = vmul.f32 0.00390625, %v1751_v22 }
 0x629   : > { %v1758_v24 = vsub.f32 %v1743_v10, %v1756_v23  ;;  %v1759_v25 = vsub.f32 %v1744_v11, %v1756_v23 }
 0x62a   : > { %v1754_v26 = vpop.xlane.xlu0 %1753 }
 0x62b   : > { %v1757_v27 = vmul.f32 0.00390625, %v1754_v26  ;;  %v1762_v28 = vmul.f32 %v1758_v24, %v1758_v24  ;;  %v1763_v29 = vmul.f32 %v1759_v25, %v1759_v25 }
 0x62d   : > { %v1760_v30 = vsub.f32 %v1745_v19, %v1757_v27  ;;  %v1761_v31 = vsub.f32 %v1746_v16, %v1757_v27  ;;  %v1766_v32 = vadd.f32 %v1763_v29, %v1762_v28 }
 0x62f   : > { %1767 = vadd.xlane.f32.xlu1 %v1766_v32  ;;  %v1764_v33 = vmul.f32 %v1760_v30, %v1760_v30  ;;  %v1765_v35 = vmul.f32 %v1761_v31, %v1761_v31 }
 0x631   : > { %v1769_v36 = vadd.f32 %v1765_v35, %v1764_v33 }
 0x633   : > { %1770 = vadd.xlane.f32.xlu0 %v1769_v36 }
 0x6bc   : > { %v1768_v37 = vpop.xlane.xlu1 %1767 }
 0x6bd   : > { %v1772_v38 = vmul.f32 0.00390625, %v1768_v37 }
 0x6bf   : > { %v1774_v39 = vadd.f32 1e-05, %v1772_v38 }
 0x6c0   : > { %v1771_v40 = vpop.xlane.xlu0 %1770 }
 0x6c1   : > { %2419 = vrsqrt.f32 %v1774_v39  ;;  %v1773_v42 = vmul.f32 0.00390625, %v1771_v40 }
 0x6c3   : > { %v1775_v43 = vadd.f32 1e-05, %v1773_v42 }
 0x6c5   : > { %2421 = vrsqrt.f32 %v1775_v43 }
 0x6cb   : > { %v2420_v46 = vpop.eup %2419 }
 0x6cc   : > { %v1778_v49 = vmul.f32 %v2420_v46, %v1758_v24  ;;  %v1779_v50 = vmul.f32 %v2420_v46, %v1759_v25 }
 0x6ce   : > { %v1793_v52 = vmul.f32 %v1786_v1, %v1778_v49  ;;  %v1794_v53 = vmul.f32 %v1790_v45, %v1779_v50 }
 0x6cf   : > { %v2422_v54 = vpop.eup %2421 }
 0x6d0   : > { %v1808_v55 = vadd.f32 %v1801_v47, %v1793_v52  ;;  %v1809_v56 = vadd.f32 %v1805_v48, %v1794_v53  ;;  %v1780_v57 = vmul.f32 %v2422_v54, %v1760_v30  ;;  %v1781_v58 = vmul.f32 %v2422_v54, %v1761_v31 }
 0x6d2   : > { %1812 = vst [vmem:[%s315_s12] sm:$0xff] %v1808_v55  ;;  %1813 = vst [vmem:[%s315_s12 + $0x8] sm:$0xff] %v1809_v56  ;;  %v1795_v59 = vmul.f32 %v1786_v1, %v1780_v57  ;;  %v1796_v41 = vmul.f32 %v1790_v45, %v1781_v58 }
 0x6d4   : > { %v1810_v60 = vadd.f32 %v1801_v47, %v1795_v59  ;;  %v1811_v51 = vadd.f32 %v1805_v48, %v1796_v41 }
 0x6d6   : > { %1814 = vst [vmem:[%s315_s12 + $0x10] sm:$0xff] %v1810_v60  ;;  %1815 = vst [vmem:[%s315_s12 + $0x18] sm:$0xff] %v1811_v51 }
 0x6d7 PF: > { %s19_s24 = sadd.s32 1, %s2497_s24  }
 0x6d8   : > { %p16_p2 = scmp.ge.s32.totalorder %s19_s24, 4  }
 0x6da   :  { %18 = sbr.rel (!%p16_p2) target bundleno = 2 (0x2), region = 87 }
 0x6e1   :  { %1840 = vsyncpa [#allocation3], 1 }
 0x6e2   :  { %1842 = vsyncpa [#allocation3 + $0x1], 1 }
 0x6e3   :  { %1843 = vsyncpa [#allocation5], 1 }

// kernel: transformer_forward.9
= control target key start
LH: loop header
LB: loop body
LE: loop exit
PB: predicated region body
PF: predicated region fallthrough
CT: control target
= control target key end

     0   :  { %s935_s24 = smov 0   ;;  %s1389_s0 = inlined_call_operand.vmem [shape: f32[32,256], index: 0, kind: input, shape index: {}]   ;;  %s1390_s1 = inlined_call_operand.vmem [shape: f32[256,256], index: 1, kind: input, shape index: {}]   ;;  %s1391_s2 = inlined_call_operand.vmem [shape: f32[1,256], index: 2, kind: input, shape index: {}]   ;;  %s1392_s3 = inlined_call_operand.vmem [shape: f32[256,256], index: 3, kind: input, shape index: {}]   ;;  %s1393_s4 = inlined_call_operand.vmem [shape: f32[1,256], index: 4, kind: input, shape index: {}]   ;;  %s1394_s5 = inlined_call_operand.vmem [shape: f32[1,256], index: 5, kind: input, shape index: {}]   ;;  %s1395_s6 = inlined_call_operand.vmem [shape: f32[1,256], index: 6, kind: input, shape index: {}]   ;;  %s1396_s7 = inlined_call_operand.vmem [shape: f32[32,256], index: 7, kind: output, shape index: {}]  }
   0x1 LB: > { %s732_s25 = sadd.s32 4294967295, %s893_s24   ;;  %p736_p0 = scmp.ge.s32.totalorder %s893_s24, 1  ;;  %s893_s24 = sphi %s935_s24, %s17_s24  }
   0x2   : > { %p239_p1 = scmp.lt.s32.totalorder %s893_s24, 3 }
   0x4   : > { %p240_p2 = pnand %p736_p0, %p239_p1 }
   0x5   : > { %v292_v0 = vld [vmem:[%s1390_s1 + $0x8] sm:$0xff] (!%p240_p2)  ;;  %v294_v1 = vld [vmem:[%s1390_s1 + $0x18] sm:$0xff] (!%p240_p2)  ;;  %v291_v2 = vld [vmem:[%s1390_s1] sm:$0xff] (!%p240_p2)  ;;  %s737_s23 = sshll.u32 (!%p240_p2), %s732_s25, 1 }
   0x6   : > { %243 = sbr.rel (%p240_p2) target bundleno = 827 (0x33b), region = 48  ;;  %v747_v3 = vpack.c.bf16 (!%p240_p2), %v294_v1, %v292_v0  ;;  %v293_v4 = vld [vmem:[%s1390_s1 + $0x10] sm:$0xff] (!%p240_p2)  ;;  %v296_v5 = vld [vmem:[%s1390_s1 + $0x28] sm:$0xff] (!%p240_p2)  ;;  %v298_v6 = vld [vmem:[%s1390_s1 + $0x38] sm:$0xff] (!%p240_p2)  ;;  %p274_p3 = scmp.lt.s32.totalorder (!%p240_p2), %s737_s23, 3 }
   0x7   : > { %v749_v7 = vpack.c.bf16 (!%p240_p2), %v293_v4, %v291_v2  ;;  %v751_v8 = vpack.c.bf16 (!%p240_p2), %v298_v6, %v296_v5  ;;  %v295_v9 = vld [vmem:[%s1390_s1 + $0x20] sm:$0xff] (!%p240_p2)  ;;  %v297_v10 = vld [vmem:[%s1390_s1 + $0x30] sm:$0xff] (!%p240_p2)  ;;  %v300_v11 = vld [vmem:[%s1390_s1 + $0x48] sm:$0xff] (!%p240_p2) }
   0x8   : > { %748 = vmatprep.subr.bf16.mxu0 (!%p240_p2), %v747_v3  ;;  %v302_v12 = vld [vmem:[%s1390_s1 + $0x58] sm:$0xff] (!%p240_p2)  ;;  %v753_v13 = vpack.c.bf16 (!%p240_p2), %v297_v10, %v295_v9  ;;  %v299_v15 = vld [vmem:[%s1390_s1 + $0x40] sm:$0xff] (!%p240_p2)  ;;  %v301_v16 = vld [vmem:[%s1390_s1 + $0x50] sm:$0xff] (!%p240_p2) }
   0x9   : > { %750 = vmatpush1.bf16.msra.mxu0 (!%p240_p2), %v749_v7  ;;  %v755_v14 = vpack.c.bf16 (!%p240_p2), %v302_v12, %v300_v11  ;;  %v304_v17 = vld [vmem:[%s1390_s1 + $0x68] sm:$0xff] (!%p240_p2)  ;;  %v306_v18 = vld [vmem:[%s1390_s1 + $0x78] sm:$0xff] (!%p240_p2)  ;;  %v757_v19 = vpack.c.bf16 (!%p240_p2), %v301_v16, %v299_v15  ;;  %v303_v21 = vld [vmem:[%s1390_s1 + $0x60] sm:$0xff] (!%p240_p2) }
   0xa   : > { %752 = vmatprep.subr.bf16.mxu0 (!%p240_p2), %v751_v8  ;;  %v759_v20 = vpack.c.bf16 (!%p240_p2), %v306_v18, %v304_v17  ;;  %v305_v22 = vld [vmem:[%s1390_s1 + $0x70] sm:$0xff] (!%p240_p2)  ;;  %v308_v23 = vld [vmem:[%s1390_s1 + $0x88] sm:$0xff] (!%p240_p2)  ;;  %v310_v24 = vld [vmem:[%s1390_s1 + $0x98] sm:$0xff] (!%p240_p2) }
   0xb   : > { %v761_v25 = vpack.c.bf16 (!%p240_p2), %v305_v22, %v303_v21  ;;  %v763_v26 = vpack.c.bf16 (!%p240_p2), %v310_v24, %v308_v23  ;;  %v307_v27 = vld [vmem:[%s1390_s1 + $0x80] sm:$0xff] (!%p240_p2)  ;;  %v309_v28 = vld [vmem:[%s1390_s1 + $0x90] sm:$0xff] (!%p240_p2)  ;;  %v312_v29 = vld [vmem:[%s1390_s1 + $0xa8] sm:$0xff] (!%p240_p2) }
   0xc   : > { %v314_v30 = vld [vmem:[%s1390_s1 + $0xb8] sm:$0xff] (!%p240_p2)  ;;  %v765_v31 = vpack.c.bf16 (!%p240_p2), %v309_v28, %v307_v27  ;;  %v311_v33 = vld [vmem:[%s1390_s1 + $0xa0] sm:$0xff] (!%p240_p2)  ;;  %v313_v34 = vld [vmem:[%s1390_s1 + $0xb0] sm:$0xff] (!%p240_p2) }
   0xd   : > { %754 = vmatpush1.bf16.msra.mxu0 %v753_v13  ;;  %s1398_s23 = smov (!%p274_p3, %s737_s23), 3  ;;  %v767_v32 = vpack.c.bf16 %v314_v30, %v312_v29  ;;  %v316_v35 = vld [vmem:[%s1390_s1 + $0xc8] sm:$0xff]  ;;  %v318_v36 = vld [vmem:[%s1390_s1 + $0xd8] sm:$0xff]  ;;  %v769_v37 = vpack.c.bf16 %v313_v34, %v311_v33  ;;  %v315_v39 = vld [vmem:[%s1390_s1 + $0xc0] sm:$0xff] }
   0xe   : > { %756 = vmatprep.subr.bf16.mxu0 %v755_v14  ;;  %s745_s29 = sshll.u32 %s1398_s23, 4  ;;  %v771_v38 = vpack.c.bf16 %v318_v36, %v316_v35  ;;  %v317_v40 = vld [vmem:[%s1390_s1 + $0xd0] sm:$0xff]  ;;  %v320_v42 = vld [vmem:[%s1390_s1 + $0xe8] sm:$0xff]  ;;  %v322_v43 = vld [vmem:[%s1390_s1 + $0xf8] sm:$0xff] }
   0xf   : > { %s1029_s16 = scalar_lea.vmem %s1389_s0, %s745_s29  ;;  %v449_v44 = vld [vmem:[%s1392_s3 + $0x8] sm:$0xff]  ;;  %v319_v45 = vld [vmem:[%s1390_s1 + $0xe0] sm:$0xff]  ;;  %v321_v46 = vld [vmem:[%s1390_s1 + $0xf0] sm:$0xff]  ;;  %v773_v50 = vpack.c.bf16 %v317_v40, %v315_v39  ;;  %v775_v56 = vpack.c.bf16 %v322_v43, %v320_v42  ;;  %s285_s20 = scalar_lea.vmem %s1396_s7, %s745_s29 }
  0x10   : > { %v1038_v41 = vld [vmem:[%s1029_s16 + $0x8] sm:$0xff]  ;;  %v451_v47 = vld [vmem:[%s1392_s3 + $0x18] sm:$0xff]  ;;  %v448_v48 = vld [vmem:[%s1392_s3] sm:$0xff]  ;;  %v777_v0 = vpack.c.bf16 %v321_v46, %v319_v45 }
  0x11   : > { %758 = vmatpush1.bf16.msra.mxu0 %v757_v19  ;;  %431 = vmatprep.mubr.f32.mxu0 %v1038_v41  ;;  %v450_v49 = vld [vmem:[%s1392_s3 + $0x10] sm:$0xff]  ;;  %v811_v51 = vpack.c.bf16 %v451_v47, %v449_v44  ;;  %v453_v53 = vld [vmem:[%s1392_s3 + $0x28] sm:$0xff]  ;;  %v455_v54 = vld [vmem:[%s1392_s3 + $0x38] sm:$0xff] }
  0x12   : > { %760 = vmatprep.subr.bf16.mxu0 %v759_v20  ;;  %v813_v52 = vpack.c.bf16 %v450_v49, %v448_v48  ;;  %v452_v55 = vld [vmem:[%s1392_s3 + $0x20] sm:$0xff]  ;;  %v815_v57 = vpack.c.bf16 %v455_v54, %v453_v53  ;;  %v454_v58 = vld [vmem:[%s1392_s3 + $0x30] sm:$0xff]  ;;  %v457_v59 = vld [vmem:[%s1392_s3 + $0x48] sm:$0xff] }
  0x13   : > { %v459_v60 = vld [vmem:[%s1392_s3 + $0x58] sm:$0xff]  ;;  %v324_v61 = vld [vmem:[%s1390_s1 + $0x108] sm:$0xff]  ;;  %812 = vmatprep.subr.bf16.mxu1 %v811_v51  ;;  %v817_v63 = vpack.c.bf16 %v454_v58, %v452_v55  ;;  %v323_v1 = vld [vmem:[%s1390_s1 + $0x100] sm:$0xff] }
  0x14   : > { %v326_v62 = vld [vmem:[%s1390_s1 + $0x118] sm:$0xff]  ;;  %814 = vmatpush1.bf16.msra.mxu1 %v813_v52  ;;  %v819_v2 = vpack.c.bf16 %v459_v60, %v457_v59  ;;  %v456_v3 = vld [vmem:[%s1392_s3 + $0x40] sm:$0xff]  ;;  %v458_v4 = vld [vmem:[%s1392_s3 + $0x50] sm:$0xff] }
  0x15   : > { %762 = vmatpush1.bf16.msra.mxu0 %v761_v25  ;;  %816 = vmatprep.subr.bf16.mxu1 %v815_v57  ;;  %v779_v5 = vpack.c.bf16 %v326_v62, %v324_v61  ;;  %v325_v6 = vld [vmem:[%s1390_s1 + $0x110] sm:$0xff]  ;;  %v461_v7 = vld [vmem:[%s1392_s3 + $0x68] sm:$0xff]  ;;  %v463_v8 = vld [vmem:[%s1392_s3 + $0x78] sm:$0xff]  ;;  %v821_v11 = vpack.c.bf16 %v458_v4, %v456_v3 }
  0x16   : > { %764 = vmatprep.subr.bf16.mxu0 %v763_v26  ;;  %v328_v9 = vld [vmem:[%s1390_s1 + $0x128] sm:$0xff]  ;;  %v330_v10 = vld [vmem:[%s1390_s1 + $0x138] sm:$0xff]  ;;  %v781_v12 = vpack.c.bf16 %v325_v6, %v323_v1  ;;  %v327_v13 = vld [vmem:[%s1390_s1 + $0x120] sm:$0xff]  ;;  %v823_v14 = vpack.c.bf16 %v463_v8, %v461_v7 }
  0x17   : > { %v460_v15 = vld [vmem:[%s1392_s3 + $0x60] sm:$0xff]  ;;  %v462_v16 = vld [vmem:[%s1392_s3 + $0x70] sm:$0xff]  ;;  %v783_v17 = vpack.c.bf16 %v330_v10, %v328_v9  ;;  %v465_v19 = vld [vmem:[%s1392_s3 + $0x88] sm:$0xff] }
  0x18   : > { %818 = vmatpush1.bf16.msra.mxu1 %v817_v63  ;;  %v329_v18 = vld [vmem:[%s1390_s1 + $0x130] sm:$0xff]  ;;  %v467_v20 = vld [vmem:[%s1392_s3 + $0x98] sm:$0xff]  ;;  %v332_v21 = vld [vmem:[%s1390_s1 + $0x148] sm:$0xff]  ;;  %v825_v23 = vpack.c.bf16 %v462_v16, %v460_v15 }
  0x19   : > { %766 = vmatpush1.bf16.msra.mxu0 %v765_v31  ;;  %820 = vmatprep.subr.bf16.mxu1 %v819_v2  ;;  %v334_v22 = vld [vmem:[%s1390_s1 + $0x158] sm:$0xff]  ;;  %v785_v24 = vpack.c.bf16 %v329_v18, %v327_v13  ;;  %v331_v25 = vld [vmem:[%s1390_s1 + $0x140] sm:$0xff]  ;;  %v827_v26 = vpack.c.bf16 %v467_v20, %v465_v19  ;;  %v466_v28 = vld [vmem:[%s1392_s3 + $0x90] sm:$0xff] }
  0x1a   : > { %768 = vmatprep.subr.bf16.mxu0 %v767_v32  ;;  %v464_v27 = vld [vmem:[%s1392_s3 + $0x80] sm:$0xff]  ;;  %v787_v29 = vpack.c.bf16 %v334_v22, %v332_v21  ;;  %v333_v30 = vld [vmem:[%s1390_s1 + $0x150] sm:$0xff]  ;;  %v469_v31 = vld [vmem:[%s1392_s3 + $0xa8] sm:$0xff] }
  0x1b   : > { %v471_v32 = vld [vmem:[%s1392_s3 + $0xb8] sm:$0xff]  ;;  %v336_v33 = vld [vmem:[%s1390_s1 + $0x168] sm:$0xff]  ;;  %v829_v35 = vpack.c.bf16 %v466_v28, %v464_v27  ;;  %v789_v36 = vpack.c.bf16 %v333_v30, %v331_v25  ;;  %v468_v39 = vld [vmem:[%s1392_s3 + $0xa0] sm:$0xff] }
  0x1c   : > { %822 = vmatpush1.bf16.msra.mxu1 %v821_v11  ;;  %v338_v34 = vld [vmem:[%s1390_s1 + $0x178] sm:$0xff]  ;;  %v470_v40 = vld [vmem:[%s1392_s3 + $0xb0] sm:$0xff]  ;;  %v473_v44 = vld [vmem:[%s1392_s3 + $0xc8] sm:$0xff] }
  0x1d   : > { %770 = vmatpush1.bf16.msra.mxu0 %v769_v37  ;;  %824 = vmatprep.subr.bf16.mxu1 %v823_v14  ;;  %v335_v37 = vld [vmem:[%s1390_s1 + $0x160] sm:$0xff]  ;;  %v791_v42 = vpack.c.bf16 %v338_v34, %v336_v33  ;;  %v337_v43 = vld [vmem:[%s1390_s1 + $0x170] sm:$0xff]  ;;  %v475_v45 = vld [vmem:[%s1392_s3 + $0xd8] sm:$0xff]  ;;  %v833_v48 = vpack.c.bf16 %v470_v40, %v468_v39 }
  0x1e   : > { %772 = vmatprep.subr.bf16.mxu0 %v771_v38  ;;  %v831_v38 = vpack.c.bf16 %v471_v32, %v469_v31  ;;  %v340_v46 = vld [vmem:[%s1390_s1 + $0x188] sm:$0xff]  ;;  %v342_v47 = vld [vmem:[%s1390_s1 + $0x198] sm:$0xff]  ;;  %v793_v49 = vpack.c.bf16 %v337_v43, %v335_v37  ;;  %v835_v51 = vpack.c.bf16 %v475_v45, %v473_v44  ;;  %v472_v52 = vld [vmem:[%s1392_s3 + $0xc0] sm:$0xff] }
  0x1f   : > { %v474_v53 = vld [vmem:[%s1392_s3 + $0xd0] sm:$0xff]  ;;  %v795_v54 = vpack.c.bf16 %v342_v47, %v340_v46  ;;  %v479_v57 = vld [vmem:[%s1392_s3 + $0xf8] sm:$0xff]  ;;  %v344_v58 = vld [vmem:[%s1390_s1 + $0x1a8] sm:$0xff] }
  0x20   : > { %826 = vmatpush1.bf16.msra.mxu1 %v825_v23  ;;  %v341_v55 = vld [vmem:[%s1390_s1 + $0x190] sm:$0xff]  ;;  %v346_v59 = vld [vmem:[%s1390_s1 + $0x1b8] sm:$0xff]  ;;  %v837_v60 = vpack.c.bf16 %v474_v53, %v472_v52  ;;  %v343_v62 = vld [vmem:[%s1390_s1 + $0x1a0] sm:$0xff] }
  0x21   : > { %774 = vmatpush1.bf16.msra.mxu0 %v773_v50  ;;  %828 = vmatprep.subr.bf16.mxu1 %v827_v26  ;;  %v339_v50 = vld [vmem:[%s1390_s1 + $0x180] sm:$0xff]  ;;  %v478_v1 = vld [vmem:[%s1392_s3 + $0xf0] sm:$0xff]  ;;  %v799_v2 = vpack.c.bf16 %v346_v59, %v344_v58  ;;  %v481_v4 = vld [vmem:[%s1392_s3 + $0x108] sm:$0xff] }
  0x22   : > { %776 = vmatprep.subr.bf16.mxu0 %v775_v56  ;;  %v477_v56 = vld [vmem:[%s1392_s3 + $0xe8] sm:$0xff]  ;;  %v797_v61 = vpack.c.bf16 %v341_v55, %v339_v50  ;;  %v345_v3 = vld [vmem:[%s1390_s1 + $0x1b0] sm:$0xff]  ;;  %v350_v7 = vld [vmem:[%s1390_s1 + $0x1d8] sm:$0xff] }
  0x23   : > { %v839_v63 = vpack.c.bf16 %v479_v57, %v477_v56  ;;  %v348_v6 = vld [vmem:[%s1390_s1 + $0x1c8] sm:$0xff]  ;;  %v801_v9 = vpack.c.bf16 %v345_v3, %v343_v62  ;;  %v347_v10 = vld [vmem:[%s1390_s1 + $0x1c0] sm:$0xff]  ;;  %v482_v13 = vld [vmem:[%s1392_s3 + $0x110] sm:$0xff] }
  0x24   : > { %830 = vmatpush1.bf16.msra.mxu1 %v829_v35  ;;  %v803_v14 = vpack.c.bf16 %v350_v7, %v348_v6  ;;  %v349_v15 = vld [vmem:[%s1390_s1 + $0x1d0] sm:$0xff]  ;;  %v485_v16 = vld [vmem:[%s1392_s3 + $0x128] sm:$0xff]  ;;  %v354_v19 = vld [vmem:[%s1390_s1 + $0x1f8] sm:$0xff]  ;;  %v357_v6 = vlaneseq }
  0x25   : > { %778 = vmatpush1.bf16.msra.mxu0 %v777_v0  ;;  %832 = vmatprep.subr.bf16.mxu1 %v831_v38  ;;  %v476_v0 = vld [vmem:[%s1392_s3 + $0xe0] sm:$0xff]  ;;  %v352_v18 = vld [vmem:[%s1390_s1 + $0x1e8] sm:$0xff]  ;;  %v805_v21 = vpack.c.bf16 %v349_v15, %v347_v10  ;;  %v486_v25 = vld [vmem:[%s1392_s3 + $0x130] sm:$0xff] }
  0x26   : > { %780 = vmatprep.subr.bf16.mxu0 %v779_v5  ;;  %v483_v5 = vld [vmem:[%s1392_s3 + $0x118] sm:$0xff]  ;;  %v841_v8 = vpack.c.bf16 %v478_v1, %v476_v0  ;;  %v351_v22 = vld [vmem:[%s1390_s1 + $0x1e0] sm:$0xff]  ;;  %v807_v26 = vpack.c.bf16 %v354_v19, %v352_v18  ;;  %v353_v27 = vld [vmem:[%s1390_s1 + $0x1f0] sm:$0xff]  ;;  %v358_v7 = vshrl.u32 %v357_v6, 7 }
  0x27   : > { %v843_v11 = vpack.c.bf16 %v483_v5, %v481_v4  ;;  %v489_v28 = vld [vmem:[%s1392_s3 + $0x148] sm:$0xff]  ;;  %v809_v31 = vpack.c.bf16 %v353_v27, %v351_v22  ;;  %v488_v33 = vld [vmem:[%s1392_s3 + $0x140] sm:$0xff]  ;;  %v490_v34 = vld [vmem:[%s1392_s3 + $0x150] sm:$0xff] }
  0x28   : > { %834 = vmatpush1.bf16.msra.mxu1 %v833_v48  ;;  %v493_v35 = vld [vmem:[%s1392_s3 + $0x168] sm:$0xff]  ;;  %v853_v37 = vpack.c.bf16 %v490_v34, %v488_v33  ;;  %v1288_v38 = vld [vmem:[%s1029_s16] sm:$0xff]  ;;  %v1297_v43 = vld [vmem:[%s1029_s16 + $0x18] sm:$0xff]  ;;  %v1358_v10 = vsub.s32 1, %v358_v7 }
  0x29   : > { %782 = vmatpush1.bf16.msra.mxu0 %v781_v12  ;;  %836 = vmatprep.subr.bf16.mxu1 %v835_v51  ;;  %v480_v12 = vld [vmem:[%s1392_s3 + $0x100] sm:$0xff]  ;;  %v497_v44 = vld [vmem:[%s1392_s3 + $0x188] sm:$0xff]  ;;  %v499_v45 = vld [vmem:[%s1392_s3 + $0x198] sm:$0xff] }
  0x2a   : > { %784 = vmatprep.subr.bf16.mxu0 %v783_v17  ;;  %v487_v17 = vld [vmem:[%s1392_s3 + $0x138] sm:$0xff]  ;;  %v845_v20 = vpack.c.bf16 %v482_v13, %v480_v12  ;;  %v492_v40 = vld [vmem:[%s1392_s3 + $0x160] sm:$0xff]  ;;  %v1308_v47 = vld [vmem:[%s1029_s16 + $0x10] sm:$0xff]  ;;  %v859_v48 = vpack.c.bf16 %v499_v45, %v497_v44 }
  0x2b   : > { %v847_v23 = vpack.c.bf16 %v487_v17, %v485_v16  ;;  %v498_v50 = vld [vmem:[%s1392_s3 + $0x190] sm:$0xff]  ;;  %v501_v51 = vld [vmem:[%s1392_s3 + $0x1a8] sm:$0xff]  ;;  %v503_v52 = vld [vmem:[%s1392_s3 + $0x1b8] sm:$0xff] }
  0x2c   : > { %838 = vmatpush1.bf16.msra.mxu1 %v837_v60  ;;  %v500_v55 = vld [vmem:[%s1392_s3 + $0x1a0] sm:$0xff]  ;;  %v502_v56 = vld [vmem:[%s1392_s3 + $0x1b0] sm:$0xff]  ;;  %v505_v57 = vld [vmem:[%s1392_s3 + $0x1c8] sm:$0xff] }
  0x2d   : > { %786 = vmatpush1.bf16.msra.mxu0 %v785_v24  ;;  %840 = vmatprep.subr.bf16.mxu1 %v839_v63  ;;  %v484_v24 = vld [vmem:[%s1392_s3 + $0x120] sm:$0xff]  ;;  %v507_v58 = vld [vmem:[%s1392_s3 + $0x1d8] sm:$0xff]  ;;  %v865_v59 = vpack.c.bf16 %v502_v56, %v500_v55  ;;  %v506_v62 = vld [vmem:[%s1392_s3 + $0x1d0] sm:$0xff] }
  0x2e   : > { %788 = vmatprep.subr.bf16.mxu0 %v787_v29  ;;  %v491_v29 = vld [vmem:[%s1392_s3 + $0x158] sm:$0xff]  ;;  %v849_v30 = vpack.c.bf16 %v486_v25, %v484_v24  ;;  %v867_v60 = vpack.c.bf16 %v507_v58, %v505_v57  ;;  %v509_v0 = vld [vmem:[%s1392_s3 + $0x1e8] sm:$0xff]  ;;  %v508_v3 = vld [vmem:[%s1392_s3 + $0x1e0] sm:$0xff] }
  0x2f   : > { %v851_v32 = vpack.c.bf16 %v491_v29, %v489_v28  ;;  %v511_v1 = vld [vmem:[%s1392_s3 + $0x1f8] sm:$0xff]  ;;  %v510_v4 = vld [vmem:[%s1392_s3 + $0x1f0] sm:$0xff]  ;;  %v512_v25 = vld [vmem:[%s1393_s4] sm:$0x3] }
  0x30   : > { %842 = vmatpush1.bf16.msra.mxu1 %v841_v8  ;;  %v873_v5 = vpack.c.bf16 %v510_v4, %v508_v3  ;;  %v1353_v8 = vsub.s32 0, %v358_v7  ;;  %v521_v27 = vrot.slane %v512_v25, %v1358_v10 }
  0x31   : > { %790 = vmatpush1.bf16.msra.mxu0 %v789_v36  ;;  %844 = vmatprep.subr.bf16.mxu1 %v843_v11  ;;  %v495_v36 = vld [vmem:[%s1392_s3 + $0x178] sm:$0xff] }
  0x32   : > { %792 = vmatprep.subr.bf16.mxu0 %v791_v42  ;;  %v855_v39 = vpack.c.bf16 %v495_v36, %v493_v35  ;;  %v494_v42 = vld [vmem:[%s1392_s3 + $0x170] sm:$0xff] }
  0x33   : > { %v857_v46 = vpack.c.bf16 %v494_v42, %v492_v40 }
  0x34   : > { %846 = vmatpush1.bf16.msra.mxu1 %v845_v20 }
  0x35   : > { %794 = vmatpush1.bf16.msra.mxu0 %v793_v49  ;;  %848 = vmatprep.subr.bf16.mxu1 %v847_v23  ;;  %v496_v49 = vld [vmem:[%s1392_s3 + $0x180] sm:$0xff] }
  0x36   : > { %796 = vmatprep.subr.bf16.mxu0 %v795_v54  ;;  %v861_v53 = vpack.c.bf16 %v498_v50, %v496_v49  ;;  %v863_v54 = vpack.c.bf16 %v503_v52, %v501_v51 }
  0x38   : > { %850 = vmatpush1.bf16.msra.mxu1 %v849_v30 }
  0x39   : > { %798 = vmatpush1.bf16.msra.mxu0 %v797_v61  ;;  %852 = vmatprep.subr.bf16.mxu1 %v851_v32  ;;  %v504_v61 = vld [vmem:[%s1392_s3 + $0x1c0] sm:$0xff] }
  0x3a   : > { %800 = vmatprep.subr.bf16.mxu0 %v799_v2  ;;  %v869_v63 = vpack.c.bf16 %v506_v62, %v504_v61  ;;  %v871_v2 = vpack.c.bf16 %v511_v1, %v509_v0  ;;  %v605_v62 = vld [vmem:[%s1394_s5] sm:$0x3] }
  0x3b   : > { %v644_v0 = vrot.slane %v605_v62, %v1353_v8  ;;  %v648_v1 = vrot.slane %v605_v62, %v1358_v10 }
  0x3c   : > { %854 = vmatpush1.bf16.msra.mxu1 %v853_v37 }
  0x3d   : > { %802 = vmatpush1.bf16.msra.mxu0 %v801_v9  ;;  %856 = vmatprep.subr.bf16.mxu1 %v855_v39  ;;  %v355_v9 = vld [vmem:[%s1391_s2] sm:$0x3] }
  0x3e   : > { %804 = vmatprep.subr.bf16.mxu0 %v803_v14  ;;  %v360_v11 = vrot.slane %v355_v9, %v1353_v8  ;;  %v364_v12 = vrot.slane %v355_v9, %v1358_v10 }
  0x40   : > { %858 = vmatpush1.bf16.msra.mxu1 %v857_v46 }
  0x41   : > { %806 = vmatpush1.bf16.msra.mxu0 %v805_v21  ;;  %860 = vmatprep.subr.bf16.mxu1 %v859_v48 }
  0x42   : > { %808 = vmatprep.subr.bf16.mxu0 %v807_v26  ;;  %v517_v26 = vrot.slane %v512_v25, %v1353_v8 }
  0x44   : > { %862 = vmatpush1.bf16.msra.mxu1 %v861_v53 }
  0x45   : > { %810 = vmatpush1.bf16.msra.mxu0 %v809_v31  ;;  %864 = vmatprep.subr.bf16.mxu1 %v863_v54 }
  0x48   : > { %432 = vmatmul.mubr.f32.vlgmr.msra.gmra.mrb[0].mxu0 %v1288_v38  ;;  %866 = vmatpush1.bf16.msra.mxu1 %v865_v59 }
  0x49   : > { %437 = vmatprep.mubr.f32.mxu0 %v1297_v43  ;;  %868 = vmatprep.subr.bf16.mxu1 %v867_v60 }
  0x4c   : > { %438 = vmatmul.mubr.f32.gmra.mrb[2].mxu0 %v1308_v47  ;;  %870 = vmatpush1.bf16.msra.mxu1 %v869_v63  ;;  %v606_v63 = vld [vmem:[%s1395_s6] sm:$0x3] }
  0x4d   : > { %872 = vmatprep.subr.bf16.mxu1 %v871_v2  ;;  %v659_v3 = vrot.slane %v606_v63, %v1353_v8  ;;  %v663_v4 = vrot.slane %v606_v63, %v1358_v10 }
  0x50   : > { %874 = vmatpush1.bf16.msra.mxu1 %v873_v5 }
 0x11b   : > { %v433_v13 = vpop.f32.mrb[0].mxu0 }
 0x11c   : > { %v434_v14 = vadd.f32 %v433_v13, %v360_v11  ;;  %v435_v15 = vpop.f32.mrb[1].mxu0 }
 0x11d   : > { %v436_v16 = vadd.f32 %v435_v15, %v364_v12 }
 0x11e   : > { %v444_v19 = vmax.f32 %v434_v14, 0.0 }
 0x11f   : > { %v439_v17 = vpop.f32.mrb[2].mxu0  ;;  %v445_v18 = vmax.f32 %v436_v16, 0.0 }
 0x120   : > { %v440_v20 = vadd.f32 %v439_v17, %v360_v11  ;;  %v441_v21 = vpop.f32.mrb[3].mxu0 }
 0x121   : > { %v442_v22 = vadd.f32 %v441_v21, %v364_v12  ;;  %588 = vmatprep.mubr.f32.mxu1 %v445_v18 }
 0x122   : > { %589 = vmatmul.mubr.f32.vlgmr.msra.gmra.mrb[0].mxu1 %v444_v19  ;;  %v446_v24 = vmax.f32 %v440_v20, 0.0 }
 0x123   : > { %v447_v23 = vmax.f32 %v442_v22, 0.0 }
 0x125   : > { %594 = vmatprep.mubr.f32.mxu1 %v447_v23 }
 0x126   : > { %595 = vmatmul.mubr.f32.gmra.mrb[2].mxu1 %v446_v24 }
 0x1f5   : > { %v590_v28 = vpop.f32.mrb[0].mxu1 }
 0x1f6   : > { %v591_v29 = vadd.f32 %v590_v28, %v517_v26  ;;  %v592_v30 = vpop.f32.mrb[1].mxu1 }
 0x1f7   : > { %v593_v31 = vadd.f32 %v592_v30, %v521_v27 }
 0x1f8   : > { %v601_v32 = vadd.f32 %v591_v29, %v1288_v38 }
 0x1f9   : > { %v596_v33 = vpop.f32.mrb[2].mxu1  ;;  %v602_v34 = vadd.f32 %v593_v31, %v1038_v41 }
 0x1fa   : > { %v597_v35 = vadd.f32 %v596_v33, %v517_v26  ;;  %v598_v36 = vpop.f32.mrb[3].mxu1 }
 0x1fb   : > { %v599_v37 = vadd.f32 %v598_v36, %v521_v27  ;;  %v607_v39 = vadd.f32 %v602_v34, %v601_v32 }
 0x1fc   : > { %v603_v40 = vadd.f32 %v597_v35, %v1308_v47 }
 0x1fd   : > { %v604_v42 = vadd.f32 %v599_v37, %v1297_v43  ;;  %608 = vadd.xlane.f32.xlu0 %v607_v39 }
 0x1ff   : > { %v610_v44 = vadd.f32 %v604_v42, %v603_v40 }
 0x201   : > { %611 = vadd.xlane.f32.xlu0 %v610_v44 }
 0x28a   : > { %v609_v45 = vpop.xlane.xlu0 %608 }
 0x28b   : > { %v614_v46 = vmul.f32 0.00390625, %v609_v45 }
 0x28d   : > { %v616_v48 = vsub.f32 %v601_v32, %v614_v46  ;;  %v617_v49 = vsub.f32 %v602_v34, %v614_v46 }
 0x28e   : > { %v612_v50 = vpop.xlane.xlu0 %611 }
 0x28f   : > { %v615_v38 = vmul.f32 0.00390625, %v612_v50  ;;  %v620_v51 = vmul.f32 %v616_v48, %v616_v48  ;;  %v621_v52 = vmul.f32 %v617_v49, %v617_v49 }
 0x291   : > { %v618_v41 = vsub.f32 %v603_v40, %v615_v38  ;;  %v619_v53 = vsub.f32 %v604_v42, %v615_v38  ;;  %v624_v54 = vadd.f32 %v621_v52, %v620_v51 }
 0x293   : > { %625 = vadd.xlane.f32.xlu1 %v624_v54  ;;  %v622_v55 = vmul.f32 %v618_v41, %v618_v41  ;;  %v623_v56 = vmul.f32 %v619_v53, %v619_v53 }
 0x295   : > { %v627_v47 = vadd.f32 %v623_v56, %v622_v55 }
 0x297   : > { %628 = vadd.xlane.f32.xlu1 %v627_v47 }
 0x320   : > { %v626_v43 = vpop.xlane.xlu1 %625 }
 0x321   : > { %v630_v57 = vmul.f32 0.00390625, %v626_v43 }
 0x323   : > { %v632_v58 = vadd.f32 1e-05, %v630_v57 }
 0x324   : > { %v629_v59 = vpop.xlane.xlu1 %628 }
 0x325   : > { %883 = vrsqrt.f32 %v632_v58  ;;  %v631_v60 = vmul.f32 0.00390625, %v629_v59 }
 0x327   : > { %v633_v61 = vadd.f32 1e-05, %v631_v60 }
 0x329   : > { %885 = vrsqrt.f32 %v633_v61 }
 0x32f   : > { %v884_v2 = vpop.eup %883 }
 0x330   : > { %v636_v5 = vmul.f32 %v884_v2, %v616_v48  ;;  %v637_v6 = vmul.f32 %v884_v2, %v617_v49 }
 0x332   : > { %v651_v7 = vmul.f32 %v644_v0, %v636_v5  ;;  %v652_v9 = vmul.f32 %v648_v1, %v637_v6 }
 0x333   : > { %v886_v11 = vpop.eup %885 }
 0x334   : > { %v666_v12 = vadd.f32 %v659_v3, %v651_v7  ;;  %v667_v13 = vadd.f32 %v663_v4, %v652_v9  ;;  %v638_v14 = vmul.f32 %v886_v11, %v618_v41  ;;  %v639_v15 = vmul.f32 %v886_v11, %v619_v53 }
 0x336   : > { %670 = vst [vmem:[%s285_s20] sm:$0xff] %v666_v12  ;;  %671 = vst [vmem:[%s285_s20 + $0x8] sm:$0xff] %v667_v13  ;;  %v653_v16 = vmul.f32 %v644_v0, %v638_v14  ;;  %v654_v8 = vmul.f32 %v648_v1, %v639_v15 }
 0x338   : > { %v668_v17 = vadd.f32 %v659_v3, %v653_v16  ;;  %v669_v10 = vadd.f32 %v663_v4, %v654_v8 }
 0x33a   : > { %672 = vst [vmem:[%s285_s20 + $0x10] sm:$0xff] %v668_v17  ;;  %673 = vst [vmem:[%s285_s20 + $0x18] sm:$0xff] %v669_v10 }
 0x33b PF: > { %s17_s24 = sadd.s32 1, %s893_s24  }
 0x33c   : > { %p14_p4 = scmp.ge.s32.totalorder %s17_s24, 4  }
 0x33e   :  { %16 = sbr.rel (!%p14_p4) target bundleno = 1 (0x1), region = 78 }

</bundles_post_ra>
